<compile_context>
chip_gen: v7x
topology: tpu7x:2x2x1
jax: 0.10.0
libtpu: 0.0.40
codegen_flags: <defaults>
</compile_context>

<pallas_src>
import functools

import jax
import jax.numpy as jnp
from jax.experimental import pallas as pl
from jax.experimental.pallas import tpu as pltpu


# Per-layer parameter orderings (flattening order == packing order).
ENC_KEYS = ("wqkv", "bqkv", "wo", "bo",
            "norm1_g", "norm1_b",
            "ff_w1", "ff_b1", "ff_w2", "ff_b2",
            "norm2_g", "norm2_b")
DEC_KEYS = ("sa_wqkv", "sa_bqkv", "sa_wo", "sa_bo",
            "norm1_g", "norm1_b",
            "ca_wqkv", "ca_bqkv", "ca_wo", "ca_bo",
            "norm2_g", "norm2_b",
            "ff_w1", "ff_b1", "ff_w2", "ff_b2",
            "norm3_g", "norm3_b")


# --------------------------- parameter packing --------------------------------

def pack_params(params, num_heads):
    """One-time preprocessing (run OUTSIDE the jitted forward).

    * Folds the 1/sqrt(head_dim) attention scale into the Q columns of every
      qkv projection (weight and bias).
    * Packs every parameter into a single f32 slab of shape (rows, 128):
      each array starts at an 8-aligned row and occupies its natural column
      count (rest zero padded), so the whole model is a single DMA and the
      kernel unpacks with static slices.

    Returns (slab, layout) with layout[name] = (row_offset, nrows, ncols).
    """
    D = params["proj_w"].shape[0]
    scale = 1.0 / float(D // num_heads) ** 0.5

    def fold(lp, wk, bk):
        lp = dict(lp)
        lp[wk] = lp[wk].at[:, :D].multiply(scale)
        lp[bk] = lp[bk].at[:, :D].multiply(scale)
        return lp

    flat = []
    for i, lp in enumerate(params["encoder"]):
        lp = fold(lp, "wqkv", "bqkv")
        for k in ENC_KEYS:
            flat.append((f"enc{i}/{k}", lp[k]))
    for i, lp in enumerate(params["decoder"]):
        lp = fold(fold(lp, "sa_wqkv", "sa_bqkv"), "ca_wqkv", "ca_bqkv")
        for k in DEC_KEYS:
            flat.append((f"dec{i}/{k}", lp[k]))
    flat.append(("proj_w", params["proj_w"]))
    flat.append(("proj_b", params["proj_b"]))

    max_cols = max(a.shape[1] for _, a in flat)
    cols = max(128, 128 * ((max_cols + 127) // 128))   # lane-aligned slab width

    layout = {}
    blocks = []
    row = 0
    for name, a in flat:
        r, c = a.shape
        rp = 8 * ((r + 7) // 8)                         # sublane-aligned rows
        blk = jnp.zeros((rp, cols), jnp.float32).at[:r, :c].set(
            a.astype(jnp.float32))
        blocks.append(blk)
        layout[name] = (row, r, c)
        row += rp
    slab = jnp.concatenate(blocks, axis=0)
    return slab, layout


# ------------------------------ fused kernel ----------------------------------

def _make_kernel(layout, num_enc, num_dec, num_heads, B, S, D):
    Dh = D // num_heads

    def read(w_ref, name):
        off, nr, nc = layout[name]
        return w_ref[off:off + nr, :nc]                 # static slice of the slab

    def layer_norm(y, g, b):
        # LN over last dim, eps = 1e-5 (PyTorch default), f32 math.
        mu = jnp.mean(y, axis=-1, keepdims=True)
        var = jnp.mean(jnp.square(y - mu), axis=-1, keepdims=True)
        return (y - mu) * jax.lax.rsqrt(var + 1e-5) * g + b

    def split_heads(t):
        # (B*S, D) -> (B*num_heads, S, Dh) via static slices (no reshapes).
        return jnp.stack(
            [t[b * S:(b + 1) * S, h * Dh:(h + 1) * Dh]
             for b in range(B) for h in range(num_heads)], axis=0)

    def merge_heads(o):
        # (B*num_heads, S, Dh) -> (B*S, D), entirely in registers (no scratch).
        return jnp.concatenate(
            [jnp.concatenate([o[b * num_heads + h] for h in range(num_heads)],
                             axis=-1)
             for b in range(B)], axis=0)

    def mha(x_q, x_kv, w_ref, pre, self_attn):
        wqkv = read(w_ref, pre + "wqkv")                # (D, 3D)
        bqkv = read(w_ref, pre + "bqkv")                # (1, 3D)
        if self_attn:
            # One (B*S, D) @ (D, 3D) matmul for Q, K, V.
            qkv = jnp.dot(x_q, wqkv, preferred_element_type=jnp.float32) + bqkv
            q, k, v = qkv[:, :D], qkv[:, D:2 * D], qkv[:, 2 * D:]
        else:
            # Cross-attention: Q from x_q, K/V from x_kv (same weight layout).
            q = (jnp.dot(x_q, wqkv[:, :D], preferred_element_type=jnp.float32)
                 + bqkv[:, :D])
            kv = (jnp.dot(x_kv, wqkv[:, D:], preferred_element_type=jnp.float32)
                  + bqkv[:, D:])
            k, v = kv[:, :D], kv[:, D:]
        # NOTE: 1/sqrt(Dh) is already folded into the Q weights/bias (pack time).

        # All (batch, head) pairs batched into ONE pair of dot_generals plus a
        # single fused softmax over the whole (B*H, S, S) score tensor.
        qh, kh, vh = split_heads(q), split_heads(k), split_heads(v)
        s = jnp.einsum("bqd,bkd->bqk", qh, kh,
                       preferred_element_type=jnp.float32)       # (B*H, S, S)
        s = s - jnp.max(s, axis=-1, keepdims=True)
        p = jnp.exp(s)
        p = p / jnp.sum(p, axis=-1, keepdims=True)               # exact softmax
        o = jnp.einsum("bqk,bkd->bqd", p, vh,
                       preferred_element_type=jnp.float32)       # (B*H, S, Dh)
        attn = merge_heads(o)                                    # (B*S, D)

        wo = read(w_ref, pre + "wo")
        bo = read(w_ref, pre + "bo")
        return jnp.dot(attn, wo, preferred_element_type=jnp.float32) + bo

    def ffn(x, w_ref, pre):
        w1, b1 = read(w_ref, pre + "ff_w1"), read(w_ref, pre + "ff_b1")
        w2, b2 = read(w_ref, pre + "ff_w2"), read(w_ref, pre + "ff_b2")
        h = jnp.maximum(
            jnp.dot(x, w1, preferred_element_type=jnp.float32) + b1, 0.0)
        return jnp.dot(h, w2, preferred_element_type=jnp.float32) + b2

    def enc_layer(x, w_ref, i):
        pre = f"enc{i}/"
        a = mha(x, x, w_ref, pre, self_attn=True)
        x = layer_norm(x + a, read(w_ref, pre + "norm1_g"),
                       read(w_ref, pre + "norm1_b"))
        f = ffn(x, w_ref, pre)
        return layer_norm(x + f, read(w_ref, pre + "norm2_g"),
                          read(w_ref, pre + "norm2_b"))

    def dec_layer(x, mem, w_ref, i):
        pre = f"dec{i}/"
        a = mha(x, x, w_ref, pre + "sa_", self_attn=True)
        x = layer_norm(x + a, read(w_ref, pre + "norm1_g"),
                       read(w_ref, pre + "norm1_b"))
        c = mha(x, mem, w_ref, pre + "ca_", self_attn=False)
        x = layer_norm(x + c, read(w_ref, pre + "norm2_g"),
                       read(w_ref, pre + "norm2_b"))
        f = ffn(x, w_ref, pre)
        return layer_norm(x + f, read(w_ref, pre + "norm3_g"),
                          read(w_ref, pre + "norm3_b"))

    def kernel(src_ref, tgt_ref, w_ref, out_ref):
        x = src_ref[...]        # (B*S, D)  all batch rows, one invocation
        tgt = tgt_ref[...]      # (B*S, D)

        mem = x
        for i in range(num_enc):
            mem = enc_layer(mem, w_ref, i)

        # PyTorch module calls self.decoder(memory, tgt):
        #   decoder *target* = encoder output, decoder *memory* = tgt.
        out = mem
        for i in range(num_dec):
            out = dec_layer(out, tgt, w_ref, i)

        pw, pb = read(w_ref, "proj_w"), read(w_ref, "proj_b")
        out_ref[...] = (jnp.dot(out, pw, preferred_element_type=jnp.float32)
                        + pb)

    return kernel


# -------------------------------- wrapper --------------------------------------

def transformer_latent_forward(packed, src, tgt, *, layout, num_heads,
                               num_enc, num_dec):
    B, S, D = src.shape
    R, C = packed.shape
    src2d = src.reshape(B * S, D)
    tgt2d = tgt.reshape(B * S, D)

    kernel = _make_kernel(layout, num_enc, num_dec, num_heads, B, S, D)

    # Single grid step: all activations + the one packed weight slab live in
    # VMEM for the whole forward pass (<< VMEM on every TPU generation).
    out2d = pl.pallas_call(
        kernel,
        out_shape=jax.ShapeDtypeStruct((B * S, D), jnp.float32),
        grid=(1,),
        in_specs=[
            pl.BlockSpec((B * S, D), lambda i: (0, 0)),   # src (all rows)
            pl.BlockSpec((B * S, D), lambda i: (0, 0)),   # tgt (all rows)
            pl.BlockSpec((R, C), lambda i: (0, 0)),       # packed parameter slab
        ],
        out_specs=pl.BlockSpec((B * S, D), lambda i: (0, 0)),
        compiler_params=pltpu.CompilerParams(
            dimension_semantics=("arbitrary",)),
    )(src2d, tgt2d, packed)

    return out2d.reshape(B, S, D)


# --------------------------- pure-JAX reference ---------------------------------

def _reference_forward(params, src, tgt, num_heads):
    D = src.shape[-1]
    Dh = D // num_heads
    scale = 1.0 / float(Dh) ** 0.5

    def ln(x, g, b):
        mu = jnp.mean(x, -1, keepdims=True)
        var = jnp.mean(jnp.square(x - mu), -1, keepdims=True)
        return (x - mu) / jnp.sqrt(var + 1e-5) * g + b

    def mha(xq, xkv, wqkv, bqkv, wo, bo):
        B, Sq, _ = xq.shape
        Sk = xkv.shape[1]
        q = (xq @ wqkv[:, :D] + bqkv[:, :D]) * scale
        k = xkv @ wqkv[:, D:2 * D] + bqkv[:, D:2 * D]
        v = xkv @ wqkv[:, 2 * D:] + bqkv[:, 2 * D:]

        def split(x, S):
            return x.reshape(B, S, num_heads, Dh).transpose(0, 2, 1, 3)

        qh, kh, vh = split(q, Sq), split(k, Sk), split(v, Sk)
        s = jnp.einsum("bhqd,bhkd->bhqk", qh, kh)
        p = jax.nn.softmax(s, axis=-1)
        o = jnp.einsum("bhqk,bhkd->bhqd", p, vh)
        o = o.transpose(0, 2, 1, 3).reshape(B, Sq, D)
        return o @ wo + bo

    def ffn(x, w1, b1, w2, b2):
        return jnp.maximum(x @ w1 + b1, 0.0) @ w2 + b2

    def enc_layer(x, p):
        a = mha(x, x, p["wqkv"], p["bqkv"], p["wo"], p["bo"])
        x = ln(x + a, p["norm1_g"], p["norm1_b"])
        f = ffn(x, p["ff_w1"], p["ff_b1"], p["ff_w2"], p["ff_b2"])
        return ln(x + f, p["norm2_g"], p["norm2_b"])

    def dec_layer(x, mem, p):
        a = mha(x, x, p["sa_wqkv"], p["sa_bqkv"], p["sa_wo"], p["sa_bo"])
        x = ln(x + a, p["norm1_g"], p["norm1_b"])
        c = mha(x, mem, p["ca_wqkv"], p["ca_bqkv"], p["ca_wo"], p["ca_bo"])
        x = ln(x + c, p["norm2_g"], p["norm2_b"])
        f = ffn(x, p["ff_w1"], p["ff_b1"], p["ff_w2"], p["ff_b2"])
        return ln(x + f, p["norm3_g"], p["norm3_b"])

    mem = src
    for p in params["encoder"]:
        mem = enc_layer(mem, p)
    out = mem
    for p in params["decoder"]:
        out = dec_layer(out, tgt, p)
    return out @ params["proj_w"] + params["proj_b"]


# ----------------------------- parameter init -----------------------------------

def _init(key, shape, scale=0.05):
    return scale * jax.random.normal(key, shape, jnp.float32)


def init_encoder_layer(key, D, H):
    ks = jax.random.split(key, 8)
    ones, zeros = jnp.ones((1, D), jnp.float32), jnp.zeros((1, D), jnp.float32)
    return {
        "wqkv": _init(ks[0], (D, 3 * D)), "bqkv": _init(ks[1], (1, 3 * D)),
        "wo": _init(ks[2], (D, D)), "bo": _init(ks[3], (1, D)),
        "norm1_g": ones, "norm1_b": zeros,
        "ff_w1": _init(ks[4], (D, H)), "ff_b1": _init(ks[5], (1, H)),
        "ff_w2": _init(ks[6], (H, D)), "ff_b2": _init(ks[7], (1, D)),
        "norm2_g": ones, "norm2_b": zeros,
    }


def init_decoder_layer(key, D, H):
    ks = jax.random.split(key, 12)
    ones, zeros = jnp.ones((1, D), jnp.float32), jnp.zeros((1, D), jnp.float32)
    return {
        "sa_wqkv": _init(ks[0], (D, 3 * D)), "sa_bqkv": _init(ks[1], (1, 3 * D)),
        "sa_wo": _init(ks[2], (D, D)), "sa_bo": _init(ks[3], (1, D)),
        "norm1_g": ones, "norm1_b": zeros,
        "ca_wqkv": _init(ks[4], (D, 3 * D)), "ca_bqkv": _init(ks[5], (1, 3 * D)),
        "ca_wo": _init(ks[6], (D, D)), "ca_bo": _init(ks[7], (1, D)),
        "norm2_g": ones, "norm2_b": zeros,
        "ff_w1": _init(ks[8], (D, H)), "ff_b1": _init(ks[9], (1, H)),
        "ff_w2": _init(ks[10], (H, D)), "ff_b2": _init(ks[11], (1, D)),
        "norm3_g": ones, "norm3_b": zeros,
    }


def init_params(key, D, H, num_layers):
    ks = jax.random.split(key, 2 * num_layers + 2)
    enc = [init_encoder_layer(ks[i], D, H) for i in range(num_layers)]
    dec = [init_decoder_layer(ks[num_layers + i], D, H) for i in range(num_layers)]
    return {
        "encoder": enc,
        "decoder": dec,
        "proj_w": _init(ks[-2], (D, D)),
        "proj_b": _init(ks[-1], (1, D)),
    }


# ----------------------------------- main ---------------------------------------

if __name__ == "__main__":
    B, S, LATENT_DIM, NUM_HEADS, NUM_LAYERS, HIDDEN_DIM = 2, 8, 32, 4, 2, 64

    key = jax.random.PRNGKey(0)
    k_params, k_src, k_tgt = jax.random.split(key, 3)

    params = init_params(k_params, LATENT_DIM, HIDDEN_DIM, NUM_LAYERS)
    src = jax.random.normal(k_src, (B, S, LATENT_DIM), jnp.float32)
    tgt = jax.random.normal(k_tgt, (B, S, LATENT_DIM), jnp.float32)

    # One-time parameter preprocessing: scale fold + single-slab packing
    # (deliberately outside the jitted forward).
    packed, layout = pack_params(params, NUM_HEADS)
    packed = jax.block_until_ready(packed)

    fwd = jax.jit(functools.partial(
        transformer_latent_forward, layout=layout, num_heads=NUM_HEADS,
        num_enc=NUM_LAYERS, num_dec=NUM_LAYERS))

    out = fwd(packed, src, tgt)
    jax.block_until_ready(out)

    assert out.shape == (B, S, LATENT_DIM)
    assert out.dtype == jnp.float32
    assert bool(jnp.all(jnp.isfinite(out)))

    # Sanity-check against a pure-JAX reference (exact softmax in the kernel,
    # high-precision reference matmuls; tolerance kept generous for MXU
    # precision differences).
    with jax.default_matmul_precision("highest"):
        ref = _reference_forward(params, src, tgt, NUM_HEADS)
    max_diff = float(jnp.max(jnp.abs(out - ref)))
    assert max_diff < 1e-2, f"max diff vs reference: {max_diff}"

    print("KERNEL_OK")
</pallas_src>

<mosaic_0001>
module attributes {stable_mosaic.version = 11 : i64} {
  func.func @kernel(%arg0: i32, %arg1: memref<16x32xf32, #tpu.memory_space<vmem>>, %arg2: memref<16x32xf32, #tpu.memory_space<vmem>>, %arg3: memref<1128x128xf32, #tpu.memory_space<vmem>>, %arg4: memref<16x32xf32, #tpu.memory_space<vmem>>) attributes {dimension_semantics = [#tpu.dimension_semantics<arbitrary>], iteration_bounds = array<i64: 1>, scalar_prefetch = 0 : i64, scratch_operands = 0 : i64, tpu.core_type = #tpu.core_type<tc>, window_params = [{pipeline_mode = #tpu.pipeline_mode<synchronous>, transform_indices = @transform_0, window_bounds = array<i64: 16, 32>}, {pipeline_mode = #tpu.pipeline_mode<synchronous>, transform_indices = @transform_1, window_bounds = array<i64: 16, 32>}, {pipeline_mode = #tpu.pipeline_mode<synchronous>, transform_indices = @transform_2, window_bounds = array<i64: 1128, 128>}, {pipeline_mode = #tpu.pipeline_mode<synchronous>, transform_indices = @transform_3, window_bounds = array<i64: 16, 32>}]} {
    %c0 = arith.constant 0 : index
    %c0_0 = arith.constant 0 : index
    %0 = vector.load %arg1[%c0, %c0_0] : memref<16x32xf32, #tpu.memory_space<vmem>>, vector<16x32xf32>
    %c0_1 = arith.constant 0 : index
    %c0_2 = arith.constant 0 : index
    %1 = vector.load %arg2[%c0_1, %c0_2] : memref<16x32xf32, #tpu.memory_space<vmem>>, vector<16x32xf32>
    %c0_3 = arith.constant 0 : index
    %c0_4 = arith.constant 0 : index
    %2 = vector.load %arg3[%c0_3, %c0_4] : memref<1128x128xf32, #tpu.memory_space<vmem>>, vector<32x96xf32>
    %c32 = arith.constant 32 : index
    %c0_5 = arith.constant 0 : index
    %3 = vector.load %arg3[%c32, %c0_5] : memref<1128x128xf32, #tpu.memory_space<vmem>>, vector<1x96xf32>
    %cst = arith.constant dense<0.000000e+00> : vector<16x96xf32>
    %4 = tpu.matmul %0, %2, %cst {dimension_numbers = #tpu.dot_dimension_numbers<[1], [0], [0], [1], [0, 0, 1, 1], [], []>} : vector<16x32xf32>, vector<32x96xf32>, vector<16x96xf32> -> vector<16x96xf32>
    %5 = vector.broadcast %3 : vector<1x96xf32> to vector<16x96xf32>
    %6 = arith.addf %4, %5 : vector<16x96xf32>
    %7 = vector.extract_strided_slice %6 {offsets = [0, 0], sizes = [16, 32], strides = [1, 1]} : vector<16x96xf32> to vector<16x32xf32>
    %8 = vector.extract_strided_slice %6 {offsets = [0, 32], sizes = [16, 32], strides = [1, 1]} : vector<16x96xf32> to vector<16x32xf32>
    %9 = vector.extract_strided_slice %6 {offsets = [0, 64], sizes = [16, 32], strides = [1, 1]} : vector<16x96xf32> to vector<16x32xf32>
    %10 = vector.extract_strided_slice %7 {offsets = [0, 0], sizes = [8, 8], strides = [1, 1]} : vector<16x32xf32> to vector<8x8xf32>
    %11 = vector.extract_strided_slice %7 {offsets = [0, 8], sizes = [8, 8], strides = [1, 1]} : vector<16x32xf32> to vector<8x8xf32>
    %12 = vector.extract_strided_slice %7 {offsets = [0, 16], sizes = [8, 8], strides = [1, 1]} : vector<16x32xf32> to vector<8x8xf32>
    %13 = vector.extract_strided_slice %7 {offsets = [0, 24], sizes = [8, 8], strides = [1, 1]} : vector<16x32xf32> to vector<8x8xf32>
    %14 = vector.extract_strided_slice %7 {offsets = [8, 0], sizes = [8, 8], strides = [1, 1]} : vector<16x32xf32> to vector<8x8xf32>
    %15 = vector.extract_strided_slice %7 {offsets = [8, 8], sizes = [8, 8], strides = [1, 1]} : vector<16x32xf32> to vector<8x8xf32>
    %16 = vector.extract_strided_slice %7 {offsets = [8, 16], sizes = [8, 8], strides = [1, 1]} : vector<16x32xf32> to vector<8x8xf32>
    %17 = vector.extract_strided_slice %7 {offsets = [8, 24], sizes = [8, 8], strides = [1, 1]} : vector<16x32xf32> to vector<8x8xf32>
    %18 = vector.shape_cast %10 : vector<8x8xf32> to vector<1x8x8xf32>
    %19 = vector.shape_cast %11 : vector<8x8xf32> to vector<1x8x8xf32>
    %20 = vector.shape_cast %12 : vector<8x8xf32> to vector<1x8x8xf32>
    %21 = vector.shape_cast %13 : vector<8x8xf32> to vector<1x8x8xf32>
    %22 = vector.shape_cast %14 : vector<8x8xf32> to vector<1x8x8xf32>
    %23 = vector.shape_cast %15 : vector<8x8xf32> to vector<1x8x8xf32>
    %24 = vector.shape_cast %16 : vector<8x8xf32> to vector<1x8x8xf32>
    %25 = vector.shape_cast %17 : vector<8x8xf32> to vector<1x8x8xf32>
    %26 = tpu.concatenate %18, %19, %20, %21, %22, %23, %24, %25 in 0 : vector<1x8x8xf32>, vector<1x8x8xf32>, vector<1x8x8xf32>, vector<1x8x8xf32>, vector<1x8x8xf32>, vector<1x8x8xf32>, vector<1x8x8xf32>, vector<1x8x8xf32> -> vector<8x8x8xf32>
    %27 = vector.extract_strided_slice %8 {offsets = [0, 0], sizes = [8, 8], strides = [1, 1]} : vector<16x32xf32> to vector<8x8xf32>
    %28 = vector.extract_strided_slice %8 {offsets = [0, 8], sizes = [8, 8], strides = [1, 1]} : vector<16x32xf32> to vector<8x8xf32>
    %29 = vector.extract_strided_slice %8 {offsets = [0, 16], sizes = [8, 8], strides = [1, 1]} : vector<16x32xf32> to vector<8x8xf32>
    %30 = vector.extract_strided_slice %8 {offsets = [0, 24], sizes = [8, 8], strides = [1, 1]} : vector<16x32xf32> to vector<8x8xf32>
    %31 = vector.extract_strided_slice %8 {offsets = [8, 0], sizes = [8, 8], strides = [1, 1]} : vector<16x32xf32> to vector<8x8xf32>
    %32 = vector.extract_strided_slice %8 {offsets = [8, 8], sizes = [8, 8], strides = [1, 1]} : vector<16x32xf32> to vector<8x8xf32>
    %33 = vector.extract_strided_slice %8 {offsets = [8, 16], sizes = [8, 8], strides = [1, 1]} : vector<16x32xf32> to vector<8x8xf32>
    %34 = vector.extract_strided_slice %8 {offsets = [8, 24], sizes = [8, 8], strides = [1, 1]} : vector<16x32xf32> to vector<8x8xf32>
    %35 = vector.shape_cast %27 : vector<8x8xf32> to vector<1x8x8xf32>
    %36 = vector.shape_cast %28 : vector<8x8xf32> to vector<1x8x8xf32>
    %37 = vector.shape_cast %29 : vector<8x8xf32> to vector<1x8x8xf32>
    %38 = vector.shape_cast %30 : vector<8x8xf32> to vector<1x8x8xf32>
    %39 = vector.shape_cast %31 : vector<8x8xf32> to vector<1x8x8xf32>
    %40 = vector.shape_cast %32 : vector<8x8xf32> to vector<1x8x8xf32>
    %41 = vector.shape_cast %33 : vector<8x8xf32> to vector<1x8x8xf32>
    %42 = vector.shape_cast %34 : vector<8x8xf32> to vector<1x8x8xf32>
    %43 = tpu.concatenate %35, %36, %37, %38, %39, %40, %41, %42 in 0 : vector<1x8x8xf32>, vector<1x8x8xf32>, vector<1x8x8xf32>, vector<1x8x8xf32>, vector<1x8x8xf32>, vector<1x8x8xf32>, vector<1x8x8xf32>, vector<1x8x8xf32> -> vector<8x8x8xf32>
    %44 = vector.extract_strided_slice %9 {offsets = [0, 0], sizes = [8, 8], strides = [1, 1]} : vector<16x32xf32> to vector<8x8xf32>
    %45 = vector.extract_strided_slice %9 {offsets = [0, 8], sizes = [8, 8], strides = [1, 1]} : vector<16x32xf32> to vector<8x8xf32>
    %46 = vector.extract_strided_slice %9 {offsets = [0, 16], sizes = [8, 8], strides = [1, 1]} : vector<16x32xf32> to vector<8x8xf32>
    %47 = vector.extract_strided_slice %9 {offsets = [0, 24], sizes = [8, 8], strides = [1, 1]} : vector<16x32xf32> to vector<8x8xf32>
    %48 = vector.extract_strided_slice %9 {offsets = [8, 0], sizes = [8, 8], strides = [1, 1]} : vector<16x32xf32> to vector<8x8xf32>
    %49 = vector.extract_strided_slice %9 {offsets = [8, 8], sizes = [8, 8], strides = [1, 1]} : vector<16x32xf32> to vector<8x8xf32>
    %50 = vector.extract_strided_slice %9 {offsets = [8, 16], sizes = [8, 8], strides = [1, 1]} : vector<16x32xf32> to vector<8x8xf32>
    %51 = vector.extract_strided_slice %9 {offsets = [8, 24], sizes = [8, 8], strides = [1, 1]} : vector<16x32xf32> to vector<8x8xf32>
    %52 = vector.shape_cast %44 : vector<8x8xf32> to vector<1x8x8xf32>
    %53 = vector.shape_cast %45 : vector<8x8xf32> to vector<1x8x8xf32>
    %54 = vector.shape_cast %46 : vector<8x8xf32> to vector<1x8x8xf32>
    %55 = vector.shape_cast %47 : vector<8x8xf32> to vector<1x8x8xf32>
    %56 = vector.shape_cast %48 : vector<8x8xf32> to vector<1x8x8xf32>
    %57 = vector.shape_cast %49 : vector<8x8xf32> to vector<1x8x8xf32>
    %58 = vector.shape_cast %50 : vector<8x8xf32> to vector<1x8x8xf32>
    %59 = vector.shape_cast %51 : vector<8x8xf32> to vector<1x8x8xf32>
    %60 = tpu.concatenate %52, %53, %54, %55, %56, %57, %58, %59 in 0 : vector<1x8x8xf32>, vector<1x8x8xf32>, vector<1x8x8xf32>, vector<1x8x8xf32>, vector<1x8x8xf32>, vector<1x8x8xf32>, vector<1x8x8xf32>, vector<1x8x8xf32> -> vector<8x8x8xf32>
    "tpu.trace_start"() <{level = 10 : i32, message = "bqd,bkd->bqk"}> : () -> ()
    %cst_6 = arith.constant dense<0.000000e+00> : vector<8x8x8xf32>
    %61 = tpu.matmul %26, %43, %cst_6 {dimension_numbers = #tpu.dot_dimension_numbers<[2], [2], [1], [1], [0, 0, 0, 1, 1, 1], [0], [0]>} : vector<8x8x8xf32>, vector<8x8x8xf32>, vector<8x8x8xf32> -> vector<8x8x8xf32>
    "tpu.trace_stop"() : () -> ()
    %cst_7 = arith.constant dense<0xFF800000> : vector<8x8xf32>
    %62 = vector.multi_reduction <maximumf>, %61, %cst_7 [2] : vector<8x8x8xf32> to vector<8x8xf32>
    %63 = vector.shape_cast %62 : vector<8x8xf32> to vector<8x8x1xf32>
    %64 = vector.broadcast %63 : vector<8x8x1xf32> to vector<8x8x8xf32>
    %65 = arith.subf %61, %64 : vector<8x8x8xf32>
    %66 = math.exp %65 : vector<8x8x8xf32>
    %cst_8 = arith.constant dense<0.000000e+00> : vector<8x8xf32>
    %67 = vector.multi_reduction <add>, %66, %cst_8 [2] : vector<8x8x8xf32> to vector<8x8xf32>
    %68 = vector.shape_cast %67 : vector<8x8xf32> to vector<8x8x1xf32>
    %69 = vector.broadcast %68 : vector<8x8x1xf32> to vector<8x8x8xf32>
    %70 = arith.divf %66, %69 : vector<8x8x8xf32>
    "tpu.trace_start"() <{level = 10 : i32, message = "bqk,bkd->bqd"}> : () -> ()
    %cst_9 = arith.constant dense<0.000000e+00> : vector<8x8x8xf32>
    %71 = tpu.matmul %70, %60, %cst_9 {dimension_numbers = #tpu.dot_dimension_numbers<[2], [1], [1], [2], [0, 0, 0, 1, 1, 2], [0], [0]>} : vector<8x8x8xf32>, vector<8x8x8xf32>, vector<8x8x8xf32> -> vector<8x8x8xf32>
    "tpu.trace_stop"() : () -> ()
    %72 = vector.extract_strided_slice %71 {offsets = [0, 0, 0], sizes = [1, 8, 8], strides = [1, 1, 1]} : vector<8x8x8xf32> to vector<1x8x8xf32>
    %73 = vector.shape_cast %72 : vector<1x8x8xf32> to vector<8x8xf32>
    %74 = vector.extract_strided_slice %71 {offsets = [1, 0, 0], sizes = [1, 8, 8], strides = [1, 1, 1]} : vector<8x8x8xf32> to vector<1x8x8xf32>
    %75 = vector.shape_cast %74 : vector<1x8x8xf32> to vector<8x8xf32>
    %76 = vector.extract_strided_slice %71 {offsets = [2, 0, 0], sizes = [1, 8, 8], strides = [1, 1, 1]} : vector<8x8x8xf32> to vector<1x8x8xf32>
    %77 = vector.shape_cast %76 : vector<1x8x8xf32> to vector<8x8xf32>
    %78 = vector.extract_strided_slice %71 {offsets = [3, 0, 0], sizes = [1, 8, 8], strides = [1, 1, 1]} : vector<8x8x8xf32> to vector<1x8x8xf32>
    %79 = vector.shape_cast %78 : vector<1x8x8xf32> to vector<8x8xf32>
    %80 = tpu.concatenate %73, %75, %77, %79 in 1 : vector<8x8xf32>, vector<8x8xf32>, vector<8x8xf32>, vector<8x8xf32> -> vector<8x32xf32>
    %81 = vector.extract_strided_slice %71 {offsets = [4, 0, 0], sizes = [1, 8, 8], strides = [1, 1, 1]} : vector<8x8x8xf32> to vector<1x8x8xf32>
    %82 = vector.shape_cast %81 : vector<1x8x8xf32> to vector<8x8xf32>
    %83 = vector.extract_strided_slice %71 {offsets = [5, 0, 0], sizes = [1, 8, 8], strides = [1, 1, 1]} : vector<8x8x8xf32> to vector<1x8x8xf32>
    %84 = vector.shape_cast %83 : vector<1x8x8xf32> to vector<8x8xf32>
    %85 = vector.extract_strided_slice %71 {offsets = [6, 0, 0], sizes = [1, 8, 8], strides = [1, 1, 1]} : vector<8x8x8xf32> to vector<1x8x8xf32>
    %86 = vector.shape_cast %85 : vector<1x8x8xf32> to vector<8x8xf32>
    %87 = vector.extract_strided_slice %71 {offsets = [7, 0, 0], sizes = [1, 8, 8], strides = [1, 1, 1]} : vector<8x8x8xf32> to vector<1x8x8xf32>
    %88 = vector.shape_cast %87 : vector<1x8x8xf32> to vector<8x8xf32>
    %89 = tpu.concatenate %82, %84, %86, %88 in 1 : vector<8x8xf32>, vector<8x8xf32>, vector<8x8xf32>, vector<8x8xf32> -> vector<8x32xf32>
    %90 = tpu.concatenate %80, %89 in 0 : vector<8x32xf32>, vector<8x32xf32> -> vector<16x32xf32>
    %c40 = arith.constant 40 : index
    %c0_10 = arith.constant 0 : index
    %91 = vector.load %arg3[%c40, %c0_10] : memref<1128x128xf32, #tpu.memory_space<vmem>>, vector<32x32xf32>
    %c72 = arith.constant 72 : index
    %c0_11 = arith.constant 0 : index
    %92 = vector.load %arg3[%c72, %c0_11] : memref<1128x128xf32, #tpu.memory_space<vmem>>, vector<1x32xf32>
    %cst_12 = arith.constant dense<0.000000e+00> : vector<16x32xf32>
    %93 = tpu.matmul %90, %91, %cst_12 {dimension_numbers = #tpu.dot_dimension_numbers<[1], [0], [0], [1], [0, 0, 1, 1], [], []>} : vector<16x32xf32>, vector<32x32xf32>, vector<16x32xf32> -> vector<16x32xf32>
    %94 = vector.broadcast %92 : vector<1x32xf32> to vector<16x32xf32>
    %95 = arith.addf %93, %94 : vector<16x32xf32>
    %96 = arith.addf %0, %95 : vector<16x32xf32>
    %c80 = arith.constant 80 : index
    %c0_13 = arith.constant 0 : index
    %97 = vector.load %arg3[%c80, %c0_13] : memref<1128x128xf32, #tpu.memory_space<vmem>>, vector<1x32xf32>
    %c88 = arith.constant 88 : index
    %c0_14 = arith.constant 0 : index
    %98 = vector.load %arg3[%c88, %c0_14] : memref<1128x128xf32, #tpu.memory_space<vmem>>, vector<1x32xf32>
    %cst_15 = arith.constant dense<0.000000e+00> : vector<16xf32>
    %99 = vector.multi_reduction <add>, %96, %cst_15 [1] : vector<16x32xf32> to vector<16xf32>
    %100 = vector.shape_cast %99 : vector<16xf32> to vector<16x1xf32>
    %cst_16 = arith.constant 3.200000e+01 : f32
    %101 = vector.broadcast %cst_16 : f32 to vector<16x1xf32>
    %102 = arith.divf %100, %101 : vector<16x1xf32>
    %103 = vector.broadcast %102 : vector<16x1xf32> to vector<16x32xf32>
    %104 = arith.subf %96, %103 : vector<16x32xf32>
    %105 = arith.mulf %104, %104 : vector<16x32xf32>
    %cst_17 = arith.constant dense<0.000000e+00> : vector<16xf32>
    %106 = vector.multi_reduction <add>, %105, %cst_17 [1] : vector<16x32xf32> to vector<16xf32>
    %107 = vector.shape_cast %106 : vector<16xf32> to vector<16x1xf32>
    %cst_18 = arith.constant 3.200000e+01 : f32
    %108 = vector.broadcast %cst_18 : f32 to vector<16x1xf32>
    %109 = arith.divf %107, %108 : vector<16x1xf32>
    %110 = vector.broadcast %102 : vector<16x1xf32> to vector<16x32xf32>
    %111 = arith.subf %96, %110 : vector<16x32xf32>
    %cst_19 = arith.constant 9.99999974E-6 : f32
    %112 = vector.broadcast %cst_19 : f32 to vector<16x1xf32>
    %113 = arith.addf %109, %112 : vector<16x1xf32>
    %114 = math.rsqrt %113 : vector<16x1xf32>
    %115 = vector.broadcast %114 : vector<16x1xf32> to vector<16x32xf32>
    %116 = arith.mulf %111, %115 : vector<16x32xf32>
    %117 = vector.broadcast %97 : vector<1x32xf32> to vector<16x32xf32>
    %118 = arith.mulf %116, %117 : vector<16x32xf32>
    %119 = vector.broadcast %98 : vector<1x32xf32> to vector<16x32xf32>
    %120 = arith.addf %118, %119 : vector<16x32xf32>
    %c96 = arith.constant 96 : index
    %c0_20 = arith.constant 0 : index
    %121 = vector.load %arg3[%c96, %c0_20] : memref<1128x128xf32, #tpu.memory_space<vmem>>, vector<32x64xf32>
    %c128 = arith.constant 128 : index
    %c0_21 = arith.constant 0 : index
    %122 = vector.load %arg3[%c128, %c0_21] : memref<1128x128xf32, #tpu.memory_space<vmem>>, vector<1x64xf32>
    %c136 = arith.constant 136 : index
    %c0_22 = arith.constant 0 : index
    %123 = vector.load %arg3[%c136, %c0_22] : memref<1128x128xf32, #tpu.memory_space<vmem>>, vector<64x32xf32>
    %c200 = arith.constant 200 : index
    %c0_23 = arith.constant 0 : index
    %124 = vector.load %arg3[%c200, %c0_23] : memref<1128x128xf32, #tpu.memory_space<vmem>>, vector<1x32xf32>
    %cst_24 = arith.constant dense<0.000000e+00> : vector<16x64xf32>
    %125 = tpu.matmul %120, %121, %cst_24 {dimension_numbers = #tpu.dot_dimension_numbers<[1], [0], [0], [1], [0, 0, 1, 1], [], []>} : vector<16x32xf32>, vector<32x64xf32>, vector<16x64xf32> -> vector<16x64xf32>
    %126 = vector.broadcast %122 : vector<1x64xf32> to vector<16x64xf32>
    %127 = arith.addf %125, %126 : vector<16x64xf32>
    %cst_25 = arith.constant 0.000000e+00 : f32
    %128 = vector.broadcast %cst_25 : f32 to vector<16x64xf32>
    %129 = arith.maximumf %127, %128 : vector<16x64xf32>
    %cst_26 = arith.constant dense<0.000000e+00> : vector<16x32xf32>
    %130 = tpu.matmul %129, %123, %cst_26 {dimension_numbers = #tpu.dot_dimension_numbers<[1], [0], [0], [1], [0, 0, 1, 1], [], []>} : vector<16x64xf32>, vector<64x32xf32>, vector<16x32xf32> -> vector<16x32xf32>
    %131 = vector.broadcast %124 : vector<1x32xf32> to vector<16x32xf32>
    %132 = arith.addf %130, %131 : vector<16x32xf32>
    %133 = arith.addf %120, %132 : vector<16x32xf32>
    %c208 = arith.constant 208 : index
    %c0_27 = arith.constant 0 : index
    %134 = vector.load %arg3[%c208, %c0_27] : memref<1128x128xf32, #tpu.memory_space<vmem>>, vector<1x32xf32>
    %c216 = arith.constant 216 : index
    %c0_28 = arith.constant 0 : index
    %135 = vector.load %arg3[%c216, %c0_28] : memref<1128x128xf32, #tpu.memory_space<vmem>>, vector<1x32xf32>
    %cst_29 = arith.constant dense<0.000000e+00> : vector<16xf32>
    %136 = vector.multi_reduction <add>, %133, %cst_29 [1] : vector<16x32xf32> to vector<16xf32>
    %137 = vector.shape_cast %136 : vector<16xf32> to vector<16x1xf32>
    %cst_30 = arith.constant 3.200000e+01 : f32
    %138 = vector.broadcast %cst_30 : f32 to vector<16x1xf32>
    %139 = arith.divf %137, %138 : vector<16x1xf32>
    %140 = vector.broadcast %139 : vector<16x1xf32> to vector<16x32xf32>
    %141 = arith.subf %133, %140 : vector<16x32xf32>
    %142 = arith.mulf %141, %141 : vector<16x32xf32>
    %cst_31 = arith.constant dense<0.000000e+00> : vector<16xf32>
    %143 = vector.multi_reduction <add>, %142, %cst_31 [1] : vector<16x32xf32> to vector<16xf32>
    %144 = vector.shape_cast %143 : vector<16xf32> to vector<16x1xf32>
    %cst_32 = arith.constant 3.200000e+01 : f32
    %145 = vector.broadcast %cst_32 : f32 to vector<16x1xf32>
    %146 = arith.divf %144, %145 : vector<16x1xf32>
    %147 = vector.broadcast %139 : vector<16x1xf32> to vector<16x32xf32>
    %148 = arith.subf %133, %147 : vector<16x32xf32>
    %cst_33 = arith.constant 9.99999974E-6 : f32
    %149 = vector.broadcast %cst_33 : f32 to vector<16x1xf32>
    %150 = arith.addf %146, %149 : vector<16x1xf32>
    %151 = math.rsqrt %150 : vector<16x1xf32>
    %152 = vector.broadcast %151 : vector<16x1xf32> to vector<16x32xf32>
    %153 = arith.mulf %148, %152 : vector<16x32xf32>
    %154 = vector.broadcast %134 : vector<1x32xf32> to vector<16x32xf32>
    %155 = arith.mulf %153, %154 : vector<16x32xf32>
    %156 = vector.broadcast %135 : vector<1x32xf32> to vector<16x32xf32>
    %157 = arith.addf %155, %156 : vector<16x32xf32>
    %c224 = arith.constant 224 : index
    %c0_34 = arith.constant 0 : index
    %158 = vector.load %arg3[%c224, %c0_34] : memref<1128x128xf32, #tpu.memory_space<vmem>>, vector<32x96xf32>
    %c256 = arith.constant 256 : index
    %c0_35 = arith.constant 0 : index
    %159 = vector.load %arg3[%c256, %c0_35] : memref<1128x128xf32, #tpu.memory_space<vmem>>, vector<1x96xf32>
    %cst_36 = arith.constant dense<0.000000e+00> : vector<16x96xf32>
    %160 = tpu.matmul %157, %158, %cst_36 {dimension_numbers = #tpu.dot_dimension_numbers<[1], [0], [0], [1], [0, 0, 1, 1], [], []>} : vector<16x32xf32>, vector<32x96xf32>, vector<16x96xf32> -> vector<16x96xf32>
    %161 = vector.broadcast %159 : vector<1x96xf32> to vector<16x96xf32>
    %162 = arith.addf %160, %161 : vector<16x96xf32>
    %163 = vector.extract_strided_slice %162 {offsets = [0, 0], sizes = [16, 32], strides = [1, 1]} : vector<16x96xf32> to vector<16x32xf32>
    %164 = vector.extract_strided_slice %162 {offsets = [0, 32], sizes = [16, 32], strides = [1, 1]} : vector<16x96xf32> to vector<16x32xf32>
    %165 = vector.extract_strided_slice %162 {offsets = [0, 64], sizes = [16, 32], strides = [1, 1]} : vector<16x96xf32> to vector<16x32xf32>
    %166 = vector.extract_strided_slice %163 {offsets = [0, 0], sizes = [8, 8], strides = [1, 1]} : vector<16x32xf32> to vector<8x8xf32>
    %167 = vector.extract_strided_slice %163 {offsets = [0, 8], sizes = [8, 8], strides = [1, 1]} : vector<16x32xf32> to vector<8x8xf32>
    %168 = vector.extract_strided_slice %163 {offsets = [0, 16], sizes = [8, 8], strides = [1, 1]} : vector<16x32xf32> to vector<8x8xf32>
    %169 = vector.extract_strided_slice %163 {offsets = [0, 24], sizes = [8, 8], strides = [1, 1]} : vector<16x32xf32> to vector<8x8xf32>
    %170 = vector.extract_strided_slice %163 {offsets = [8, 0], sizes = [8, 8], strides = [1, 1]} : vector<16x32xf32> to vector<8x8xf32>
    %171 = vector.extract_strided_slice %163 {offsets = [8, 8], sizes = [8, 8], strides = [1, 1]} : vector<16x32xf32> to vector<8x8xf32>
    %172 = vector.extract_strided_slice %163 {offsets = [8, 16], sizes = [8, 8], strides = [1, 1]} : vector<16x32xf32> to vector<8x8xf32>
    %173 = vector.extract_strided_slice %163 {offsets = [8, 24], sizes = [8, 8], strides = [1, 1]} : vector<16x32xf32> to vector<8x8xf32>
    %174 = vector.shape_cast %166 : vector<8x8xf32> to vector<1x8x8xf32>
    %175 = vector.shape_cast %167 : vector<8x8xf32> to vector<1x8x8xf32>
    %176 = vector.shape_cast %168 : vector<8x8xf32> to vector<1x8x8xf32>
    %177 = vector.shape_cast %169 : vector<8x8xf32> to vector<1x8x8xf32>
    %178 = vector.shape_cast %170 : vector<8x8xf32> to vector<1x8x8xf32>
    %179 = vector.shape_cast %171 : vector<8x8xf32> to vector<1x8x8xf32>
    %180 = vector.shape_cast %172 : vector<8x8xf32> to vector<1x8x8xf32>
    %181 = vector.shape_cast %173 : vector<8x8xf32> to vector<1x8x8xf32>
    %182 = tpu.concatenate %174, %175, %176, %177, %178, %179, %180, %181 in 0 : vector<1x8x8xf32>, vector<1x8x8xf32>, vector<1x8x8xf32>, vector<1x8x8xf32>, vector<1x8x8xf32>, vector<1x8x8xf32>, vector<1x8x8xf32>, vector<1x8x8xf32> -> vector<8x8x8xf32>
    %183 = vector.extract_strided_slice %164 {offsets = [0, 0], sizes = [8, 8], strides = [1, 1]} : vector<16x32xf32> to vector<8x8xf32>
    %184 = vector.extract_strided_slice %164 {offsets = [0, 8], sizes = [8, 8], strides = [1, 1]} : vector<16x32xf32> to vector<8x8xf32>
    %185 = vector.extract_strided_slice %164 {offsets = [0, 16], sizes = [8, 8], strides = [1, 1]} : vector<16x32xf32> to vector<8x8xf32>
    %186 = vector.extract_strided_slice %164 {offsets = [0, 24], sizes = [8, 8], strides = [1, 1]} : vector<16x32xf32> to vector<8x8xf32>
    %187 = vector.extract_strided_slice %164 {offsets = [8, 0], sizes = [8, 8], strides = [1, 1]} : vector<16x32xf32> to vector<8x8xf32>
    %188 = vector.extract_strided_slice %164 {offsets = [8, 8], sizes = [8, 8], strides = [1, 1]} : vector<16x32xf32> to vector<8x8xf32>
    %189 = vector.extract_strided_slice %164 {offsets = [8, 16], sizes = [8, 8], strides = [1, 1]} : vector<16x32xf32> to vector<8x8xf32>
    %190 = vector.extract_strided_slice %164 {offsets = [8, 24], sizes = [8, 8], strides = [1, 1]} : vector<16x32xf32> to vector<8x8xf32>
    %191 = vector.shape_cast %183 : vector<8x8xf32> to vector<1x8x8xf32>
    %192 = vector.shape_cast %184 : vector<8x8xf32> to vector<1x8x8xf32>
    %193 = vector.shape_cast %185 : vector<8x8xf32> to vector<1x8x8xf32>
    %194 = vector.shape_cast %186 : vector<8x8xf32> to vector<1x8x8xf32>
    %195 = vector.shape_cast %187 : vector<8x8xf32> to vector<1x8x8xf32>
    %196 = vector.shape_cast %188 : vector<8x8xf32> to vector<1x8x8xf32>
    %197 = vector.shape_cast %189 : vector<8x8xf32> to vector<1x8x8xf32>
    %198 = vector.shape_cast %190 : vector<8x8xf32> to vector<1x8x8xf32>
    %199 = tpu.concatenate %191, %192, %193, %194, %195, %196, %197, %198 in 0 : vector<1x8x8xf32>, vector<1x8x8xf32>, vector<1x8x8xf32>, vector<1x8x8xf32>, vector<1x8x8xf32>, vector<1x8x8xf32>, vector<1x8x8xf32>, vector<1x8x8xf32> -> vector<8x8x8xf32>
    %200 = vector.extract_strided_slice %165 {offsets = [0, 0], sizes = [8, 8], strides = [1, 1]} : vector<16x32xf32> to vector<8x8xf32>
    %201 = vector.extract_strided_slice %165 {offsets = [0, 8], sizes = [8, 8], strides = [1, 1]} : vector<16x32xf32> to vector<8x8xf32>
    %202 = vector.extract_strided_slice %165 {offsets = [0, 16], sizes = [8, 8], strides = [1, 1]} : vector<16x32xf32> to vector<8x8xf32>
    %203 = vector.extract_strided_slice %165 {offsets = [0, 24], sizes = [8, 8], strides = [1, 1]} : vector<16x32xf32> to vector<8x8xf32>
    %204 = vector.extract_strided_slice %165 {offsets = [8, 0], sizes = [8, 8], strides = [1, 1]} : vector<16x32xf32> to vector<8x8xf32>
    %205 = vector.extract_strided_slice %165 {offsets = [8, 8], sizes = [8, 8], strides = [1, 1]} : vector<16x32xf32> to vector<8x8xf32>
    %206 = vector.extract_strided_slice %165 {offsets = [8, 16], sizes = [8, 8], strides = [1, 1]} : vector<16x32xf32> to vector<8x8xf32>
    %207 = vector.extract_strided_slice %165 {offsets = [8, 24], sizes = [8, 8], strides = [1, 1]} : vector<16x32xf32> to vector<8x8xf32>
    %208 = vector.shape_cast %200 : vector<8x8xf32> to vector<1x8x8xf32>
    %209 = vector.shape_cast %201 : vector<8x8xf32> to vector<1x8x8xf32>
    %210 = vector.shape_cast %202 : vector<8x8xf32> to vector<1x8x8xf32>
    %211 = vector.shape_cast %203 : vector<8x8xf32> to vector<1x8x8xf32>
    %212 = vector.shape_cast %204 : vector<8x8xf32> to vector<1x8x8xf32>
    %213 = vector.shape_cast %205 : vector<8x8xf32> to vector<1x8x8xf32>
    %214 = vector.shape_cast %206 : vector<8x8xf32> to vector<1x8x8xf32>
    %215 = vector.shape_cast %207 : vector<8x8xf32> to vector<1x8x8xf32>
    %216 = tpu.concatenate %208, %209, %210, %211, %212, %213, %214, %215 in 0 : vector<1x8x8xf32>, vector<1x8x8xf32>, vector<1x8x8xf32>, vector<1x8x8xf32>, vector<1x8x8xf32>, vector<1x8x8xf32>, vector<1x8x8xf32>, vector<1x8x8xf32> -> vector<8x8x8xf32>
    "tpu.trace_start"() <{level = 10 : i32, message = "bqd,bkd->bqk"}> : () -> ()
    %cst_37 = arith.constant dense<0.000000e+00> : vector<8x8x8xf32>
    %217 = tpu.matmul %182, %199, %cst_37 {dimension_numbers = #tpu.dot_dimension_numbers<[2], [2], [1], [1], [0, 0, 0, 1, 1, 1], [0], [0]>} : vector<8x8x8xf32>, vector<8x8x8xf32>, vector<8x8x8xf32> -> vector<8x8x8xf32>
    "tpu.trace_stop"() : () -> ()
    %cst_38 = arith.constant dense<0xFF800000> : vector<8x8xf32>
    %218 = vector.multi_reduction <maximumf>, %217, %cst_38 [2] : vector<8x8x8xf32> to vector<8x8xf32>
    %219 = vector.shape_cast %218 : vector<8x8xf32> to vector<8x8x1xf32>
    %220 = vector.broadcast %219 : vector<8x8x1xf32> to vector<8x8x8xf32>
    %221 = arith.subf %217, %220 : vector<8x8x8xf32>
    %222 = math.exp %221 : vector<8x8x8xf32>
    %cst_39 = arith.constant dense<0.000000e+00> : vector<8x8xf32>
    %223 = vector.multi_reduction <add>, %222, %cst_39 [2] : vector<8x8x8xf32> to vector<8x8xf32>
    %224 = vector.shape_cast %223 : vector<8x8xf32> to vector<8x8x1xf32>
    %225 = vector.broadcast %224 : vector<8x8x1xf32> to vector<8x8x8xf32>
    %226 = arith.divf %222, %225 : vector<8x8x8xf32>
    "tpu.trace_start"() <{level = 10 : i32, message = "bqk,bkd->bqd"}> : () -> ()
    %cst_40 = arith.constant dense<0.000000e+00> : vector<8x8x8xf32>
    %227 = tpu.matmul %226, %216, %cst_40 {dimension_numbers = #tpu.dot_dimension_numbers<[2], [1], [1], [2], [0, 0, 0, 1, 1, 2], [0], [0]>} : vector<8x8x8xf32>, vector<8x8x8xf32>, vector<8x8x8xf32> -> vector<8x8x8xf32>
    "tpu.trace_stop"() : () -> ()
    %228 = vector.extract_strided_slice %227 {offsets = [0, 0, 0], sizes = [1, 8, 8], strides = [1, 1, 1]} : vector<8x8x8xf32> to vector<1x8x8xf32>
    %229 = vector.shape_cast %228 : vector<1x8x8xf32> to vector<8x8xf32>
    %230 = vector.extract_strided_slice %227 {offsets = [1, 0, 0], sizes = [1, 8, 8], strides = [1, 1, 1]} : vector<8x8x8xf32> to vector<1x8x8xf32>
    %231 = vector.shape_cast %230 : vector<1x8x8xf32> to vector<8x8xf32>
    %232 = vector.extract_strided_slice %227 {offsets = [2, 0, 0], sizes = [1, 8, 8], strides = [1, 1, 1]} : vector<8x8x8xf32> to vector<1x8x8xf32>
    %233 = vector.shape_cast %232 : vector<1x8x8xf32> to vector<8x8xf32>
    %234 = vector.extract_strided_slice %227 {offsets = [3, 0, 0], sizes = [1, 8, 8], strides = [1, 1, 1]} : vector<8x8x8xf32> to vector<1x8x8xf32>
    %235 = vector.shape_cast %234 : vector<1x8x8xf32> to vector<8x8xf32>
    %236 = tpu.concatenate %229, %231, %233, %235 in 1 : vector<8x8xf32>, vector<8x8xf32>, vector<8x8xf32>, vector<8x8xf32> -> vector<8x32xf32>
    %237 = vector.extract_strided_slice %227 {offsets = [4, 0, 0], sizes = [1, 8, 8], strides = [1, 1, 1]} : vector<8x8x8xf32> to vector<1x8x8xf32>
    %238 = vector.shape_cast %237 : vector<1x8x8xf32> to vector<8x8xf32>
    %239 = vector.extract_strided_slice %227 {offsets = [5, 0, 0], sizes = [1, 8, 8], strides = [1, 1, 1]} : vector<8x8x8xf32> to vector<1x8x8xf32>
    %240 = vector.shape_cast %239 : vector<1x8x8xf32> to vector<8x8xf32>
    %241 = vector.extract_strided_slice %227 {offsets = [6, 0, 0], sizes = [1, 8, 8], strides = [1, 1, 1]} : vector<8x8x8xf32> to vector<1x8x8xf32>
    %242 = vector.shape_cast %241 : vector<1x8x8xf32> to vector<8x8xf32>
    %243 = vector.extract_strided_slice %227 {offsets = [7, 0, 0], sizes = [1, 8, 8], strides = [1, 1, 1]} : vector<8x8x8xf32> to vector<1x8x8xf32>
    %244 = vector.shape_cast %243 : vector<1x8x8xf32> to vector<8x8xf32>
    %245 = tpu.concatenate %238, %240, %242, %244 in 1 : vector<8x8xf32>, vector<8x8xf32>, vector<8x8xf32>, vector<8x8xf32> -> vector<8x32xf32>
    %246 = tpu.concatenate %236, %245 in 0 : vector<8x32xf32>, vector<8x32xf32> -> vector<16x32xf32>
    %c264 = arith.constant 264 : index
    %c0_41 = arith.constant 0 : index
    %247 = vector.load %arg3[%c264, %c0_41] : memref<1128x128xf32, #tpu.memory_space<vmem>>, vector<32x32xf32>
    %c296 = arith.constant 296 : index
    %c0_42 = arith.constant 0 : index
    %248 = vector.load %arg3[%c296, %c0_42] : memref<1128x128xf32, #tpu.memory_space<vmem>>, vector<1x32xf32>
    %cst_43 = arith.constant dense<0.000000e+00> : vector<16x32xf32>
    %249 = tpu.matmul %246, %247, %cst_43 {dimension_numbers = #tpu.dot_dimension_numbers<[1], [0], [0], [1], [0, 0, 1, 1], [], []>} : vector<16x32xf32>, vector<32x32xf32>, vector<16x32xf32> -> vector<16x32xf32>
    %250 = vector.broadcast %248 : vector<1x32xf32> to vector<16x32xf32>
    %251 = arith.addf %249, %250 : vector<16x32xf32>
    %252 = arith.addf %157, %251 : vector<16x32xf32>
    %c304 = arith.constant 304 : index
    %c0_44 = arith.constant 0 : index
    %253 = vector.load %arg3[%c304, %c0_44] : memref<1128x128xf32, #tpu.memory_space<vmem>>, vector<1x32xf32>
    %c312 = arith.constant 312 : index
    %c0_45 = arith.constant 0 : index
    %254 = vector.load %arg3[%c312, %c0_45] : memref<1128x128xf32, #tpu.memory_space<vmem>>, vector<1x32xf32>
    %cst_46 = arith.constant dense<0.000000e+00> : vector<16xf32>
    %255 = vector.multi_reduction <add>, %252, %cst_46 [1] : vector<16x32xf32> to vector<16xf32>
    %256 = vector.shape_cast %255 : vector<16xf32> to vector<16x1xf32>
    %cst_47 = arith.constant 3.200000e+01 : f32
    %257 = vector.broadcast %cst_47 : f32 to vector<16x1xf32>
    %258 = arith.divf %256, %257 : vector<16x1xf32>
    %259 = vector.broadcast %258 : vector<16x1xf32> to vector<16x32xf32>
    %260 = arith.subf %252, %259 : vector<16x32xf32>
    %261 = arith.mulf %260, %260 : vector<16x32xf32>
    %cst_48 = arith.constant dense<0.000000e+00> : vector<16xf32>
    %262 = vector.multi_reduction <add>, %261, %cst_48 [1] : vector<16x32xf32> to vector<16xf32>
    %263 = vector.shape_cast %262 : vector<16xf32> to vector<16x1xf32>
    %cst_49 = arith.constant 3.200000e+01 : f32
    %264 = vector.broadcast %cst_49 : f32 to vector<16x1xf32>
    %265 = arith.divf %263, %264 : vector<16x1xf32>
    %266 = vector.broadcast %258 : vector<16x1xf32> to vector<16x32xf32>
    %267 = arith.subf %252, %266 : vector<16x32xf32>
    %cst_50 = arith.constant 9.99999974E-6 : f32
    %268 = vector.broadcast %cst_50 : f32 to vector<16x1xf32>
    %269 = arith.addf %265, %268 : vector<16x1xf32>
    %270 = math.rsqrt %269 : vector<16x1xf32>
    %271 = vector.broadcast %270 : vector<16x1xf32> to vector<16x32xf32>
    %272 = arith.mulf %267, %271 : vector<16x32xf32>
    %273 = vector.broadcast %253 : vector<1x32xf32> to vector<16x32xf32>
    %274 = arith.mulf %272, %273 : vector<16x32xf32>
    %275 = vector.broadcast %254 : vector<1x32xf32> to vector<16x32xf32>
    %276 = arith.addf %274, %275 : vector<16x32xf32>
    %c320 = arith.constant 320 : index
    %c0_51 = arith.constant 0 : index
    %277 = vector.load %arg3[%c320, %c0_51] : memref<1128x128xf32, #tpu.memory_space<vmem>>, vector<32x64xf32>
    %c352 = arith.constant 352 : index
    %c0_52 = arith.constant 0 : index
    %278 = vector.load %arg3[%c352, %c0_52] : memref<1128x128xf32, #tpu.memory_space<vmem>>, vector<1x64xf32>
    %c360 = arith.constant 360 : index
    %c0_53 = arith.constant 0 : index
    %279 = vector.load %arg3[%c360, %c0_53] : memref<1128x128xf32, #tpu.memory_space<vmem>>, vector<64x32xf32>
    %c424 = arith.constant 424 : index
    %c0_54 = arith.constant 0 : index
    %280 = vector.load %arg3[%c424, %c0_54] : memref<1128x128xf32, #tpu.memory_space<vmem>>, vector<1x32xf32>
    %cst_55 = arith.constant dense<0.000000e+00> : vector<16x64xf32>
    %281 = tpu.matmul %276, %277, %cst_55 {dimension_numbers = #tpu.dot_dimension_numbers<[1], [0], [0], [1], [0, 0, 1, 1], [], []>} : vector<16x32xf32>, vector<32x64xf32>, vector<16x64xf32> -> vector<16x64xf32>
    %282 = vector.broadcast %278 : vector<1x64xf32> to vector<16x64xf32>
    %283 = arith.addf %281, %282 : vector<16x64xf32>
    %cst_56 = arith.constant 0.000000e+00 : f32
    %284 = vector.broadcast %cst_56 : f32 to vector<16x64xf32>
    %285 = arith.maximumf %283, %284 : vector<16x64xf32>
    %cst_57 = arith.constant dense<0.000000e+00> : vector<16x32xf32>
    %286 = tpu.matmul %285, %279, %cst_57 {dimension_numbers = #tpu.dot_dimension_numbers<[1], [0], [0], [1], [0, 0, 1, 1], [], []>} : vector<16x64xf32>, vector<64x32xf32>, vector<16x32xf32> -> vector<16x32xf32>
    %287 = vector.broadcast %280 : vector<1x32xf32> to vector<16x32xf32>
    %288 = arith.addf %286, %287 : vector<16x32xf32>
    %289 = arith.addf %276, %288 : vector<16x32xf32>
    %c432 = arith.constant 432 : index
    %c0_58 = arith.constant 0 : index
    %290 = vector.load %arg3[%c432, %c0_58] : memref<1128x128xf32, #tpu.memory_space<vmem>>, vector<1x32xf32>
    %c440 = arith.constant 440 : index
    %c0_59 = arith.constant 0 : index
    %291 = vector.load %arg3[%c440, %c0_59] : memref<1128x128xf32, #tpu.memory_space<vmem>>, vector<1x32xf32>
    %cst_60 = arith.constant dense<0.000000e+00> : vector<16xf32>
    %292 = vector.multi_reduction <add>, %289, %cst_60 [1] : vector<16x32xf32> to vector<16xf32>
    %293 = vector.shape_cast %292 : vector<16xf32> to vector<16x1xf32>
    %cst_61 = arith.constant 3.200000e+01 : f32
    %294 = vector.broadcast %cst_61 : f32 to vector<16x1xf32>
    %295 = arith.divf %293, %294 : vector<16x1xf32>
    %296 = vector.broadcast %295 : vector<16x1xf32> to vector<16x32xf32>
    %297 = arith.subf %289, %296 : vector<16x32xf32>
    %298 = arith.mulf %297, %297 : vector<16x32xf32>
    %cst_62 = arith.constant dense<0.000000e+00> : vector<16xf32>
    %299 = vector.multi_reduction <add>, %298, %cst_62 [1] : vector<16x32xf32> to vector<16xf32>
    %300 = vector.shape_cast %299 : vector<16xf32> to vector<16x1xf32>
    %cst_63 = arith.constant 3.200000e+01 : f32
    %301 = vector.broadcast %cst_63 : f32 to vector<16x1xf32>
    %302 = arith.divf %300, %301 : vector<16x1xf32>
    %303 = vector.broadcast %295 : vector<16x1xf32> to vector<16x32xf32>
    %304 = arith.subf %289, %303 : vector<16x32xf32>
    %cst_64 = arith.constant 9.99999974E-6 : f32
    %305 = vector.broadcast %cst_64 : f32 to vector<16x1xf32>
    %306 = arith.addf %302, %305 : vector<16x1xf32>
    %307 = math.rsqrt %306 : vector<16x1xf32>
    %308 = vector.broadcast %307 : vector<16x1xf32> to vector<16x32xf32>
    %309 = arith.mulf %304, %308 : vector<16x32xf32>
    %310 = vector.broadcast %290 : vector<1x32xf32> to vector<16x32xf32>
    %311 = arith.mulf %309, %310 : vector<16x32xf32>
    %312 = vector.broadcast %291 : vector<1x32xf32> to vector<16x32xf32>
    %313 = arith.addf %311, %312 : vector<16x32xf32>
    %c448 = arith.constant 448 : index
    %c0_65 = arith.constant 0 : index
    %314 = vector.load %arg3[%c448, %c0_65] : memref<1128x128xf32, #tpu.memory_space<vmem>>, vector<32x96xf32>
    %c480 = arith.constant 480 : index
    %c0_66 = arith.constant 0 : index
    %315 = vector.load %arg3[%c480, %c0_66] : memref<1128x128xf32, #tpu.memory_space<vmem>>, vector<1x96xf32>
    %cst_67 = arith.constant dense<0.000000e+00> : vector<16x96xf32>
    %316 = tpu.matmul %313, %314, %cst_67 {dimension_numbers = #tpu.dot_dimension_numbers<[1], [0], [0], [1], [0, 0, 1, 1], [], []>} : vector<16x32xf32>, vector<32x96xf32>, vector<16x96xf32> -> vector<16x96xf32>
    %317 = vector.broadcast %315 : vector<1x96xf32> to vector<16x96xf32>
    %318 = arith.addf %316, %317 : vector<16x96xf32>
    %319 = vector.extract_strided_slice %318 {offsets = [0, 0], sizes = [16, 32], strides = [1, 1]} : vector<16x96xf32> to vector<16x32xf32>
    %320 = vector.extract_strided_slice %318 {offsets = [0, 32], sizes = [16, 32], strides = [1, 1]} : vector<16x96xf32> to vector<16x32xf32>
    %321 = vector.extract_strided_slice %318 {offsets = [0, 64], sizes = [16, 32], strides = [1, 1]} : vector<16x96xf32> to vector<16x32xf32>
    %322 = vector.extract_strided_slice %319 {offsets = [0, 0], sizes = [8, 8], strides = [1, 1]} : vector<16x32xf32> to vector<8x8xf32>
    %323 = vector.extract_strided_slice %319 {offsets = [0, 8], sizes = [8, 8], strides = [1, 1]} : vector<16x32xf32> to vector<8x8xf32>
    %324 = vector.extract_strided_slice %319 {offsets = [0, 16], sizes = [8, 8], strides = [1, 1]} : vector<16x32xf32> to vector<8x8xf32>
    %325 = vector.extract_strided_slice %319 {offsets = [0, 24], sizes = [8, 8], strides = [1, 1]} : vector<16x32xf32> to vector<8x8xf32>
    %326 = vector.extract_strided_slice %319 {offsets = [8, 0], sizes = [8, 8], strides = [1, 1]} : vector<16x32xf32> to vector<8x8xf32>
    %327 = vector.extract_strided_slice %319 {offsets = [8, 8], sizes = [8, 8], strides = [1, 1]} : vector<16x32xf32> to vector<8x8xf32>
    %328 = vector.extract_strided_slice %319 {offsets = [8, 16], sizes = [8, 8], strides = [1, 1]} : vector<16x32xf32> to vector<8x8xf32>
    %329 = vector.extract_strided_slice %319 {offsets = [8, 24], sizes = [8, 8], strides = [1, 1]} : vector<16x32xf32> to vector<8x8xf32>
    %330 = vector.shape_cast %322 : vector<8x8xf32> to vector<1x8x8xf32>
    %331 = vector.shape_cast %323 : vector<8x8xf32> to vector<1x8x8xf32>
    %332 = vector.shape_cast %324 : vector<8x8xf32> to vector<1x8x8xf32>
    %333 = vector.shape_cast %325 : vector<8x8xf32> to vector<1x8x8xf32>
    %334 = vector.shape_cast %326 : vector<8x8xf32> to vector<1x8x8xf32>
    %335 = vector.shape_cast %327 : vector<8x8xf32> to vector<1x8x8xf32>
    %336 = vector.shape_cast %328 : vector<8x8xf32> to vector<1x8x8xf32>
    %337 = vector.shape_cast %329 : vector<8x8xf32> to vector<1x8x8xf32>
    %338 = tpu.concatenate %330, %331, %332, %333, %334, %335, %336, %337 in 0 : vector<1x8x8xf32>, vector<1x8x8xf32>, vector<1x8x8xf32>, vector<1x8x8xf32>, vector<1x8x8xf32>, vector<1x8x8xf32>, vector<1x8x8xf32>, vector<1x8x8xf32> -> vector<8x8x8xf32>
    %339 = vector.extract_strided_slice %320 {offsets = [0, 0], sizes = [8, 8], strides = [1, 1]} : vector<16x32xf32> to vector<8x8xf32>
    %340 = vector.extract_strided_slice %320 {offsets = [0, 8], sizes = [8, 8], strides = [1, 1]} : vector<16x32xf32> to vector<8x8xf32>
    %341 = vector.extract_strided_slice %320 {offsets = [0, 16], sizes = [8, 8], strides = [1, 1]} : vector<16x32xf32> to vector<8x8xf32>
    %342 = vector.extract_strided_slice %320 {offsets = [0, 24], sizes = [8, 8], strides = [1, 1]} : vector<16x32xf32> to vector<8x8xf32>
    %343 = vector.extract_strided_slice %320 {offsets = [8, 0], sizes = [8, 8], strides = [1, 1]} : vector<16x32xf32> to vector<8x8xf32>
    %344 = vector.extract_strided_slice %320 {offsets = [8, 8], sizes = [8, 8], strides = [1, 1]} : vector<16x32xf32> to vector<8x8xf32>
    %345 = vector.extract_strided_slice %320 {offsets = [8, 16], sizes = [8, 8], strides = [1, 1]} : vector<16x32xf32> to vector<8x8xf32>
    %346 = vector.extract_strided_slice %320 {offsets = [8, 24], sizes = [8, 8], strides = [1, 1]} : vector<16x32xf32> to vector<8x8xf32>
    %347 = vector.shape_cast %339 : vector<8x8xf32> to vector<1x8x8xf32>
    %348 = vector.shape_cast %340 : vector<8x8xf32> to vector<1x8x8xf32>
    %349 = vector.shape_cast %341 : vector<8x8xf32> to vector<1x8x8xf32>
    %350 = vector.shape_cast %342 : vector<8x8xf32> to vector<1x8x8xf32>
    %351 = vector.shape_cast %343 : vector<8x8xf32> to vector<1x8x8xf32>
    %352 = vector.shape_cast %344 : vector<8x8xf32> to vector<1x8x8xf32>
    %353 = vector.shape_cast %345 : vector<8x8xf32> to vector<1x8x8xf32>
    %354 = vector.shape_cast %346 : vector<8x8xf32> to vector<1x8x8xf32>
    %355 = tpu.concatenate %347, %348, %349, %350, %351, %352, %353, %354 in 0 : vector<1x8x8xf32>, vector<1x8x8xf32>, vector<1x8x8xf32>, vector<1x8x8xf32>, vector<1x8x8xf32>, vector<1x8x8xf32>, vector<1x8x8xf32>, vector<1x8x8xf32> -> vector<8x8x8xf32>
    %356 = vector.extract_strided_slice %321 {offsets = [0, 0], sizes = [8, 8], strides = [1, 1]} : vector<16x32xf32> to vector<8x8xf32>
    %357 = vector.extract_strided_slice %321 {offsets = [0, 8], sizes = [8, 8], strides = [1, 1]} : vector<16x32xf32> to vector<8x8xf32>
    %358 = vector.extract_strided_slice %321 {offsets = [0, 16], sizes = [8, 8], strides = [1, 1]} : vector<16x32xf32> to vector<8x8xf32>
    %359 = vector.extract_strided_slice %321 {offsets = [0, 24], sizes = [8, 8], strides = [1, 1]} : vector<16x32xf32> to vector<8x8xf32>
    %360 = vector.extract_strided_slice %321 {offsets = [8, 0], sizes = [8, 8], strides = [1, 1]} : vector<16x32xf32> to vector<8x8xf32>
    %361 = vector.extract_strided_slice %321 {offsets = [8, 8], sizes = [8, 8], strides = [1, 1]} : vector<16x32xf32> to vector<8x8xf32>
    %362 = vector.extract_strided_slice %321 {offsets = [8, 16], sizes = [8, 8], strides = [1, 1]} : vector<16x32xf32> to vector<8x8xf32>
    %363 = vector.extract_strided_slice %321 {offsets = [8, 24], sizes = [8, 8], strides = [1, 1]} : vector<16x32xf32> to vector<8x8xf32>
    %364 = vector.shape_cast %356 : vector<8x8xf32> to vector<1x8x8xf32>
    %365 = vector.shape_cast %357 : vector<8x8xf32> to vector<1x8x8xf32>
    %366 = vector.shape_cast %358 : vector<8x8xf32> to vector<1x8x8xf32>
    %367 = vector.shape_cast %359 : vector<8x8xf32> to vector<1x8x8xf32>
    %368 = vector.shape_cast %360 : vector<8x8xf32> to vector<1x8x8xf32>
    %369 = vector.shape_cast %361 : vector<8x8xf32> to vector<1x8x8xf32>
    %370 = vector.shape_cast %362 : vector<8x8xf32> to vector<1x8x8xf32>
    %371 = vector.shape_cast %363 : vector<8x8xf32> to vector<1x8x8xf32>
    %372 = tpu.concatenate %364, %365, %366, %367, %368, %369, %370, %371 in 0 : vector<1x8x8xf32>, vector<1x8x8xf32>, vector<1x8x8xf32>, vector<1x8x8xf32>, vector<1x8x8xf32>, vector<1x8x8xf32>, vector<1x8x8xf32>, vector<1x8x8xf32> -> vector<8x8x8xf32>
    "tpu.trace_start"() <{level = 10 : i32, message = "bqd,bkd->bqk"}> : () -> ()
    %cst_68 = arith.constant dense<0.000000e+00> : vector<8x8x8xf32>
    %373 = tpu.matmul %338, %355, %cst_68 {dimension_numbers = #tpu.dot_dimension_numbers<[2], [2], [1], [1], [0, 0, 0, 1, 1, 1], [0], [0]>} : vector<8x8x8xf32>, vector<8x8x8xf32>, vector<8x8x8xf32> -> vector<8x8x8xf32>
    "tpu.trace_stop"() : () -> ()
    %cst_69 = arith.constant dense<0xFF800000> : vector<8x8xf32>
    %374 = vector.multi_reduction <maximumf>, %373, %cst_69 [2] : vector<8x8x8xf32> to vector<8x8xf32>
    %375 = vector.shape_cast %374 : vector<8x8xf32> to vector<8x8x1xf32>
    %376 = vector.broadcast %375 : vector<8x8x1xf32> to vector<8x8x8xf32>
    %377 = arith.subf %373, %376 : vector<8x8x8xf32>
    %378 = math.exp %377 : vector<8x8x8xf32>
    %cst_70 = arith.constant dense<0.000000e+00> : vector<8x8xf32>
    %379 = vector.multi_reduction <add>, %378, %cst_70 [2] : vector<8x8x8xf32> to vector<8x8xf32>
    %380 = vector.shape_cast %379 : vector<8x8xf32> to vector<8x8x1xf32>
    %381 = vector.broadcast %380 : vector<8x8x1xf32> to vector<8x8x8xf32>
    %382 = arith.divf %378, %381 : vector<8x8x8xf32>
    "tpu.trace_start"() <{level = 10 : i32, message = "bqk,bkd->bqd"}> : () -> ()
    %cst_71 = arith.constant dense<0.000000e+00> : vector<8x8x8xf32>
    %383 = tpu.matmul %382, %372, %cst_71 {dimension_numbers = #tpu.dot_dimension_numbers<[2], [1], [1], [2], [0, 0, 0, 1, 1, 2], [0], [0]>} : vector<8x8x8xf32>, vector<8x8x8xf32>, vector<8x8x8xf32> -> vector<8x8x8xf32>
    "tpu.trace_stop"() : () -> ()
    %384 = vector.extract_strided_slice %383 {offsets = [0, 0, 0], sizes = [1, 8, 8], strides = [1, 1, 1]} : vector<8x8x8xf32> to vector<1x8x8xf32>
    %385 = vector.shape_cast %384 : vector<1x8x8xf32> to vector<8x8xf32>
    %386 = vector.extract_strided_slice %383 {offsets = [1, 0, 0], sizes = [1, 8, 8], strides = [1, 1, 1]} : vector<8x8x8xf32> to vector<1x8x8xf32>
    %387 = vector.shape_cast %386 : vector<1x8x8xf32> to vector<8x8xf32>
    %388 = vector.extract_strided_slice %383 {offsets = [2, 0, 0], sizes = [1, 8, 8], strides = [1, 1, 1]} : vector<8x8x8xf32> to vector<1x8x8xf32>
    %389 = vector.shape_cast %388 : vector<1x8x8xf32> to vector<8x8xf32>
    %390 = vector.extract_strided_slice %383 {offsets = [3, 0, 0], sizes = [1, 8, 8], strides = [1, 1, 1]} : vector<8x8x8xf32> to vector<1x8x8xf32>
    %391 = vector.shape_cast %390 : vector<1x8x8xf32> to vector<8x8xf32>
    %392 = tpu.concatenate %385, %387, %389, %391 in 1 : vector<8x8xf32>, vector<8x8xf32>, vector<8x8xf32>, vector<8x8xf32> -> vector<8x32xf32>
    %393 = vector.extract_strided_slice %383 {offsets = [4, 0, 0], sizes = [1, 8, 8], strides = [1, 1, 1]} : vector<8x8x8xf32> to vector<1x8x8xf32>
    %394 = vector.shape_cast %393 : vector<1x8x8xf32> to vector<8x8xf32>
    %395 = vector.extract_strided_slice %383 {offsets = [5, 0, 0], sizes = [1, 8, 8], strides = [1, 1, 1]} : vector<8x8x8xf32> to vector<1x8x8xf32>
    %396 = vector.shape_cast %395 : vector<1x8x8xf32> to vector<8x8xf32>
    %397 = vector.extract_strided_slice %383 {offsets = [6, 0, 0], sizes = [1, 8, 8], strides = [1, 1, 1]} : vector<8x8x8xf32> to vector<1x8x8xf32>
    %398 = vector.shape_cast %397 : vector<1x8x8xf32> to vector<8x8xf32>
    %399 = vector.extract_strided_slice %383 {offsets = [7, 0, 0], sizes = [1, 8, 8], strides = [1, 1, 1]} : vector<8x8x8xf32> to vector<1x8x8xf32>
    %400 = vector.shape_cast %399 : vector<1x8x8xf32> to vector<8x8xf32>
    %401 = tpu.concatenate %394, %396, %398, %400 in 1 : vector<8x8xf32>, vector<8x8xf32>, vector<8x8xf32>, vector<8x8xf32> -> vector<8x32xf32>
    %402 = tpu.concatenate %392, %401 in 0 : vector<8x32xf32>, vector<8x32xf32> -> vector<16x32xf32>
    %c488 = arith.constant 488 : index
    %c0_72 = arith.constant 0 : index
    %403 = vector.load %arg3[%c488, %c0_72] : memref<1128x128xf32, #tpu.memory_space<vmem>>, vector<32x32xf32>
    %c520 = arith.constant 520 : index
    %c0_73 = arith.constant 0 : index
    %404 = vector.load %arg3[%c520, %c0_73] : memref<1128x128xf32, #tpu.memory_space<vmem>>, vector<1x32xf32>
    %cst_74 = arith.constant dense<0.000000e+00> : vector<16x32xf32>
    %405 = tpu.matmul %402, %403, %cst_74 {dimension_numbers = #tpu.dot_dimension_numbers<[1], [0], [0], [1], [0, 0, 1, 1], [], []>} : vector<16x32xf32>, vector<32x32xf32>, vector<16x32xf32> -> vector<16x32xf32>
    %406 = vector.broadcast %404 : vector<1x32xf32> to vector<16x32xf32>
    %407 = arith.addf %405, %406 : vector<16x32xf32>
    %408 = arith.addf %313, %407 : vector<16x32xf32>
    %c528 = arith.constant 528 : index
    %c0_75 = arith.constant 0 : index
    %409 = vector.load %arg3[%c528, %c0_75] : memref<1128x128xf32, #tpu.memory_space<vmem>>, vector<1x32xf32>
    %c536 = arith.constant 536 : index
    %c0_76 = arith.constant 0 : index
    %410 = vector.load %arg3[%c536, %c0_76] : memref<1128x128xf32, #tpu.memory_space<vmem>>, vector<1x32xf32>
    %cst_77 = arith.constant dense<0.000000e+00> : vector<16xf32>
    %411 = vector.multi_reduction <add>, %408, %cst_77 [1] : vector<16x32xf32> to vector<16xf32>
    %412 = vector.shape_cast %411 : vector<16xf32> to vector<16x1xf32>
    %cst_78 = arith.constant 3.200000e+01 : f32
    %413 = vector.broadcast %cst_78 : f32 to vector<16x1xf32>
    %414 = arith.divf %412, %413 : vector<16x1xf32>
    %415 = vector.broadcast %414 : vector<16x1xf32> to vector<16x32xf32>
    %416 = arith.subf %408, %415 : vector<16x32xf32>
    %417 = arith.mulf %416, %416 : vector<16x32xf32>
    %cst_79 = arith.constant dense<0.000000e+00> : vector<16xf32>
    %418 = vector.multi_reduction <add>, %417, %cst_79 [1] : vector<16x32xf32> to vector<16xf32>
    %419 = vector.shape_cast %418 : vector<16xf32> to vector<16x1xf32>
    %cst_80 = arith.constant 3.200000e+01 : f32
    %420 = vector.broadcast %cst_80 : f32 to vector<16x1xf32>
    %421 = arith.divf %419, %420 : vector<16x1xf32>
    %422 = vector.broadcast %414 : vector<16x1xf32> to vector<16x32xf32>
    %423 = arith.subf %408, %422 : vector<16x32xf32>
    %cst_81 = arith.constant 9.99999974E-6 : f32
    %424 = vector.broadcast %cst_81 : f32 to vector<16x1xf32>
    %425 = arith.addf %421, %424 : vector<16x1xf32>
    %426 = math.rsqrt %425 : vector<16x1xf32>
    %427 = vector.broadcast %426 : vector<16x1xf32> to vector<16x32xf32>
    %428 = arith.mulf %423, %427 : vector<16x32xf32>
    %429 = vector.broadcast %409 : vector<1x32xf32> to vector<16x32xf32>
    %430 = arith.mulf %428, %429 : vector<16x32xf32>
    %431 = vector.broadcast %410 : vector<1x32xf32> to vector<16x32xf32>
    %432 = arith.addf %430, %431 : vector<16x32xf32>
    %c544 = arith.constant 544 : index
    %c0_82 = arith.constant 0 : index
    %433 = vector.load %arg3[%c544, %c0_82] : memref<1128x128xf32, #tpu.memory_space<vmem>>, vector<32x96xf32>
    %c576 = arith.constant 576 : index
    %c0_83 = arith.constant 0 : index
    %434 = vector.load %arg3[%c576, %c0_83] : memref<1128x128xf32, #tpu.memory_space<vmem>>, vector<1x96xf32>
    %435 = vector.extract_strided_slice %433 {offsets = [0, 0], sizes = [32, 32], strides = [1, 1]} : vector<32x96xf32> to vector<32x32xf32>
    %cst_84 = arith.constant dense<0.000000e+00> : vector<16x32xf32>
    %436 = tpu.matmul %432, %435, %cst_84 {dimension_numbers = #tpu.dot_dimension_numbers<[1], [0], [0], [1], [0, 0, 1, 1], [], []>} : vector<16x32xf32>, vector<32x32xf32>, vector<16x32xf32> -> vector<16x32xf32>
    %437 = vector.extract_strided_slice %434 {offsets = [0, 0], sizes = [1, 32], strides = [1, 1]} : vector<1x96xf32> to vector<1x32xf32>
    %438 = vector.broadcast %437 : vector<1x32xf32> to vector<16x32xf32>
    %439 = arith.addf %436, %438 : vector<16x32xf32>
    %440 = vector.extract_strided_slice %433 {offsets = [0, 32], sizes = [32, 64], strides = [1, 1]} : vector<32x96xf32> to vector<32x64xf32>
    %cst_85 = arith.constant dense<0.000000e+00> : vector<16x64xf32>
    %441 = tpu.matmul %1, %440, %cst_85 {dimension_numbers = #tpu.dot_dimension_numbers<[1], [0], [0], [1], [0, 0, 1, 1], [], []>} : vector<16x32xf32>, vector<32x64xf32>, vector<16x64xf32> -> vector<16x64xf32>
    %442 = vector.extract_strided_slice %434 {offsets = [0, 32], sizes = [1, 64], strides = [1, 1]} : vector<1x96xf32> to vector<1x64xf32>
    %443 = vector.broadcast %442 : vector<1x64xf32> to vector<16x64xf32>
    %444 = arith.addf %441, %443 : vector<16x64xf32>
    %445 = vector.extract_strided_slice %444 {offsets = [0, 0], sizes = [16, 32], strides = [1, 1]} : vector<16x64xf32> to vector<16x32xf32>
    %446 = vector.extract_strided_slice %444 {offsets = [0, 32], sizes = [16, 32], strides = [1, 1]} : vector<16x64xf32> to vector<16x32xf32>
    %447 = vector.extract_strided_slice %439 {offsets = [0, 0], sizes = [8, 8], strides = [1, 1]} : vector<16x32xf32> to vector<8x8xf32>
    %448 = vector.extract_strided_slice %439 {offsets = [0, 8], sizes = [8, 8], strides = [1, 1]} : vector<16x32xf32> to vector<8x8xf32>
    %449 = vector.extract_strided_slice %439 {offsets = [0, 16], sizes = [8, 8], strides = [1, 1]} : vector<16x32xf32> to vector<8x8xf32>
    %450 = vector.extract_strided_slice %439 {offsets = [0, 24], sizes = [8, 8], strides = [1, 1]} : vector<16x32xf32> to vector<8x8xf32>
    %451 = vector.extract_strided_slice %439 {offsets = [8, 0], sizes = [8, 8], strides = [1, 1]} : vector<16x32xf32> to vector<8x8xf32>
    %452 = vector.extract_strided_slice %439 {offsets = [8, 8], sizes = [8, 8], strides = [1, 1]} : vector<16x32xf32> to vector<8x8xf32>
    %453 = vector.extract_strided_slice %439 {offsets = [8, 16], sizes = [8, 8], strides = [1, 1]} : vector<16x32xf32> to vector<8x8xf32>
    %454 = vector.extract_strided_slice %439 {offsets = [8, 24], sizes = [8, 8], strides = [1, 1]} : vector<16x32xf32> to vector<8x8xf32>
    %455 = vector.shape_cast %447 : vector<8x8xf32> to vector<1x8x8xf32>
    %456 = vector.shape_cast %448 : vector<8x8xf32> to vector<1x8x8xf32>
    %457 = vector.shape_cast %449 : vector<8x8xf32> to vector<1x8x8xf32>
    %458 = vector.shape_cast %450 : vector<8x8xf32> to vector<1x8x8xf32>
    %459 = vector.shape_cast %451 : vector<8x8xf32> to vector<1x8x8xf32>
    %460 = vector.shape_cast %452 : vector<8x8xf32> to vector<1x8x8xf32>
    %461 = vector.shape_cast %453 : vector<8x8xf32> to vector<1x8x8xf32>
    %462 = vector.shape_cast %454 : vector<8x8xf32> to vector<1x8x8xf32>
    %463 = tpu.concatenate %455, %456, %457, %458, %459, %460, %461, %462 in 0 : vector<1x8x8xf32>, vector<1x8x8xf32>, vector<1x8x8xf32>, vector<1x8x8xf32>, vector<1x8x8xf32>, vector<1x8x8xf32>, vector<1x8x8xf32>, vector<1x8x8xf32> -> vector<8x8x8xf32>
    %464 = vector.extract_strided_slice %445 {offsets = [0, 0], sizes = [8, 8], strides = [1, 1]} : vector<16x32xf32> to vector<8x8xf32>
    %465 = vector.extract_strided_slice %445 {offsets = [0, 8], sizes = [8, 8], strides = [1, 1]} : vector<16x32xf32> to vector<8x8xf32>
    %466 = vector.extract_strided_slice %445 {offsets = [0, 16], sizes = [8, 8], strides = [1, 1]} : vector<16x32xf32> to vector<8x8xf32>
    %467 = vector.extract_strided_slice %445 {offsets = [0, 24], sizes = [8, 8], strides = [1, 1]} : vector<16x32xf32> to vector<8x8xf32>
    %468 = vector.extract_strided_slice %445 {offsets = [8, 0], sizes = [8, 8], strides = [1, 1]} : vector<16x32xf32> to vector<8x8xf32>
    %469 = vector.extract_strided_slice %445 {offsets = [8, 8], sizes = [8, 8], strides = [1, 1]} : vector<16x32xf32> to vector<8x8xf32>
    %470 = vector.extract_strided_slice %445 {offsets = [8, 16], sizes = [8, 8], strides = [1, 1]} : vector<16x32xf32> to vector<8x8xf32>
    %471 = vector.extract_strided_slice %445 {offsets = [8, 24], sizes = [8, 8], strides = [1, 1]} : vector<16x32xf32> to vector<8x8xf32>
    %472 = vector.shape_cast %464 : vector<8x8xf32> to vector<1x8x8xf32>
    %473 = vector.shape_cast %465 : vector<8x8xf32> to vector<1x8x8xf32>
    %474 = vector.shape_cast %466 : vector<8x8xf32> to vector<1x8x8xf32>
    %475 = vector.shape_cast %467 : vector<8x8xf32> to vector<1x8x8xf32>
    %476 = vector.shape_cast %468 : vector<8x8xf32> to vector<1x8x8xf32>
    %477 = vector.shape_cast %469 : vector<8x8xf32> to vector<1x8x8xf32>
    %478 = vector.shape_cast %470 : vector<8x8xf32> to vector<1x8x8xf32>
    %479 = vector.shape_cast %471 : vector<8x8xf32> to vector<1x8x8xf32>
    %480 = tpu.concatenate %472, %473, %474, %475, %476, %477, %478, %479 in 0 : vector<1x8x8xf32>, vector<1x8x8xf32>, vector<1x8x8xf32>, vector<1x8x8xf32>, vector<1x8x8xf32>, vector<1x8x8xf32>, vector<1x8x8xf32>, vector<1x8x8xf32> -> vector<8x8x8xf32>
    %481 = vector.extract_strided_slice %446 {offsets = [0, 0], sizes = [8, 8], strides = [1, 1]} : vector<16x32xf32> to vector<8x8xf32>
    %482 = vector.extract_strided_slice %446 {offsets = [0, 8], sizes = [8, 8], strides = [1, 1]} : vector<16x32xf32> to vector<8x8xf32>
    %483 = vector.extract_strided_slice %446 {offsets = [0, 16], sizes = [8, 8], strides = [1, 1]} : vector<16x32xf32> to vector<8x8xf32>
    %484 = vector.extract_strided_slice %446 {offsets = [0, 24], sizes = [8, 8], strides = [1, 1]} : vector<16x32xf32> to vector<8x8xf32>
    %485 = vector.extract_strided_slice %446 {offsets = [8, 0], sizes = [8, 8], strides = [1, 1]} : vector<16x32xf32> to vector<8x8xf32>
    %486 = vector.extract_strided_slice %446 {offsets = [8, 8], sizes = [8, 8], strides = [1, 1]} : vector<16x32xf32> to vector<8x8xf32>
    %487 = vector.extract_strided_slice %446 {offsets = [8, 16], sizes = [8, 8], strides = [1, 1]} : vector<16x32xf32> to vector<8x8xf32>
    %488 = vector.extract_strided_slice %446 {offsets = [8, 24], sizes = [8, 8], strides = [1, 1]} : vector<16x32xf32> to vector<8x8xf32>
    %489 = vector.shape_cast %481 : vector<8x8xf32> to vector<1x8x8xf32>
    %490 = vector.shape_cast %482 : vector<8x8xf32> to vector<1x8x8xf32>
    %491 = vector.shape_cast %483 : vector<8x8xf32> to vector<1x8x8xf32>
    %492 = vector.shape_cast %484 : vector<8x8xf32> to vector<1x8x8xf32>
    %493 = vector.shape_cast %485 : vector<8x8xf32> to vector<1x8x8xf32>
    %494 = vector.shape_cast %486 : vector<8x8xf32> to vector<1x8x8xf32>
    %495 = vector.shape_cast %487 : vector<8x8xf32> to vector<1x8x8xf32>
    %496 = vector.shape_cast %488 : vector<8x8xf32> to vector<1x8x8xf32>
    %497 = tpu.concatenate %489, %490, %491, %492, %493, %494, %495, %496 in 0 : vector<1x8x8xf32>, vector<1x8x8xf32>, vector<1x8x8xf32>, vector<1x8x8xf32>, vector<1x8x8xf32>, vector<1x8x8xf32>, vector<1x8x8xf32>, vector<1x8x8xf32> -> vector<8x8x8xf32>
    "tpu.trace_start"() <{level = 10 : i32, message = "bqd,bkd->bqk"}> : () -> ()
    %cst_86 = arith.constant dense<0.000000e+00> : vector<8x8x8xf32>
    %498 = tpu.matmul %463, %480, %cst_86 {dimension_numbers = #tpu.dot_dimension_numbers<[2], [2], [1], [1], [0, 0, 0, 1, 1, 1], [0], [0]>} : vector<8x8x8xf32>, vector<8x8x8xf32>, vector<8x8x8xf32> -> vector<8x8x8xf32>
    "tpu.trace_stop"() : () -> ()
    %cst_87 = arith.constant dense<0xFF800000> : vector<8x8xf32>
    %499 = vector.multi_reduction <maximumf>, %498, %cst_87 [2] : vector<8x8x8xf32> to vector<8x8xf32>
    %500 = vector.shape_cast %499 : vector<8x8xf32> to vector<8x8x1xf32>
    %501 = vector.broadcast %500 : vector<8x8x1xf32> to vector<8x8x8xf32>
    %502 = arith.subf %498, %501 : vector<8x8x8xf32>
    %503 = math.exp %502 : vector<8x8x8xf32>
    %cst_88 = arith.constant dense<0.000000e+00> : vector<8x8xf32>
    %504 = vector.multi_reduction <add>, %503, %cst_88 [2] : vector<8x8x8xf32> to vector<8x8xf32>
    %505 = vector.shape_cast %504 : vector<8x8xf32> to vector<8x8x1xf32>
    %506 = vector.broadcast %505 : vector<8x8x1xf32> to vector<8x8x8xf32>
    %507 = arith.divf %503, %506 : vector<8x8x8xf32>
    "tpu.trace_start"() <{level = 10 : i32, message = "bqk,bkd->bqd"}> : () -> ()
    %cst_89 = arith.constant dense<0.000000e+00> : vector<8x8x8xf32>
    %508 = tpu.matmul %507, %497, %cst_89 {dimension_numbers = #tpu.dot_dimension_numbers<[2], [1], [1], [2], [0, 0, 0, 1, 1, 2], [0], [0]>} : vector<8x8x8xf32>, vector<8x8x8xf32>, vector<8x8x8xf32> -> vector<8x8x8xf32>
    "tpu.trace_stop"() : () -> ()
    %509 = vector.extract_strided_slice %508 {offsets = [0, 0, 0], sizes = [1, 8, 8], strides = [1, 1, 1]} : vector<8x8x8xf32> to vector<1x8x8xf32>
    %510 = vector.shape_cast %509 : vector<1x8x8xf32> to vector<8x8xf32>
    %511 = vector.extract_strided_slice %508 {offsets = [1, 0, 0], sizes = [1, 8, 8], strides = [1, 1, 1]} : vector<8x8x8xf32> to vector<1x8x8xf32>
    %512 = vector.shape_cast %511 : vector<1x8x8xf32> to vector<8x8xf32>
    %513 = vector.extract_strided_slice %508 {offsets = [2, 0, 0], sizes = [1, 8, 8], strides = [1, 1, 1]} : vector<8x8x8xf32> to vector<1x8x8xf32>
    %514 = vector.shape_cast %513 : vector<1x8x8xf32> to vector<8x8xf32>
    %515 = vector.extract_strided_slice %508 {offsets = [3, 0, 0], sizes = [1, 8, 8], strides = [1, 1, 1]} : vector<8x8x8xf32> to vector<1x8x8xf32>
    %516 = vector.shape_cast %515 : vector<1x8x8xf32> to vector<8x8xf32>
    %517 = tpu.concatenate %510, %512, %514, %516 in 1 : vector<8x8xf32>, vector<8x8xf32>, vector<8x8xf32>, vector<8x8xf32> -> vector<8x32xf32>
    %518 = vector.extract_strided_slice %508 {offsets = [4, 0, 0], sizes = [1, 8, 8], strides = [1, 1, 1]} : vector<8x8x8xf32> to vector<1x8x8xf32>
    %519 = vector.shape_cast %518 : vector<1x8x8xf32> to vector<8x8xf32>
    %520 = vector.extract_strided_slice %508 {offsets = [5, 0, 0], sizes = [1, 8, 8], strides = [1, 1, 1]} : vector<8x8x8xf32> to vector<1x8x8xf32>
    %521 = vector.shape_cast %520 : vector<1x8x8xf32> to vector<8x8xf32>
    %522 = vector.extract_strided_slice %508 {offsets = [6, 0, 0], sizes = [1, 8, 8], strides = [1, 1, 1]} : vector<8x8x8xf32> to vector<1x8x8xf32>
    %523 = vector.shape_cast %522 : vector<1x8x8xf32> to vector<8x8xf32>
    %524 = vector.extract_strided_slice %508 {offsets = [7, 0, 0], sizes = [1, 8, 8], strides = [1, 1, 1]} : vector<8x8x8xf32> to vector<1x8x8xf32>
    %525 = vector.shape_cast %524 : vector<1x8x8xf32> to vector<8x8xf32>
    %526 = tpu.concatenate %519, %521, %523, %525 in 1 : vector<8x8xf32>, vector<8x8xf32>, vector<8x8xf32>, vector<8x8xf32> -> vector<8x32xf32>
    %527 = tpu.concatenate %517, %526 in 0 : vector<8x32xf32>, vector<8x32xf32> -> vector<16x32xf32>
    %c584 = arith.constant 584 : index
    %c0_90 = arith.constant 0 : index
    %528 = vector.load %arg3[%c584, %c0_90] : memref<1128x128xf32, #tpu.memory_space<vmem>>, vector<32x32xf32>
    %c616 = arith.constant 616 : index
    %c0_91 = arith.constant 0 : index
    %529 = vector.load %arg3[%c616, %c0_91] : memref<1128x128xf32, #tpu.memory_space<vmem>>, vector<1x32xf32>
    %cst_92 = arith.constant dense<0.000000e+00> : vector<16x32xf32>
    %530 = tpu.matmul %527, %528, %cst_92 {dimension_numbers = #tpu.dot_dimension_numbers<[1], [0], [0], [1], [0, 0, 1, 1], [], []>} : vector<16x32xf32>, vector<32x32xf32>, vector<16x32xf32> -> vector<16x32xf32>
    %531 = vector.broadcast %529 : vector<1x32xf32> to vector<16x32xf32>
    %532 = arith.addf %530, %531 : vector<16x32xf32>
    %533 = arith.addf %432, %532 : vector<16x32xf32>
    %c624 = arith.constant 624 : index
    %c0_93 = arith.constant 0 : index
    %534 = vector.load %arg3[%c624, %c0_93] : memref<1128x128xf32, #tpu.memory_space<vmem>>, vector<1x32xf32>
    %c632 = arith.constant 632 : index
    %c0_94 = arith.constant 0 : index
    %535 = vector.load %arg3[%c632, %c0_94] : memref<1128x128xf32, #tpu.memory_space<vmem>>, vector<1x32xf32>
    %cst_95 = arith.constant dense<0.000000e+00> : vector<16xf32>
    %536 = vector.multi_reduction <add>, %533, %cst_95 [1] : vector<16x32xf32> to vector<16xf32>
    %537 = vector.shape_cast %536 : vector<16xf32> to vector<16x1xf32>
    %cst_96 = arith.constant 3.200000e+01 : f32
    %538 = vector.broadcast %cst_96 : f32 to vector<16x1xf32>
    %539 = arith.divf %537, %538 : vector<16x1xf32>
    %540 = vector.broadcast %539 : vector<16x1xf32> to vector<16x32xf32>
    %541 = arith.subf %533, %540 : vector<16x32xf32>
    %542 = arith.mulf %541, %541 : vector<16x32xf32>
    %cst_97 = arith.constant dense<0.000000e+00> : vector<16xf32>
    %543 = vector.multi_reduction <add>, %542, %cst_97 [1] : vector<16x32xf32> to vector<16xf32>
    %544 = vector.shape_cast %543 : vector<16xf32> to vector<16x1xf32>
    %cst_98 = arith.constant 3.200000e+01 : f32
    %545 = vector.broadcast %cst_98 : f32 to vector<16x1xf32>
    %546 = arith.divf %544, %545 : vector<16x1xf32>
    %547 = vector.broadcast %539 : vector<16x1xf32> to vector<16x32xf32>
    %548 = arith.subf %533, %547 : vector<16x32xf32>
    %cst_99 = arith.constant 9.99999974E-6 : f32
    %549 = vector.broadcast %cst_99 : f32 to vector<16x1xf32>
    %550 = arith.addf %546, %549 : vector<16x1xf32>
    %551 = math.rsqrt %550 : vector<16x1xf32>
    %552 = vector.broadcast %551 : vector<16x1xf32> to vector<16x32xf32>
    %553 = arith.mulf %548, %552 : vector<16x32xf32>
    %554 = vector.broadcast %534 : vector<1x32xf32> to vector<16x32xf32>
    %555 = arith.mulf %553, %554 : vector<16x32xf32>
    %556 = vector.broadcast %535 : vector<1x32xf32> to vector<16x32xf32>
    %557 = arith.addf %555, %556 : vector<16x32xf32>
    %c640 = arith.constant 640 : index
    %c0_100 = arith.constant 0 : index
    %558 = vector.load %arg3[%c640, %c0_100] : memref<1128x128xf32, #tpu.memory_space<vmem>>, vector<32x64xf32>
    %c672 = arith.constant 672 : index
    %c0_101 = arith.constant 0 : index
    %559 = vector.load %arg3[%c672, %c0_101] : memref<1128x128xf32, #tpu.memory_space<vmem>>, vector<1x64xf32>
    %c680 = arith.constant 680 : index
    %c0_102 = arith.constant 0 : index
    %560 = vector.load %arg3[%c680, %c0_102] : memref<1128x128xf32, #tpu.memory_space<vmem>>, vector<64x32xf32>
    %c744 = arith.constant 744 : index
    %c0_103 = arith.constant 0 : index
    %561 = vector.load %arg3[%c744, %c0_103] : memref<1128x128xf32, #tpu.memory_space<vmem>>, vector<1x32xf32>
    %cst_104 = arith.constant dense<0.000000e+00> : vector<16x64xf32>
    %562 = tpu.matmul %557, %558, %cst_104 {dimension_numbers = #tpu.dot_dimension_numbers<[1], [0], [0], [1], [0, 0, 1, 1], [], []>} : vector<16x32xf32>, vector<32x64xf32>, vector<16x64xf32> -> vector<16x64xf32>
    %563 = vector.broadcast %559 : vector<1x64xf32> to vector<16x64xf32>
    %564 = arith.addf %562, %563 : vector<16x64xf32>
    %cst_105 = arith.constant 0.000000e+00 : f32
    %565 = vector.broadcast %cst_105 : f32 to vector<16x64xf32>
    %566 = arith.maximumf %564, %565 : vector<16x64xf32>
    %cst_106 = arith.constant dense<0.000000e+00> : vector<16x32xf32>
    %567 = tpu.matmul %566, %560, %cst_106 {dimension_numbers = #tpu.dot_dimension_numbers<[1], [0], [0], [1], [0, 0, 1, 1], [], []>} : vector<16x64xf32>, vector<64x32xf32>, vector<16x32xf32> -> vector<16x32xf32>
    %568 = vector.broadcast %561 : vector<1x32xf32> to vector<16x32xf32>
    %569 = arith.addf %567, %568 : vector<16x32xf32>
    %570 = arith.addf %557, %569 : vector<16x32xf32>
    %c752 = arith.constant 752 : index
    %c0_107 = arith.constant 0 : index
    %571 = vector.load %arg3[%c752, %c0_107] : memref<1128x128xf32, #tpu.memory_space<vmem>>, vector<1x32xf32>
    %c760 = arith.constant 760 : index
    %c0_108 = arith.constant 0 : index
    %572 = vector.load %arg3[%c760, %c0_108] : memref<1128x128xf32, #tpu.memory_space<vmem>>, vector<1x32xf32>
    %cst_109 = arith.constant dense<0.000000e+00> : vector<16xf32>
    %573 = vector.multi_reduction <add>, %570, %cst_109 [1] : vector<16x32xf32> to vector<16xf32>
    %574 = vector.shape_cast %573 : vector<16xf32> to vector<16x1xf32>
    %cst_110 = arith.constant 3.200000e+01 : f32
    %575 = vector.broadcast %cst_110 : f32 to vector<16x1xf32>
    %576 = arith.divf %574, %575 : vector<16x1xf32>
    %577 = vector.broadcast %576 : vector<16x1xf32> to vector<16x32xf32>
    %578 = arith.subf %570, %577 : vector<16x32xf32>
    %579 = arith.mulf %578, %578 : vector<16x32xf32>
    %cst_111 = arith.constant dense<0.000000e+00> : vector<16xf32>
    %580 = vector.multi_reduction <add>, %579, %cst_111 [1] : vector<16x32xf32> to vector<16xf32>
    %581 = vector.shape_cast %580 : vector<16xf32> to vector<16x1xf32>
    %cst_112 = arith.constant 3.200000e+01 : f32
    %582 = vector.broadcast %cst_112 : f32 to vector<16x1xf32>
    %583 = arith.divf %581, %582 : vector<16x1xf32>
    %584 = vector.broadcast %576 : vector<16x1xf32> to vector<16x32xf32>
    %585 = arith.subf %570, %584 : vector<16x32xf32>
    %cst_113 = arith.constant 9.99999974E-6 : f32
    %586 = vector.broadcast %cst_113 : f32 to vector<16x1xf32>
    %587 = arith.addf %583, %586 : vector<16x1xf32>
    %588 = math.rsqrt %587 : vector<16x1xf32>
    %589 = vector.broadcast %588 : vector<16x1xf32> to vector<16x32xf32>
    %590 = arith.mulf %585, %589 : vector<16x32xf32>
    %591 = vector.broadcast %571 : vector<1x32xf32> to vector<16x32xf32>
    %592 = arith.mulf %590, %591 : vector<16x32xf32>
    %593 = vector.broadcast %572 : vector<1x32xf32> to vector<16x32xf32>
    %594 = arith.addf %592, %593 : vector<16x32xf32>
    %c768 = arith.constant 768 : index
    %c0_114 = arith.constant 0 : index
    %595 = vector.load %arg3[%c768, %c0_114] : memref<1128x128xf32, #tpu.memory_space<vmem>>, vector<32x96xf32>
    %c800 = arith.constant 800 : index
    %c0_115 = arith.constant 0 : index
    %596 = vector.load %arg3[%c800, %c0_115] : memref<1128x128xf32, #tpu.memory_space<vmem>>, vector<1x96xf32>
    %cst_116 = arith.constant dense<0.000000e+00> : vector<16x96xf32>
    %597 = tpu.matmul %594, %595, %cst_116 {dimension_numbers = #tpu.dot_dimension_numbers<[1], [0], [0], [1], [0, 0, 1, 1], [], []>} : vector<16x32xf32>, vector<32x96xf32>, vector<16x96xf32> -> vector<16x96xf32>
    %598 = vector.broadcast %596 : vector<1x96xf32> to vector<16x96xf32>
    %599 = arith.addf %597, %598 : vector<16x96xf32>
    %600 = vector.extract_strided_slice %599 {offsets = [0, 0], sizes = [16, 32], strides = [1, 1]} : vector<16x96xf32> to vector<16x32xf32>
    %601 = vector.extract_strided_slice %599 {offsets = [0, 32], sizes = [16, 32], strides = [1, 1]} : vector<16x96xf32> to vector<16x32xf32>
    %602 = vector.extract_strided_slice %599 {offsets = [0, 64], sizes = [16, 32], strides = [1, 1]} : vector<16x96xf32> to vector<16x32xf32>
    %603 = vector.extract_strided_slice %600 {offsets = [0, 0], sizes = [8, 8], strides = [1, 1]} : vector<16x32xf32> to vector<8x8xf32>
    %604 = vector.extract_strided_slice %600 {offsets = [0, 8], sizes = [8, 8], strides = [1, 1]} : vector<16x32xf32> to vector<8x8xf32>
    %605 = vector.extract_strided_slice %600 {offsets = [0, 16], sizes = [8, 8], strides = [1, 1]} : vector<16x32xf32> to vector<8x8xf32>
    %606 = vector.extract_strided_slice %600 {offsets = [0, 24], sizes = [8, 8], strides = [1, 1]} : vector<16x32xf32> to vector<8x8xf32>
    %607 = vector.extract_strided_slice %600 {offsets = [8, 0], sizes = [8, 8], strides = [1, 1]} : vector<16x32xf32> to vector<8x8xf32>
    %608 = vector.extract_strided_slice %600 {offsets = [8, 8], sizes = [8, 8], strides = [1, 1]} : vector<16x32xf32> to vector<8x8xf32>
    %609 = vector.extract_strided_slice %600 {offsets = [8, 16], sizes = [8, 8], strides = [1, 1]} : vector<16x32xf32> to vector<8x8xf32>
    %610 = vector.extract_strided_slice %600 {offsets = [8, 24], sizes = [8, 8], strides = [1, 1]} : vector<16x32xf32> to vector<8x8xf32>
    %611 = vector.shape_cast %603 : vector<8x8xf32> to vector<1x8x8xf32>
    %612 = vector.shape_cast %604 : vector<8x8xf32> to vector<1x8x8xf32>
    %613 = vector.shape_cast %605 : vector<8x8xf32> to vector<1x8x8xf32>
    %614 = vector.shape_cast %606 : vector<8x8xf32> to vector<1x8x8xf32>
    %615 = vector.shape_cast %607 : vector<8x8xf32> to vector<1x8x8xf32>
    %616 = vector.shape_cast %608 : vector<8x8xf32> to vector<1x8x8xf32>
    %617 = vector.shape_cast %609 : vector<8x8xf32> to vector<1x8x8xf32>
    %618 = vector.shape_cast %610 : vector<8x8xf32> to vector<1x8x8xf32>
    %619 = tpu.concatenate %611, %612, %613, %614, %615, %616, %617, %618 in 0 : vector<1x8x8xf32>, vector<1x8x8xf32>, vector<1x8x8xf32>, vector<1x8x8xf32>, vector<1x8x8xf32>, vector<1x8x8xf32>, vector<1x8x8xf32>, vector<1x8x8xf32> -> vector<8x8x8xf32>
    %620 = vector.extract_strided_slice %601 {offsets = [0, 0], sizes = [8, 8], strides = [1, 1]} : vector<16x32xf32> to vector<8x8xf32>
    %621 = vector.extract_strided_slice %601 {offsets = [0, 8], sizes = [8, 8], strides = [1, 1]} : vector<16x32xf32> to vector<8x8xf32>
    %622 = vector.extract_strided_slice %601 {offsets = [0, 16], sizes = [8, 8], strides = [1, 1]} : vector<16x32xf32> to vector<8x8xf32>
    %623 = vector.extract_strided_slice %601 {offsets = [0, 24], sizes = [8, 8], strides = [1, 1]} : vector<16x32xf32> to vector<8x8xf32>
    %624 = vector.extract_strided_slice %601 {offsets = [8, 0], sizes = [8, 8], strides = [1, 1]} : vector<16x32xf32> to vector<8x8xf32>
    %625 = vector.extract_strided_slice %601 {offsets = [8, 8], sizes = [8, 8], strides = [1, 1]} : vector<16x32xf32> to vector<8x8xf32>
    %626 = vector.extract_strided_slice %601 {offsets = [8, 16], sizes = [8, 8], strides = [1, 1]} : vector<16x32xf32> to vector<8x8xf32>
    %627 = vector.extract_strided_slice %601 {offsets = [8, 24], sizes = [8, 8], strides = [1, 1]} : vector<16x32xf32> to vector<8x8xf32>
    %628 = vector.shape_cast %620 : vector<8x8xf32> to vector<1x8x8xf32>
    %629 = vector.shape_cast %621 : vector<8x8xf32> to vector<1x8x8xf32>
    %630 = vector.shape_cast %622 : vector<8x8xf32> to vector<1x8x8xf32>
    %631 = vector.shape_cast %623 : vector<8x8xf32> to vector<1x8x8xf32>
    %632 = vector.shape_cast %624 : vector<8x8xf32> to vector<1x8x8xf32>
    %633 = vector.shape_cast %625 : vector<8x8xf32> to vector<1x8x8xf32>
    %634 = vector.shape_cast %626 : vector<8x8xf32> to vector<1x8x8xf32>
    %635 = vector.shape_cast %627 : vector<8x8xf32> to vector<1x8x8xf32>
    %636 = tpu.concatenate %628, %629, %630, %631, %632, %633, %634, %635 in 0 : vector<1x8x8xf32>, vector<1x8x8xf32>, vector<1x8x8xf32>, vector<1x8x8xf32>, vector<1x8x8xf32>, vector<1x8x8xf32>, vector<1x8x8xf32>, vector<1x8x8xf32> -> vector<8x8x8xf32>
    %637 = vector.extract_strided_slice %602 {offsets = [0, 0], sizes = [8, 8], strides = [1, 1]} : vector<16x32xf32> to vector<8x8xf32>
    %638 = vector.extract_strided_slice %602 {offsets = [0, 8], sizes = [8, 8], strides = [1, 1]} : vector<16x32xf32> to vector<8x8xf32>
    %639 = vector.extract_strided_slice %602 {offsets = [0, 16], sizes = [8, 8], strides = [1, 1]} : vector<16x32xf32> to vector<8x8xf32>
    %640 = vector.extract_strided_slice %602 {offsets = [0, 24], sizes = [8, 8], strides = [1, 1]} : vector<16x32xf32> to vector<8x8xf32>
    %641 = vector.extract_strided_slice %602 {offsets = [8, 0], sizes = [8, 8], strides = [1, 1]} : vector<16x32xf32> to vector<8x8xf32>
    %642 = vector.extract_strided_slice %602 {offsets = [8, 8], sizes = [8, 8], strides = [1, 1]} : vector<16x32xf32> to vector<8x8xf32>
    %643 = vector.extract_strided_slice %602 {offsets = [8, 16], sizes = [8, 8], strides = [1, 1]} : vector<16x32xf32> to vector<8x8xf32>
    %644 = vector.extract_strided_slice %602 {offsets = [8, 24], sizes = [8, 8], strides = [1, 1]} : vector<16x32xf32> to vector<8x8xf32>
    %645 = vector.shape_cast %637 : vector<8x8xf32> to vector<1x8x8xf32>
    %646 = vector.shape_cast %638 : vector<8x8xf32> to vector<1x8x8xf32>
    %647 = vector.shape_cast %639 : vector<8x8xf32> to vector<1x8x8xf32>
    %648 = vector.shape_cast %640 : vector<8x8xf32> to vector<1x8x8xf32>
    %649 = vector.shape_cast %641 : vector<8x8xf32> to vector<1x8x8xf32>
    %650 = vector.shape_cast %642 : vector<8x8xf32> to vector<1x8x8xf32>
    %651 = vector.shape_cast %643 : vector<8x8xf32> to vector<1x8x8xf32>
    %652 = vector.shape_cast %644 : vector<8x8xf32> to vector<1x8x8xf32>
    %653 = tpu.concatenate %645, %646, %647, %648, %649, %650, %651, %652 in 0 : vector<1x8x8xf32>, vector<1x8x8xf32>, vector<1x8x8xf32>, vector<1x8x8xf32>, vector<1x8x8xf32>, vector<1x8x8xf32>, vector<1x8x8xf32>, vector<1x8x8xf32> -> vector<8x8x8xf32>
    "tpu.trace_start"() <{level = 10 : i32, message = "bqd,bkd->bqk"}> : () -> ()
    %cst_117 = arith.constant dense<0.000000e+00> : vector<8x8x8xf32>
    %654 = tpu.matmul %619, %636, %cst_117 {dimension_numbers = #tpu.dot_dimension_numbers<[2], [2], [1], [1], [0, 0, 0, 1, 1, 1], [0], [0]>} : vector<8x8x8xf32>, vector<8x8x8xf32>, vector<8x8x8xf32> -> vector<8x8x8xf32>
    "tpu.trace_stop"() : () -> ()
    %cst_118 = arith.constant dense<0xFF800000> : vector<8x8xf32>
    %655 = vector.multi_reduction <maximumf>, %654, %cst_118 [2] : vector<8x8x8xf32> to vector<8x8xf32>
    %656 = vector.shape_cast %655 : vector<8x8xf32> to vector<8x8x1xf32>
    %657 = vector.broadcast %656 : vector<8x8x1xf32> to vector<8x8x8xf32>
    %658 = arith.subf %654, %657 : vector<8x8x8xf32>
    %659 = math.exp %658 : vector<8x8x8xf32>
    %cst_119 = arith.constant dense<0.000000e+00> : vector<8x8xf32>
    %660 = vector.multi_reduction <add>, %659, %cst_119 [2] : vector<8x8x8xf32> to vector<8x8xf32>
    %661 = vector.shape_cast %660 : vector<8x8xf32> to vector<8x8x1xf32>
    %662 = vector.broadcast %661 : vector<8x8x1xf32> to vector<8x8x8xf32>
    %663 = arith.divf %659, %662 : vector<8x8x8xf32>
    "tpu.trace_start"() <{level = 10 : i32, message = "bqk,bkd->bqd"}> : () -> ()
    %cst_120 = arith.constant dense<0.000000e+00> : vector<8x8x8xf32>
    %664 = tpu.matmul %663, %653, %cst_120 {dimension_numbers = #tpu.dot_dimension_numbers<[2], [1], [1], [2], [0, 0, 0, 1, 1, 2], [0], [0]>} : vector<8x8x8xf32>, vector<8x8x8xf32>, vector<8x8x8xf32> -> vector<8x8x8xf32>
    "tpu.trace_stop"() : () -> ()
    %665 = vector.extract_strided_slice %664 {offsets = [0, 0, 0], sizes = [1, 8, 8], strides = [1, 1, 1]} : vector<8x8x8xf32> to vector<1x8x8xf32>
    %666 = vector.shape_cast %665 : vector<1x8x8xf32> to vector<8x8xf32>
    %667 = vector.extract_strided_slice %664 {offsets = [1, 0, 0], sizes = [1, 8, 8], strides = [1, 1, 1]} : vector<8x8x8xf32> to vector<1x8x8xf32>
    %668 = vector.shape_cast %667 : vector<1x8x8xf32> to vector<8x8xf32>
    %669 = vector.extract_strided_slice %664 {offsets = [2, 0, 0], sizes = [1, 8, 8], strides = [1, 1, 1]} : vector<8x8x8xf32> to vector<1x8x8xf32>
    %670 = vector.shape_cast %669 : vector<1x8x8xf32> to vector<8x8xf32>
    %671 = vector.extract_strided_slice %664 {offsets = [3, 0, 0], sizes = [1, 8, 8], strides = [1, 1, 1]} : vector<8x8x8xf32> to vector<1x8x8xf32>
    %672 = vector.shape_cast %671 : vector<1x8x8xf32> to vector<8x8xf32>
    %673 = tpu.concatenate %666, %668, %670, %672 in 1 : vector<8x8xf32>, vector<8x8xf32>, vector<8x8xf32>, vector<8x8xf32> -> vector<8x32xf32>
    %674 = vector.extract_strided_slice %664 {offsets = [4, 0, 0], sizes = [1, 8, 8], strides = [1, 1, 1]} : vector<8x8x8xf32> to vector<1x8x8xf32>
    %675 = vector.shape_cast %674 : vector<1x8x8xf32> to vector<8x8xf32>
    %676 = vector.extract_strided_slice %664 {offsets = [5, 0, 0], sizes = [1, 8, 8], strides = [1, 1, 1]} : vector<8x8x8xf32> to vector<1x8x8xf32>
    %677 = vector.shape_cast %676 : vector<1x8x8xf32> to vector<8x8xf32>
    %678 = vector.extract_strided_slice %664 {offsets = [6, 0, 0], sizes = [1, 8, 8], strides = [1, 1, 1]} : vector<8x8x8xf32> to vector<1x8x8xf32>
    %679 = vector.shape_cast %678 : vector<1x8x8xf32> to vector<8x8xf32>
    %680 = vector.extract_strided_slice %664 {offsets = [7, 0, 0], sizes = [1, 8, 8], strides = [1, 1, 1]} : vector<8x8x8xf32> to vector<1x8x8xf32>
    %681 = vector.shape_cast %680 : vector<1x8x8xf32> to vector<8x8xf32>
    %682 = tpu.concatenate %675, %677, %679, %681 in 1 : vector<8x8xf32>, vector<8x8xf32>, vector<8x8xf32>, vector<8x8xf32> -> vector<8x32xf32>
    %683 = tpu.concatenate %673, %682 in 0 : vector<8x32xf32>, vector<8x32xf32> -> vector<16x32xf32>
    %c808 = arith.constant 808 : index
    %c0_121 = arith.constant 0 : index
    %684 = vector.load %arg3[%c808, %c0_121] : memref<1128x128xf32, #tpu.memory_space<vmem>>, vector<32x32xf32>
    %c840 = arith.constant 840 : index
    %c0_122 = arith.constant 0 : index
    %685 = vector.load %arg3[%c840, %c0_122] : memref<1128x128xf32, #tpu.memory_space<vmem>>, vector<1x32xf32>
    %cst_123 = arith.constant dense<0.000000e+00> : vector<16x32xf32>
    %686 = tpu.matmul %683, %684, %cst_123 {dimension_numbers = #tpu.dot_dimension_numbers<[1], [0], [0], [1], [0, 0, 1, 1], [], []>} : vector<16x32xf32>, vector<32x32xf32>, vector<16x32xf32> -> vector<16x32xf32>
    %687 = vector.broadcast %685 : vector<1x32xf32> to vector<16x32xf32>
    %688 = arith.addf %686, %687 : vector<16x32xf32>
    %689 = arith.addf %594, %688 : vector<16x32xf32>
    %c848 = arith.constant 848 : index
    %c0_124 = arith.constant 0 : index
    %690 = vector.load %arg3[%c848, %c0_124] : memref<1128x128xf32, #tpu.memory_space<vmem>>, vector<1x32xf32>
    %c856 = arith.constant 856 : index
    %c0_125 = arith.constant 0 : index
    %691 = vector.load %arg3[%c856, %c0_125] : memref<1128x128xf32, #tpu.memory_space<vmem>>, vector<1x32xf32>
    %cst_126 = arith.constant dense<0.000000e+00> : vector<16xf32>
    %692 = vector.multi_reduction <add>, %689, %cst_126 [1] : vector<16x32xf32> to vector<16xf32>
    %693 = vector.shape_cast %692 : vector<16xf32> to vector<16x1xf32>
    %cst_127 = arith.constant 3.200000e+01 : f32
    %694 = vector.broadcast %cst_127 : f32 to vector<16x1xf32>
    %695 = arith.divf %693, %694 : vector<16x1xf32>
    %696 = vector.broadcast %695 : vector<16x1xf32> to vector<16x32xf32>
    %697 = arith.subf %689, %696 : vector<16x32xf32>
    %698 = arith.mulf %697, %697 : vector<16x32xf32>
    %cst_128 = arith.constant dense<0.000000e+00> : vector<16xf32>
    %699 = vector.multi_reduction <add>, %698, %cst_128 [1] : vector<16x32xf32> to vector<16xf32>
    %700 = vector.shape_cast %699 : vector<16xf32> to vector<16x1xf32>
    %cst_129 = arith.constant 3.200000e+01 : f32
    %701 = vector.broadcast %cst_129 : f32 to vector<16x1xf32>
    %702 = arith.divf %700, %701 : vector<16x1xf32>
    %703 = vector.broadcast %695 : vector<16x1xf32> to vector<16x32xf32>
    %704 = arith.subf %689, %703 : vector<16x32xf32>
    %cst_130 = arith.constant 9.99999974E-6 : f32
    %705 = vector.broadcast %cst_130 : f32 to vector<16x1xf32>
    %706 = arith.addf %702, %705 : vector<16x1xf32>
    %707 = math.rsqrt %706 : vector<16x1xf32>
    %708 = vector.broadcast %707 : vector<16x1xf32> to vector<16x32xf32>
    %709 = arith.mulf %704, %708 : vector<16x32xf32>
    %710 = vector.broadcast %690 : vector<1x32xf32> to vector<16x32xf32>
    %711 = arith.mulf %709, %710 : vector<16x32xf32>
    %712 = vector.broadcast %691 : vector<1x32xf32> to vector<16x32xf32>
    %713 = arith.addf %711, %712 : vector<16x32xf32>
    %c864 = arith.constant 864 : index
    %c0_131 = arith.constant 0 : index
    %714 = vector.load %arg3[%c864, %c0_131] : memref<1128x128xf32, #tpu.memory_space<vmem>>, vector<32x96xf32>
    %c896 = arith.constant 896 : index
    %c0_132 = arith.constant 0 : index
    %715 = vector.load %arg3[%c896, %c0_132] : memref<1128x128xf32, #tpu.memory_space<vmem>>, vector<1x96xf32>
    %716 = vector.extract_strided_slice %714 {offsets = [0, 0], sizes = [32, 32], strides = [1, 1]} : vector<32x96xf32> to vector<32x32xf32>
    %cst_133 = arith.constant dense<0.000000e+00> : vector<16x32xf32>
    %717 = tpu.matmul %713, %716, %cst_133 {dimension_numbers = #tpu.dot_dimension_numbers<[1], [0], [0], [1], [0, 0, 1, 1], [], []>} : vector<16x32xf32>, vector<32x32xf32>, vector<16x32xf32> -> vector<16x32xf32>
    %718 = vector.extract_strided_slice %715 {offsets = [0, 0], sizes = [1, 32], strides = [1, 1]} : vector<1x96xf32> to vector<1x32xf32>
    %719 = vector.broadcast %718 : vector<1x32xf32> to vector<16x32xf32>
    %720 = arith.addf %717, %719 : vector<16x32xf32>
    %721 = vector.extract_strided_slice %714 {offsets = [0, 32], sizes = [32, 64], strides = [1, 1]} : vector<32x96xf32> to vector<32x64xf32>
    %cst_134 = arith.constant dense<0.000000e+00> : vector<16x64xf32>
    %722 = tpu.matmul %1, %721, %cst_134 {dimension_numbers = #tpu.dot_dimension_numbers<[1], [0], [0], [1], [0, 0, 1, 1], [], []>} : vector<16x32xf32>, vector<32x64xf32>, vector<16x64xf32> -> vector<16x64xf32>
    %723 = vector.extract_strided_slice %715 {offsets = [0, 32], sizes = [1, 64], strides = [1, 1]} : vector<1x96xf32> to vector<1x64xf32>
    %724 = vector.broadcast %723 : vector<1x64xf32> to vector<16x64xf32>
    %725 = arith.addf %722, %724 : vector<16x64xf32>
    %726 = vector.extract_strided_slice %725 {offsets = [0, 0], sizes = [16, 32], strides = [1, 1]} : vector<16x64xf32> to vector<16x32xf32>
    %727 = vector.extract_strided_slice %725 {offsets = [0, 32], sizes = [16, 32], strides = [1, 1]} : vector<16x64xf32> to vector<16x32xf32>
    %728 = vector.extract_strided_slice %720 {offsets = [0, 0], sizes = [8, 8], strides = [1, 1]} : vector<16x32xf32> to vector<8x8xf32>
    %729 = vector.extract_strided_slice %720 {offsets = [0, 8], sizes = [8, 8], strides = [1, 1]} : vector<16x32xf32> to vector<8x8xf32>
    %730 = vector.extract_strided_slice %720 {offsets = [0, 16], sizes = [8, 8], strides = [1, 1]} : vector<16x32xf32> to vector<8x8xf32>
    %731 = vector.extract_strided_slice %720 {offsets = [0, 24], sizes = [8, 8], strides = [1, 1]} : vector<16x32xf32> to vector<8x8xf32>
    %732 = vector.extract_strided_slice %720 {offsets = [8, 0], sizes = [8, 8], strides = [1, 1]} : vector<16x32xf32> to vector<8x8xf32>
    %733 = vector.extract_strided_slice %720 {offsets = [8, 8], sizes = [8, 8], strides = [1, 1]} : vector<16x32xf32> to vector<8x8xf32>
    %734 = vector.extract_strided_slice %720 {offsets = [8, 16], sizes = [8, 8], strides = [1, 1]} : vector<16x32xf32> to vector<8x8xf32>
    %735 = vector.extract_strided_slice %720 {offsets = [8, 24], sizes = [8, 8], strides = [1, 1]} : vector<16x32xf32> to vector<8x8xf32>
    %736 = vector.shape_cast %728 : vector<8x8xf32> to vector<1x8x8xf32>
    %737 = vector.shape_cast %729 : vector<8x8xf32> to vector<1x8x8xf32>
    %738 = vector.shape_cast %730 : vector<8x8xf32> to vector<1x8x8xf32>
    %739 = vector.shape_cast %731 : vector<8x8xf32> to vector<1x8x8xf32>
    %740 = vector.shape_cast %732 : vector<8x8xf32> to vector<1x8x8xf32>
    %741 = vector.shape_cast %733 : vector<8x8xf32> to vector<1x8x8xf32>
    %742 = vector.shape_cast %734 : vector<8x8xf32> to vector<1x8x8xf32>
    %743 = vector.shape_cast %735 : vector<8x8xf32> to vector<1x8x8xf32>
    %744 = tpu.concatenate %736, %737, %738, %739, %740, %741, %742, %743 in 0 : vector<1x8x8xf32>, vector<1x8x8xf32>, vector<1x8x8xf32>, vector<1x8x8xf32>, vector<1x8x8xf32>, vector<1x8x8xf32>, vector<1x8x8xf32>, vector<1x8x8xf32> -> vector<8x8x8xf32>
    %745 = vector.extract_strided_slice %726 {offsets = [0, 0], sizes = [8, 8], strides = [1, 1]} : vector<16x32xf32> to vector<8x8xf32>
    %746 = vector.extract_strided_slice %726 {offsets = [0, 8], sizes = [8, 8], strides = [1, 1]} : vector<16x32xf32> to vector<8x8xf32>
    %747 = vector.extract_strided_slice %726 {offsets = [0, 16], sizes = [8, 8], strides = [1, 1]} : vector<16x32xf32> to vector<8x8xf32>
    %748 = vector.extract_strided_slice %726 {offsets = [0, 24], sizes = [8, 8], strides = [1, 1]} : vector<16x32xf32> to vector<8x8xf32>
    %749 = vector.extract_strided_slice %726 {offsets = [8, 0], sizes = [8, 8], strides = [1, 1]} : vector<16x32xf32> to vector<8x8xf32>
    %750 = vector.extract_strided_slice %726 {offsets = [8, 8], sizes = [8, 8], strides = [1, 1]} : vector<16x32xf32> to vector<8x8xf32>
    %751 = vector.extract_strided_slice %726 {offsets = [8, 16], sizes = [8, 8], strides = [1, 1]} : vector<16x32xf32> to vector<8x8xf32>
    %752 = vector.extract_strided_slice %726 {offsets = [8, 24], sizes = [8, 8], strides = [1, 1]} : vector<16x32xf32> to vector<8x8xf32>
    %753 = vector.shape_cast %745 : vector<8x8xf32> to vector<1x8x8xf32>
    %754 = vector.shape_cast %746 : vector<8x8xf32> to vector<1x8x8xf32>
    %755 = vector.shape_cast %747 : vector<8x8xf32> to vector<1x8x8xf32>
    %756 = vector.shape_cast %748 : vector<8x8xf32> to vector<1x8x8xf32>
    %757 = vector.shape_cast %749 : vector<8x8xf32> to vector<1x8x8xf32>
    %758 = vector.shape_cast %750 : vector<8x8xf32> to vector<1x8x8xf32>
    %759 = vector.shape_cast %751 : vector<8x8xf32> to vector<1x8x8xf32>
    %760 = vector.shape_cast %752 : vector<8x8xf32> to vector<1x8x8xf32>
    %761 = tpu.concatenate %753, %754, %755, %756, %757, %758, %759, %760 in 0 : vector<1x8x8xf32>, vector<1x8x8xf32>, vector<1x8x8xf32>, vector<1x8x8xf32>, vector<1x8x8xf32>, vector<1x8x8xf32>, vector<1x8x8xf32>, vector<1x8x8xf32> -> vector<8x8x8xf32>
    %762 = vector.extract_strided_slice %727 {offsets = [0, 0], sizes = [8, 8], strides = [1, 1]} : vector<16x32xf32> to vector<8x8xf32>
    %763 = vector.extract_strided_slice %727 {offsets = [0, 8], sizes = [8, 8], strides = [1, 1]} : vector<16x32xf32> to vector<8x8xf32>
    %764 = vector.extract_strided_slice %727 {offsets = [0, 16], sizes = [8, 8], strides = [1, 1]} : vector<16x32xf32> to vector<8x8xf32>
    %765 = vector.extract_strided_slice %727 {offsets = [0, 24], sizes = [8, 8], strides = [1, 1]} : vector<16x32xf32> to vector<8x8xf32>
    %766 = vector.extract_strided_slice %727 {offsets = [8, 0], sizes = [8, 8], strides = [1, 1]} : vector<16x32xf32> to vector<8x8xf32>
    %767 = vector.extract_strided_slice %727 {offsets = [8, 8], sizes = [8, 8], strides = [1, 1]} : vector<16x32xf32> to vector<8x8xf32>
    %768 = vector.extract_strided_slice %727 {offsets = [8, 16], sizes = [8, 8], strides = [1, 1]} : vector<16x32xf32> to vector<8x8xf32>
    %769 = vector.extract_strided_slice %727 {offsets = [8, 24], sizes = [8, 8], strides = [1, 1]} : vector<16x32xf32> to vector<8x8xf32>
    %770 = vector.shape_cast %762 : vector<8x8xf32> to vector<1x8x8xf32>
    %771 = vector.shape_cast %763 : vector<8x8xf32> to vector<1x8x8xf32>
    %772 = vector.shape_cast %764 : vector<8x8xf32> to vector<1x8x8xf32>
    %773 = vector.shape_cast %765 : vector<8x8xf32> to vector<1x8x8xf32>
    %774 = vector.shape_cast %766 : vector<8x8xf32> to vector<1x8x8xf32>
    %775 = vector.shape_cast %767 : vector<8x8xf32> to vector<1x8x8xf32>
    %776 = vector.shape_cast %768 : vector<8x8xf32> to vector<1x8x8xf32>
    %777 = vector.shape_cast %769 : vector<8x8xf32> to vector<1x8x8xf32>
    %778 = tpu.concatenate %770, %771, %772, %773, %774, %775, %776, %777 in 0 : vector<1x8x8xf32>, vector<1x8x8xf32>, vector<1x8x8xf32>, vector<1x8x8xf32>, vector<1x8x8xf32>, vector<1x8x8xf32>, vector<1x8x8xf32>, vector<1x8x8xf32> -> vector<8x8x8xf32>
    "tpu.trace_start"() <{level = 10 : i32, message = "bqd,bkd->bqk"}> : () -> ()
    %cst_135 = arith.constant dense<0.000000e+00> : vector<8x8x8xf32>
    %779 = tpu.matmul %744, %761, %cst_135 {dimension_numbers = #tpu.dot_dimension_numbers<[2], [2], [1], [1], [0, 0, 0, 1, 1, 1], [0], [0]>} : vector<8x8x8xf32>, vector<8x8x8xf32>, vector<8x8x8xf32> -> vector<8x8x8xf32>
    "tpu.trace_stop"() : () -> ()
    %cst_136 = arith.constant dense<0xFF800000> : vector<8x8xf32>
    %780 = vector.multi_reduction <maximumf>, %779, %cst_136 [2] : vector<8x8x8xf32> to vector<8x8xf32>
    %781 = vector.shape_cast %780 : vector<8x8xf32> to vector<8x8x1xf32>
    %782 = vector.broadcast %781 : vector<8x8x1xf32> to vector<8x8x8xf32>
    %783 = arith.subf %779, %782 : vector<8x8x8xf32>
    %784 = math.exp %783 : vector<8x8x8xf32>
    %cst_137 = arith.constant dense<0.000000e+00> : vector<8x8xf32>
    %785 = vector.multi_reduction <add>, %784, %cst_137 [2] : vector<8x8x8xf32> to vector<8x8xf32>
    %786 = vector.shape_cast %785 : vector<8x8xf32> to vector<8x8x1xf32>
    %787 = vector.broadcast %786 : vector<8x8x1xf32> to vector<8x8x8xf32>
    %788 = arith.divf %784, %787 : vector<8x8x8xf32>
    "tpu.trace_start"() <{level = 10 : i32, message = "bqk,bkd->bqd"}> : () -> ()
    %cst_138 = arith.constant dense<0.000000e+00> : vector<8x8x8xf32>
    %789 = tpu.matmul %788, %778, %cst_138 {dimension_numbers = #tpu.dot_dimension_numbers<[2], [1], [1], [2], [0, 0, 0, 1, 1, 2], [0], [0]>} : vector<8x8x8xf32>, vector<8x8x8xf32>, vector<8x8x8xf32> -> vector<8x8x8xf32>
    "tpu.trace_stop"() : () -> ()
    %790 = vector.extract_strided_slice %789 {offsets = [0, 0, 0], sizes = [1, 8, 8], strides = [1, 1, 1]} : vector<8x8x8xf32> to vector<1x8x8xf32>
    %791 = vector.shape_cast %790 : vector<1x8x8xf32> to vector<8x8xf32>
    %792 = vector.extract_strided_slice %789 {offsets = [1, 0, 0], sizes = [1, 8, 8], strides = [1, 1, 1]} : vector<8x8x8xf32> to vector<1x8x8xf32>
    %793 = vector.shape_cast %792 : vector<1x8x8xf32> to vector<8x8xf32>
    %794 = vector.extract_strided_slice %789 {offsets = [2, 0, 0], sizes = [1, 8, 8], strides = [1, 1, 1]} : vector<8x8x8xf32> to vector<1x8x8xf32>
    %795 = vector.shape_cast %794 : vector<1x8x8xf32> to vector<8x8xf32>
    %796 = vector.extract_strided_slice %789 {offsets = [3, 0, 0], sizes = [1, 8, 8], strides = [1, 1, 1]} : vector<8x8x8xf32> to vector<1x8x8xf32>
    %797 = vector.shape_cast %796 : vector<1x8x8xf32> to vector<8x8xf32>
    %798 = tpu.concatenate %791, %793, %795, %797 in 1 : vector<8x8xf32>, vector<8x8xf32>, vector<8x8xf32>, vector<8x8xf32> -> vector<8x32xf32>
    %799 = vector.extract_strided_slice %789 {offsets = [4, 0, 0], sizes = [1, 8, 8], strides = [1, 1, 1]} : vector<8x8x8xf32> to vector<1x8x8xf32>
    %800 = vector.shape_cast %799 : vector<1x8x8xf32> to vector<8x8xf32>
    %801 = vector.extract_strided_slice %789 {offsets = [5, 0, 0], sizes = [1, 8, 8], strides = [1, 1, 1]} : vector<8x8x8xf32> to vector<1x8x8xf32>
    %802 = vector.shape_cast %801 : vector<1x8x8xf32> to vector<8x8xf32>
    %803 = vector.extract_strided_slice %789 {offsets = [6, 0, 0], sizes = [1, 8, 8], strides = [1, 1, 1]} : vector<8x8x8xf32> to vector<1x8x8xf32>
    %804 = vector.shape_cast %803 : vector<1x8x8xf32> to vector<8x8xf32>
    %805 = vector.extract_strided_slice %789 {offsets = [7, 0, 0], sizes = [1, 8, 8], strides = [1, 1, 1]} : vector<8x8x8xf32> to vector<1x8x8xf32>
    %806 = vector.shape_cast %805 : vector<1x8x8xf32> to vector<8x8xf32>
    %807 = tpu.concatenate %800, %802, %804, %806 in 1 : vector<8x8xf32>, vector<8x8xf32>, vector<8x8xf32>, vector<8x8xf32> -> vector<8x32xf32>
    %808 = tpu.concatenate %798, %807 in 0 : vector<8x32xf32>, vector<8x32xf32> -> vector<16x32xf32>
    %c904 = arith.constant 904 : index
    %c0_139 = arith.constant 0 : index
    %809 = vector.load %arg3[%c904, %c0_139] : memref<1128x128xf32, #tpu.memory_space<vmem>>, vector<32x32xf32>
    %c936 = arith.constant 936 : index
    %c0_140 = arith.constant 0 : index
    %810 = vector.load %arg3[%c936, %c0_140] : memref<1128x128xf32, #tpu.memory_space<vmem>>, vector<1x32xf32>
    %cst_141 = arith.constant dense<0.000000e+00> : vector<16x32xf32>
    %811 = tpu.matmul %808, %809, %cst_141 {dimension_numbers = #tpu.dot_dimension_numbers<[1], [0], [0], [1], [0, 0, 1, 1], [], []>} : vector<16x32xf32>, vector<32x32xf32>, vector<16x32xf32> -> vector<16x32xf32>
    %812 = vector.broadcast %810 : vector<1x32xf32> to vector<16x32xf32>
    %813 = arith.addf %811, %812 : vector<16x32xf32>
    %814 = arith.addf %713, %813 : vector<16x32xf32>
    %c944 = arith.constant 944 : index
    %c0_142 = arith.constant 0 : index
    %815 = vector.load %arg3[%c944, %c0_142] : memref<1128x128xf32, #tpu.memory_space<vmem>>, vector<1x32xf32>
    %c952 = arith.constant 952 : index
    %c0_143 = arith.constant 0 : index
    %816 = vector.load %arg3[%c952, %c0_143] : memref<1128x128xf32, #tpu.memory_space<vmem>>, vector<1x32xf32>
    %cst_144 = arith.constant dense<0.000000e+00> : vector<16xf32>
    %817 = vector.multi_reduction <add>, %814, %cst_144 [1] : vector<16x32xf32> to vector<16xf32>
    %818 = vector.shape_cast %817 : vector<16xf32> to vector<16x1xf32>
    %cst_145 = arith.constant 3.200000e+01 : f32
    %819 = vector.broadcast %cst_145 : f32 to vector<16x1xf32>
    %820 = arith.divf %818, %819 : vector<16x1xf32>
    %821 = vector.broadcast %820 : vector<16x1xf32> to vector<16x32xf32>
    %822 = arith.subf %814, %821 : vector<16x32xf32>
    %823 = arith.mulf %822, %822 : vector<16x32xf32>
    %cst_146 = arith.constant dense<0.000000e+00> : vector<16xf32>
    %824 = vector.multi_reduction <add>, %823, %cst_146 [1] : vector<16x32xf32> to vector<16xf32>
    %825 = vector.shape_cast %824 : vector<16xf32> to vector<16x1xf32>
    %cst_147 = arith.constant 3.200000e+01 : f32
    %826 = vector.broadcast %cst_147 : f32 to vector<16x1xf32>
    %827 = arith.divf %825, %826 : vector<16x1xf32>
    %828 = vector.broadcast %820 : vector<16x1xf32> to vector<16x32xf32>
    %829 = arith.subf %814, %828 : vector<16x32xf32>
    %cst_148 = arith.constant 9.99999974E-6 : f32
    %830 = vector.broadcast %cst_148 : f32 to vector<16x1xf32>
    %831 = arith.addf %827, %830 : vector<16x1xf32>
    %832 = math.rsqrt %831 : vector<16x1xf32>
    %833 = vector.broadcast %832 : vector<16x1xf32> to vector<16x32xf32>
    %834 = arith.mulf %829, %833 : vector<16x32xf32>
    %835 = vector.broadcast %815 : vector<1x32xf32> to vector<16x32xf32>
    %836 = arith.mulf %834, %835 : vector<16x32xf32>
    %837 = vector.broadcast %816 : vector<1x32xf32> to vector<16x32xf32>
    %838 = arith.addf %836, %837 : vector<16x32xf32>
    %c960 = arith.constant 960 : index
    %c0_149 = arith.constant 0 : index
    %839 = vector.load %arg3[%c960, %c0_149] : memref<1128x128xf32, #tpu.memory_space<vmem>>, vector<32x64xf32>
    %c992 = arith.constant 992 : index
    %c0_150 = arith.constant 0 : index
    %840 = vector.load %arg3[%c992, %c0_150] : memref<1128x128xf32, #tpu.memory_space<vmem>>, vector<1x64xf32>
    %c1000 = arith.constant 1000 : index
    %c0_151 = arith.constant 0 : index
    %841 = vector.load %arg3[%c1000, %c0_151] : memref<1128x128xf32, #tpu.memory_space<vmem>>, vector<64x32xf32>
    %c1064 = arith.constant 1064 : index
    %c0_152 = arith.constant 0 : index
    %842 = vector.load %arg3[%c1064, %c0_152] : memref<1128x128xf32, #tpu.memory_space<vmem>>, vector<1x32xf32>
    %cst_153 = arith.constant dense<0.000000e+00> : vector<16x64xf32>
    %843 = tpu.matmul %838, %839, %cst_153 {dimension_numbers = #tpu.dot_dimension_numbers<[1], [0], [0], [1], [0, 0, 1, 1], [], []>} : vector<16x32xf32>, vector<32x64xf32>, vector<16x64xf32> -> vector<16x64xf32>
    %844 = vector.broadcast %840 : vector<1x64xf32> to vector<16x64xf32>
    %845 = arith.addf %843, %844 : vector<16x64xf32>
    %cst_154 = arith.constant 0.000000e+00 : f32
    %846 = vector.broadcast %cst_154 : f32 to vector<16x64xf32>
    %847 = arith.maximumf %845, %846 : vector<16x64xf32>
    %cst_155 = arith.constant dense<0.000000e+00> : vector<16x32xf32>
    %848 = tpu.matmul %847, %841, %cst_155 {dimension_numbers = #tpu.dot_dimension_numbers<[1], [0], [0], [1], [0, 0, 1, 1], [], []>} : vector<16x64xf32>, vector<64x32xf32>, vector<16x32xf32> -> vector<16x32xf32>
    %849 = vector.broadcast %842 : vector<1x32xf32> to vector<16x32xf32>
    %850 = arith.addf %848, %849 : vector<16x32xf32>
    %851 = arith.addf %838, %850 : vector<16x32xf32>
    %c1072 = arith.constant 1072 : index
    %c0_156 = arith.constant 0 : index
    %852 = vector.load %arg3[%c1072, %c0_156] : memref<1128x128xf32, #tpu.memory_space<vmem>>, vector<1x32xf32>
    %c1080 = arith.constant 1080 : index
    %c0_157 = arith.constant 0 : index
    %853 = vector.load %arg3[%c1080, %c0_157] : memref<1128x128xf32, #tpu.memory_space<vmem>>, vector<1x32xf32>
    %cst_158 = arith.constant dense<0.000000e+00> : vector<16xf32>
    %854 = vector.multi_reduction <add>, %851, %cst_158 [1] : vector<16x32xf32> to vector<16xf32>
    %855 = vector.shape_cast %854 : vector<16xf32> to vector<16x1xf32>
    %cst_159 = arith.constant 3.200000e+01 : f32
    %856 = vector.broadcast %cst_159 : f32 to vector<16x1xf32>
    %857 = arith.divf %855, %856 : vector<16x1xf32>
    %858 = vector.broadcast %857 : vector<16x1xf32> to vector<16x32xf32>
    %859 = arith.subf %851, %858 : vector<16x32xf32>
    %860 = arith.mulf %859, %859 : vector<16x32xf32>
    %cst_160 = arith.constant dense<0.000000e+00> : vector<16xf32>
    %861 = vector.multi_reduction <add>, %860, %cst_160 [1] : vector<16x32xf32> to vector<16xf32>
    %862 = vector.shape_cast %861 : vector<16xf32> to vector<16x1xf32>
    %cst_161 = arith.constant 3.200000e+01 : f32
    %863 = vector.broadcast %cst_161 : f32 to vector<16x1xf32>
    %864 = arith.divf %862, %863 : vector<16x1xf32>
    %865 = vector.broadcast %857 : vector<16x1xf32> to vector<16x32xf32>
    %866 = arith.subf %851, %865 : vector<16x32xf32>
    %cst_162 = arith.constant 9.99999974E-6 : f32
    %867 = vector.broadcast %cst_162 : f32 to vector<16x1xf32>
    %868 = arith.addf %864, %867 : vector<16x1xf32>
    %869 = math.rsqrt %868 : vector<16x1xf32>
    %870 = vector.broadcast %869 : vector<16x1xf32> to vector<16x32xf32>
    %871 = arith.mulf %866, %870 : vector<16x32xf32>
    %872 = vector.broadcast %852 : vector<1x32xf32> to vector<16x32xf32>
    %873 = arith.mulf %871, %872 : vector<16x32xf32>
    %874 = vector.broadcast %853 : vector<1x32xf32> to vector<16x32xf32>
    %875 = arith.addf %873, %874 : vector<16x32xf32>
    %c1088 = arith.constant 1088 : index
    %c0_163 = arith.constant 0 : index
    %876 = vector.load %arg3[%c1088, %c0_163] : memref<1128x128xf32, #tpu.memory_space<vmem>>, vector<32x32xf32>
    %c1120 = arith.constant 1120 : index
    %c0_164 = arith.constant 0 : index
    %877 = vector.load %arg3[%c1120, %c0_164] : memref<1128x128xf32, #tpu.memory_space<vmem>>, vector<1x32xf32>
    %cst_165 = arith.constant dense<0.000000e+00> : vector<16x32xf32>
    %878 = tpu.matmul %875, %876, %cst_165 {dimension_numbers = #tpu.dot_dimension_numbers<[1], [0], [0], [1], [0, 0, 1, 1], [], []>} : vector<16x32xf32>, vector<32x32xf32>, vector<16x32xf32> -> vector<16x32xf32>
    %879 = vector.broadcast %877 : vector<1x32xf32> to vector<16x32xf32>
    %880 = arith.addf %878, %879 : vector<16x32xf32>
    %c0_166 = arith.constant 0 : index
    %c0_167 = arith.constant 0 : index
    %881 = vector.load %arg4[%c0_166, %c0_167] : memref<16x32xf32, #tpu.memory_space<vmem>>, vector<16x32xf32>
    tpu.vector_store %arg4[%c0_166, %c0_167], %880 {strides = array<i32>} : memref<16x32xf32, #tpu.memory_space<vmem>>, vector<16x32xf32>,
    return
  }
  func.func @transform_0(%arg0: i32) -> (i32, i32) {
    %c0_i32 = arith.constant 0 : i32
    %c0_i32_0 = arith.constant 0 : i32
    %c0_i32_1 = arith.constant 0 : i32
    return %c0_i32, %c0_i32_0 : i32, i32
  }
  func.func @transform_1(%arg0: i32) -> (i32, i32) {
    %c0_i32 = arith.constant 0 : i32
    %c0_i32_0 = arith.constant 0 : i32
    %c0_i32_1 = arith.constant 0 : i32
    return %c0_i32, %c0_i32_0 : i32, i32
  }
  func.func @transform_2(%arg0: i32) -> (i32, i32) {
    %c0_i32 = arith.constant 0 : i32
    %c0_i32_0 = arith.constant 0 : i32
    %c0_i32_1 = arith.constant 0 : i32
    return %c0_i32, %c0_i32_0 : i32, i32
  }
  func.func @transform_3(%arg0: i32) -> (i32, i32) {
    %c0_i32 = arith.constant 0 : i32
    %c0_i32_0 = arith.constant 0 : i32
    %c0_i32_1 = arith.constant 0 : i32
    return %c0_i32, %c0_i32_0 : i32, i32
  }
}

</mosaic_0001>

<bundles_post_ra>
// kernel: transformer_latent_forward.1
= control target key start
LH: loop header
LB: loop body
LE: loop exit
PB: predicated region body
PF: predicated region fallthrough
CT: control target
= control target key end

     0   :  { %8 = vsyncpa [#allocation3], 0  ;;  %s13921_s0 = inlined_call_operand.hbm [shape: f32[16,32], index: 0, kind: input, shape index: {}]   ;;  %s13922_s1 = inlined_call_operand.hbm [shape: f32[16,32], index: 1, kind: input, shape index: {}]   ;;  %s13923_s2 = inlined_call_operand.hbm [shape: f32[1128,128], index: 2, kind: input, shape index: {}]   ;;  %s13924_s3 = inlined_call_operand.hbm [shape: f32[16,32], index: 3, kind: output, shape index: {}]  }
   0x1   :  { %9 = vsyncpa [#allocation6], 0 }
   0x2   :  { %10 = vsyncpa [#allocation4], 0  ;;  %s12621_s12 = smov [#allocation5]   ;;  %s12622_s14 = smov [#allocation2]  }
   0x3   :  { %s28_s13 = sshll.u32 %s12621_s12, 4  ;;  %s16_s15 = sshll.u32 %s12622_s14, 4  ;;  %s29_s13 = int_to_ptr.vmem [resolvable:$true] %s28_s13  ;;  %s12656_s15 = int_to_ptr.vmem [resolvable:$true] %s16_s15 }
   0x4   :  { %s12527_s18 = scalar_lea.hbm %s13922_s1, 256 }
   0x5   :  { %p12528_p0 = scmp.ne.s32.totalorder %s13922_s1, %s12527_s18  ;;  %p12531_p1 = scmp.lt.u32.totalorder %s12527_s18, %s13922_s1 }
   0x7   :  { %p12533_p2 = pnand %p12531_p1, %p12528_p0 }
   0x9   :  { %12536 = shalt.err (!%p12533_p2)
}
   0xa   :  { %s12537_s23 = scalar_lea.vmem %s29_s13, 256  ;;  %p12542_p4 = scmp.lt.s32.totalorder %s29_s13, %s29_s13 }
   0xb   :  { %p12538_p3 = scmp.ne.s32.totalorder %s29_s13, %s12537_s23  ;;  %p12543_p5 = scmp.lt.s32.totalorder %s12537_s23, %s12537_s23 }
   0xd   :  { %p12544_p6 = por %p12543_p5, %p12542_p4 }
   0xf   :  { %p12545_p7 = pnand %p12544_p6, %p12538_p3 }
  0x11   :  { %12548 = shalt.err (!%p12545_p7)
}
  0x12   :  { %s12623_s24 = smov 128   ;;  %s12624_s25 = smov 8  }
  0x13   :  { %34 = dma.hbm_to_vmem [thread:$0]  %s13922_s1, 256, %s29_s13, [#allocation6], %s12623_s24, %s12623_s24, %s12624_s25  }
  0x14   :  { %s12549_s30 = scalar_lea.hbm %s13921_s0, 256 }
  0x15   :  { %p12550_p8 = scmp.ne.s32.totalorder %s13921_s0, %s12549_s30  ;;  %p12553_p9 = scmp.lt.u32.totalorder %s12549_s30, %s13921_s0 }
  0x17   :  { %p12555_p10 = pnand %p12553_p9, %p12550_p8 }
  0x19   :  { %12558 = shalt.err (!%p12555_p10)
}
  0x1a   :  { %s12559_s8 = scalar_lea.vmem %s12656_s15, 256  ;;  %p12564_p12 = scmp.lt.s32.totalorder %s12656_s15, %s12656_s15 }
  0x1b   :  { %p12560_p11 = scmp.ne.s32.totalorder %s12656_s15, %s12559_s8  ;;  %p12565_p13 = scmp.lt.s32.totalorder %s12559_s8, %s12559_s8 }
  0x1d   :  { %p12566_p0 = por %p12565_p13, %p12564_p12 }
  0x1f   :  { %p12567_p1 = pnand %p12566_p0, %p12560_p11 }
  0x21   :  { %12570 = shalt.err (!%p12567_p1)
}
  0x22   :  { %22 = dma.hbm_to_vmem [thread:$0]  %s13921_s0, 256, %s12656_s15, [#allocation3], %s12623_s24, %s12623_s24, %s12624_s25  }
  0x23   :  { %s12625_s10 = smov [#allocation7]   ;;  %s12571_s14 = scalar_lea.hbm %s13923_s2, 18048 }
  0x24   :  { %s40_s11 = sshll.u32 %s12625_s10, 4  ;;  %p12572_p2 = scmp.ne.s32.totalorder %s13923_s2, %s12571_s14  ;;  %s41_s11 = int_to_ptr.vmem [resolvable:$true] %s40_s11 }
  0x25   :  { %p12575_p3 = scmp.lt.u32.totalorder %s12571_s14, %s13923_s2 }
  0x27   :  { %p12577_p4 = pnand %p12575_p3, %p12572_p2 }
  0x29   :  { %12580 = shalt.err (!%p12577_p4)
}
  0x2a   :  { %s12581_s20 = scalar_lea.vmem %s41_s11, 18048  ;;  %p12586_p6 = scmp.lt.s32.totalorder %s41_s11, %s41_s11 }
  0x2b   :  { %p12582_p5 = scmp.ne.s32.totalorder %s41_s11, %s12581_s20  ;;  %p12587_p7 = scmp.lt.s32.totalorder %s12581_s20, %s12581_s20 }
  0x2d   :  { %p12588_p8 = por %p12587_p7, %p12586_p6 }
  0x2f   :  { %p12589_p9 = pnand %p12588_p8, %p12582_p5 }
  0x31   :  { %12592 = shalt.err (!%p12589_p9)
}
  0x32   :  { %46 = dma.hbm_to_vmem [thread:$0]  %s13923_s2, 18048, %s41_s11, [#allocation6], %s12623_s24, %s12623_s24, %s12624_s25  }
  0x33   :  { %12615 = dma.done.wait [#allocation3], 256  }
  0x34   :  { %12616 = vsyncadd [#allocation3], 4294967040 }
  0x35   :  { %12617 = dma.done.wait [#allocation6], 18304  }
  0x36   :  { %12618 = vsyncadd [#allocation6], 4294948992  ;;  %vm69_vm0 = vcmask 261120   ;;  %v60_v0 = vld [vmem:[#allocation7] sm:$0xff]  ;;  %v61_v1 = vld [vmem:[#allocation7 + $0x8] sm:$0xff]  ;;  %v12626_v10 = vmov 0.0  }
  0x37   :  { %v62_v2 = vld [vmem:[#allocation7 + $0x10] sm:$0xff]  ;;  %v12042_v3 = vpack.c.bf16 %v61_v1, %v60_v0  ;;  %v63_v4 = vld [vmem:[#allocation7 + $0x18] sm:$0xff]  ;;  %v12708_v5 = vld [vmem:[#allocation2] sm:$0xff]  ;;  %11288 = vmatprep.subr.mxu1 %v12626_v10  ;;  %s12627_s2 = smov 104   ;;  %s12628_s21 = smov 120   ;;  %vm12629_vm1 = vmmov 0  }
  0x38   :  { %v12046_v6 = vpack.c.bf16 %v63_v4, %v62_v2  ;;  %11285 = vmatprep.mubr.msk.f32.mxu0 %vm69_vm0, %v12708_v5  ;;  %v12712_v7 = vld [vmem:[#allocation2 + $0x8] sm:$0xff]  ;;  %v10700_v8 = vld [vmem:[#allocation7 + $0x20] ss:$0 sm:$0xff]  ;;  %11290 = vmatprep.mubr.msk.f32.mxu1 %vm12629_vm1, %v12626_v10  ;;  %s12630_s22 = smov 112   ;;  %s12631_s23 = smov 96   ;;  %vm167_vm2 = vcmask 64512  }
  0x39   :  { %12043 = vmatprep.subr.bf16.mxu0 %v12042_v3  ;;  %s12632_s26 = smov 64   ;;  %s12633_s27 = smov 16   ;;  %vm1483_vm3 = vcmask 130048   ;;  %vm1485_vm4 = vcmask 195584   ;;  %vm1740_vm5 = vcmask 523264  }
  0x3a   :  { %12045 = vmatpush3.bf16.msra.mxu0 %v12042_v3  ;;  %s12634_s28 = smov 24   ;;  %s12635_s29 = smov [#allocation8]  }
  0x3b   :  { %12047 = vmatprep.subr.bf16.mxu0 %v12046_v6  ;;  %s10687_s30 = sshll.u32 %s12635_s29, 4  ;;  %s10688_s30 = int_to_ptr.vmem [resolvable:$true] %s10687_s30 }
  0x3c   :  { %s12593_s4 = scalar_lea.vmem %s10688_s30, 256  ;;  %p12598_p11 = scmp.lt.s32.totalorder %s10688_s30, %s10688_s30 }
  0x3d   :  { %p12594_p10 = scmp.ne.s32.totalorder %s10688_s30, %s12593_s4  ;;  %p12599_p12 = scmp.lt.s32.totalorder %s12593_s4, %s12593_s4 }
  0x3e   :  { %12049 = vmatpush3.bf16.msra.mxu0 %v12046_v6 }
  0x3f   :  { %11308 = vmatprep.subr.mxu0 %v12626_v10  ;;  %p12600_p13 = por %p12599_p12, %p12598_p11 }
  0x41   :  { %11286 = vmatmul.mubr.msk.f32.vlgmr.msra.gmra.mrb[0].mxu0 %vm69_vm0, %v12712_v7  ;;  %p12601_p0 = pnand %p12600_p13, %p12594_p10 }
  0x42   :  { %11310 = vmatprep.mubr.msk.f32.mxu0 %vm12629_vm1, %v12626_v10 }
 0x114   :  { %v11287_v9 = vpop.f32.mrb[0].mxu0 }
 0x115   :  { %v142_v11 = vpop.f32.mrb[1].mxu0  ;;  %v12728_v13 = vadd.f32 %v11287_v9, %v10700_v8 }
 0x116   :  { %v12718_v12 = vadd.f32 %v10700_v8, %v142_v11 }
 0x118   :  { %156 = vrot.lane.b32.xlu1 %v12718_v12, %s12627_s2  ;;  %152 = vrot.lane.b32.xlu0 %v12718_v12, %s12628_s21 }
 0x11c   :  { %159 = vrot.lane.b32.xlu1 %v12728_v13, %s12628_s21  ;;  %154 = vrot.lane.b32.xlu0 %v12718_v12, %s12630_s22 }
 0x120   :  { %163 = vrot.lane.b32.xlu1 %v12728_v13, %s12627_s2  ;;  %161 = vrot.lane.b32.xlu0 %v12728_v13, %s12630_s22 }
 0x124   :  { %165 = vrot.lane.b32.xlu0 %v12718_v12, %s12631_s23 }
 0x18a   :  { %v12740_v14 = vpop.permute.xlu1 %156  ;;  %v12742_v15 = vpop.permute.xlu0 %152 }
 0x18b   :  { %242 = vrot.lane.b32.xlu1 %v12742_v15, %s12631_s23 }
 0x18e   :  { %v12746_v16 = vpop.permute.xlu0 %154  ;;  %v12752_v17 = vpop.permute.xlu1 %159 }
 0x18f   :  { %394 = vrot.lane.b32.xlu1 %v12740_v14, %s12631_s23  ;;  %318 = vrot.lane.b32.xlu0 %v12746_v16, %s12631_s23 }
 0x192   :  { %v12754_v18 = vpop.permute.xlu0 %161  ;;  %v12760_v19 = vpop.permute.xlu1 %163 }
 0x193   :  { %546 = vrot.lane.b32.xlu1 %v12752_v17, %s12631_s23  ;;  %470 = vrot.lane.b32.xlu0 %v12728_v13, %s12631_s23 }
 0x196   :  { %v166_v20 = vpop.permute.xlu0 %165 }
 0x197   :  { %698 = vrot.lane.b32.xlu1 %v12760_v19, %s12631_s23  ;;  %622 = vrot.lane.b32.xlu0 %v12754_v18, %s12631_s23 }
 0x198   :  { %11289 = vmatpush3.xpose.msk.msra.mxu1 %vm167_vm2, %v166_v20 }
 0x199   :  { %11293 = vmatprep.subr.mxu1 %v12626_v10 }
 0x19b   :  { %11291 = vmatmul.mubr.msk.f32.vlgmr.msra.gmra.mrb[0].mxu1 %vm167_vm2, %v12718_v12 }
 0x19c   :  { %11295 = vmatprep.mubr.msk.f32.mxu1 %vm12629_vm1, %v12626_v10 }
 0x1fd   :  { %v243_v21 = vpop.permute.xlu1 %242 }
 0x1fe   :  { %11294 = vmatpush3.xpose.msk.msra.mxu1 %vm167_vm2, %v243_v21 }
 0x1ff   :  { %11298 = vmatprep.subr.mxu1 %v12626_v10 }
 0x201   :  { %v395_v22 = vpop.permute.xlu1 %394  ;;  %11296 = vmatmul.mubr.msk.f32.vlgmr.msra.gmra.mrb[2].mxu1 %vm167_vm2, %v12742_v15  ;;  %v319_v23 = vpop.permute.xlu0 %318 }
 0x202   :  { %11299 = vmatpush3.xpose.msk.msra.mxu1 %vm167_vm2, %v319_v23  ;;  %11300 = vmatprep.mubr.msk.f32.mxu1 %vm12629_vm1, %v12626_v10 }
 0x203   :  { %11303 = vmatprep.subr.mxu1 %v12626_v10 }
 0x205   :  { %11301 = vmatmul.mubr.msk.f32.vlgmr.msra.gmra.mrb[4].mxu1 %vm167_vm2, %v12746_v16  ;;  %v471_v24 = vpop.permute.xlu0 %470  ;;  %v547_v25 = vpop.permute.xlu1 %546 }
 0x206   :  { %11304 = vmatpush3.xpose.msk.msra.mxu1 %vm167_vm2, %v395_v22  ;;  %11309 = vmatpush3.xpose.msk.msra.mxu0 %vm167_vm2, %v471_v24 }
 0x207   :  { %11305 = vmatprep.mubr.msk.f32.mxu1 %vm12629_vm1, %v12626_v10  ;;  %11313 = vmatprep.subr.mxu1 %v12626_v10 }
 0x208   :  { %11318 = vmatprep.subr.mxu0 %v12626_v10 }
 0x209   :  { %11306 = vmatmul.mubr.msk.f32.vlgmr.msra.gmra.mrb[6].mxu1 %vm167_vm2, %v12740_v14  ;;  %11311 = vmatmul.mubr.msk.f32.vlgmr.msra.gmra.mrb[2].mxu0 %vm167_vm2, %v12728_v13  ;;  %v623_v26 = vpop.permute.xlu0 %622  ;;  %v699_v27 = vpop.permute.xlu1 %698 }
 0x20a   :  { %11314 = vmatpush3.xpose.msk.msra.mxu1 %vm167_vm2, %v547_v25  ;;  %11319 = vmatpush3.xpose.msk.msra.mxu0 %vm167_vm2, %v623_v26 }
 0x20b   :  { %11315 = vmatprep.mubr.msk.f32.mxu1 %vm12629_vm1, %v12626_v10  ;;  %11320 = vmatprep.mubr.msk.f32.mxu0 %vm12629_vm1, %v12626_v10 }
 0x20c   :  { %11323 = vmatprep.subr.mxu1 %v12626_v10  ;;  %11328 = vmatprep.subr.mxu0 %v12626_v10 }
 0x20d   :  { %11316 = vmatmul.mubr.msk.f32.vlgmr.msra.gmra.mrb[8].mxu1 %vm167_vm2, %v12752_v17  ;;  %11321 = vmatmul.mubr.msk.f32.vlgmr.msra.gmra.mrb[4].mxu0 %vm167_vm2, %v12754_v18 }
 0x20e   :  { %11324 = vmatpush3.xpose.msk.msra.mxu1 %vm167_vm2, %v699_v27  ;;  %11325 = vmatprep.mubr.msk.f32.mxu1 %vm12629_vm1, %v12626_v10 }
 0x20f   :  { %11333 = vmatprep.subr.mxu1 %v12626_v10  ;;  %11330 = vmatprep.mubr.msk.f32.mxu0 %vm12629_vm1, %v12626_v10 }
 0x211   :  { %11326 = vmatmul.mubr.msk.f32.vlgmr.msra.gmra.mrb[10].mxu1 %vm167_vm2, %v12760_v19 }
 0x212   :  { %11335 = vmatprep.mubr.msk.f32.mxu1 %vm12629_vm1, %v12626_v10 }
 0x26e   :  { %v238_v28 = vpop.f32.mrb[0].mxu1 }
 0x26f   :  { %v11292_v29 = vpop.f32.mrb[1].mxu1  ;;  %v774_v30 = vsel %vm167_vm2, %v238_v28, -inf }
 0x270   :  { %775 = vmax.xlane.f32.xlu0 %v774_v30 }
 0x2d4   :  { %v314_v31 = vpop.f32.mrb[2].mxu1 }
 0x2d5   :  { %v11297_v32 = vpop.f32.mrb[3].mxu1  ;;  %v777_v33 = vsel %vm167_vm2, %v314_v31, -inf }
 0x2d6   :  { %778 = vmax.xlane.f32.xlu1 %v777_v33 }
 0x2d8   :  { %v12816_v34 = vpop.f32.mrb[4].mxu1 }
 0x2d9   :  { %v11302_v35 = vpop.f32.mrb[5].mxu1  ;;  %v780_v36 = vsel %vm167_vm2, %v12816_v34, -inf }
 0x2da   :  { %781 = vmax.xlane.f32.xlu0 %v780_v36 }
 0x2dc   :  { %v466_v37 = vpop.f32.mrb[6].mxu1  ;;  %v542_v38 = vpop.f32.mrb[2].mxu0 }
 0x2dd   :  { %v11307_v39 = vpop.f32.mrb[7].mxu1  ;;  %v11312_v40 = vpop.f32.mrb[3].mxu0  ;;  %v783_v41 = vsel %vm167_vm2, %v466_v37, -inf  ;;  %v786_v42 = vsel %vm167_vm2, %v542_v38, -inf }
 0x2de   :  { %784 = vmax.xlane.f32.xlu0 %v783_v41  ;;  %787 = vmax.xlane.f32.xlu1 %v786_v42 }
 0x2e0   :  { %v618_v43 = vpop.f32.mrb[8].mxu1  ;;  %v694_v44 = vpop.f32.mrb[4].mxu0 }
 0x2e1   :  { %v11317_v45 = vpop.f32.mrb[9].mxu1  ;;  %v11322_v46 = vpop.f32.mrb[5].mxu0  ;;  %v789_v47 = vsel %vm167_vm2, %v618_v43, -inf  ;;  %v792_v48 = vsel %vm167_vm2, %v694_v44, -inf }
 0x2e2   :  { %790 = vmax.xlane.f32.xlu0 %v789_v47  ;;  %793 = vmax.xlane.f32.xlu1 %v792_v48 }
 0x2e4   :  { %v770_v49 = vpop.f32.mrb[10].mxu1 }
 0x2e5   :  { %v11327_v50 = vpop.f32.mrb[11].mxu1  ;;  %v795_v51 = vsel %vm167_vm2, %v770_v49, -inf }
 0x2e6   :  { %796 = vmax.xlane.f32.xlu0 %v795_v51 }
 0x2f3   :  { %862 = vrot.lane.b32.xlu1 %v12718_v12, %s12632_s26 }
 0x2f7   :  { %1014 = vrot.lane.b32.xlu1 %v12746_v16, %s12632_s26 }
 0x2fb   :  { %1090 = vrot.lane.b32.xlu1 %v12740_v14, %s12632_s26 }
 0x2fc   :  { %938 = vrot.lane.b32.xlu0 %v12742_v15, %s12632_s26 }
 0x2fd   :  { %v776_v52 = vpop.xlane.xlu0 %775 }
 0x2fe   :  { %v798_v57 = vsub.f32 %v238_v28, %v776_v52 }
 0x2ff   :  { %1242 = vrot.lane.b32.xlu1 %v12752_v17, %s12632_s26 }
 0x300   :  { %1166 = vrot.lane.b32.xlu0 %v12728_v13, %s12632_s26  ;;  %v806_v62 = vmul.f32 1.442695, %v798_v57 }
 0x363   :  { %v779_v53 = vpop.xlane.xlu1 %778 }
 0x364   :  { %v799_v54 = vsub.f32 %v314_v31, %v779_v53 }
 0x366   :  { %v808_v55 = vmul.f32 1.442695, %v799_v54 }
 0x367   :  { %v782_v56 = vpop.xlane.xlu0 %781 }
 0x368   :  { %12293 = vpow2.f32 %v808_v55  ;;  %v800_v8 = vsub.f32 %v12816_v34, %v782_v56 }
 0x36a   :  { %v810_v16 = vmul.f32 1.442695, %v800_v8 }
 0x36b   :  { %v788_v58 = vpop.xlane.xlu1 %787  ;;  %v785_v59 = vpop.xlane.xlu0 %784 }
 0x36c   :  { %v802_v60 = vsub.f32 %v542_v38, %v788_v58  ;;  %v801_v61 = vsub.f32 %v466_v37, %v785_v59 }
 0x36e   :  { %v814_v63 = vmul.f32 1.442695, %v802_v60  ;;  %v812_v0 = vmul.f32 1.442695, %v801_v61 }
 0x36f   :  { %v794_v1 = vpop.xlane.xlu1 %793  ;;  %v791_v2 = vpop.xlane.xlu0 %790 }
 0x370   :  { %12295 = vpow2.f32 %v814_v63  ;;  %v804_v3 = vsub.f32 %v694_v44, %v794_v1  ;;  %v803_v4 = vsub.f32 %v618_v43, %v791_v2  ;;  %v1502_v1 = vld [vmem:[#allocation7 + $0x28] sm:$0xff]  ;;  %v1503_v2 = vld [vmem:[#allocation7 + $0x30] sm:$0xff] }
 0x371   :  { %12297 = vpow2.f32 %v812_v0 }
 0x372   :  { %v12294_v6 = vpop.eup %12293  ;;  %12299 = vpow2.f32 %v806_v62  ;;  %v818_v9 = vmul.f32 1.442695, %v804_v3  ;;  %v816_v11 = vmul.f32 1.442695, %v803_v4  ;;  %v12050_v4 = vpack.c.bf16 %v1503_v2, %v1502_v1  ;;  %v1644_v1 = vld [vmem:[#allocation7 + $0xa8] sm:$0xff]  ;;  %v1645_v2 = vld [vmem:[#allocation7 + $0xb0] sm:$0xff] }
 0x373   :  { %v863_v12 = vpop.permute.xlu1 %862  ;;  %v797_v13 = vpop.xlane.xlu0 %796  ;;  %v825_v14 = vsel %vm167_vm2, %v12294_v6, 0.0 }
 0x374   :  { %v805_v15 = vsub.f32 %v770_v49, %v797_v13  ;;  %826 = vadd.xlane.f32.xlu0 %v825_v14  ;;  %11329 = vmatpush3.msra.mxu0 %v863_v12  ;;  %12301 = vpow2.f32 %v816_v11  ;;  %v1504_v12 = vld [vmem:[#allocation7 + $0x38] sm:$0xff]  ;;  %v1505_v13 = vld [vmem:[#allocation7 + $0x40] sm:$0xff] }
 0x375   :  { %11338 = vmatprep.subr.mxu0 %v12626_v10  ;;  %12303 = vpow2.f32 %v818_v9 }
 0x376   :  { %v820_v17 = vmul.f32 1.442695, %v805_v15  ;;  %v12054_v15 = vpack.c.bf16 %v1505_v13, %v1504_v12 }
 0x377   :  { %v939_v20 = vpop.permute.xlu0 %938  ;;  %v1015_v35 = vpop.permute.xlu1 %1014 }
 0x378   :  { %12305 = vpow2.f32 %v820_v17  ;;  %11334 = vmatpush3.msra.mxu1 %v939_v20 }
 0x379   :  { %11343 = vmatprep.subr.mxu1 %v12626_v10  ;;  %12307 = vpow2.f32 %v810_v16 }
 0x37a   :  { %v12841_v21 = vpop.eup %12295 }
 0x37b   :  { %v12298_v22 = vpop.eup %12297  ;;  %v834_v23 = vsel %vm167_vm2, %v12841_v21, 0.0  ;;  %v1167_v36 = vpop.permute.xlu0 %1166 }
 0x37c   :  { %v12300_v24 = vpop.eup %12299  ;;  %835 = vadd.xlane.f32.xlu1 %v834_v23  ;;  %v831_v25 = vsel %vm167_vm2, %v12298_v22, 0.0  ;;  %v1091_v37 = vpop.permute.xlu1 %1090 }
 0x37d   :  { %832 = vadd.xlane.f32.xlu0 %v831_v25  ;;  %v822_v27 = vsel %vm167_vm2, %v12300_v24, 0.0 }
 0x37e   :  { %v12302_v26 = vpop.eup %12301 }
 0x37f   :  { %v12847_v28 = vpop.eup %12303  ;;  %v837_v29 = vsel %vm167_vm2, %v12302_v26, 0.0 }
 0x380   :  { %823 = vadd.xlane.f32.xlu1 %v822_v27  ;;  %v840_v31 = vsel %vm167_vm2, %v12847_v28, 0.0  ;;  %v1243_v39 = vpop.permute.xlu1 %1242 }
 0x381   :  { %838 = vadd.xlane.f32.xlu0 %v837_v29 }
 0x382   :  { %v12306_v30 = vpop.eup %12305 }
 0x383   :  { %v843_v32 = vsel %vm167_vm2, %v12306_v30, 0.0  ;;  %v12308_v33 = vpop.eup %12307 }
 0x384   :  { %841 = vadd.xlane.f32.xlu1 %v840_v31  ;;  %v828_v34 = vsel %vm167_vm2, %v12308_v33, 0.0 }
 0x385   :  { %844 = vadd.xlane.f32.xlu0 %v843_v32 }
 0x388   :  { %829 = vadd.xlane.f32.xlu1 %v828_v34 }
 0x399   :  { %1394 = vrot.lane.b32.xlu1 %v12760_v19, %s12632_s26 }
 0x39b   :  { %1318 = vrot.lane.b32.xlu0 %v12754_v18, %s12632_s26 }
 0x401   :  { %v827_v38 = vpop.xlane.xlu0 %826 }
 0x402   :  { %12309 = vrcp.f32 %v827_v38  ;;  %v10727_v38 = vld [vmem:[#allocation7 + $0x48] ss:$0 sm:$0xff] }
 0x409   :  { %v836_v40 = vpop.xlane.xlu1 %835 }
 0x40a   :  { %v833_v41 = vpop.xlane.xlu0 %832 }
 0x40b   :  { %12311 = vrcp.f32 %v833_v41 }
 0x40c   :  { %v12310_v42 = vpop.eup %12309 }
 0x40d   :  { %v824_v43 = vpop.xlane.xlu1 %823  ;;  %v849_v44 = vmul.f32 %v12310_v42, %v12294_v6 }
 0x40e   :  { %12313 = vrcp.f32 %v824_v43  ;;  %v839_v45 = vpop.xlane.xlu0 %838 }
 0x40f   :  { %12315 = vrcp.f32 %v839_v45  ;;  %11336 = vmatmul.mubr.msk.f32.vlgmr.msra.gmra.mrb[12].mxu1 %vm167_vm2, %v849_v44 }
 0x410   :  { %11344 = vmatpush3.msra.mxu1 %v1091_v37  ;;  %11345 = vmatprep.mubr.msk.f32.mxu1 %vm12629_vm1, %v12626_v10 }
 0x411   :  { %v842_v18 = vpop.xlane.xlu1 %841  ;;  %11353 = vmatprep.subr.mxu1 %v12626_v10 }
 0x412   :  { %v845_v19 = vpop.xlane.xlu0 %844 }
 0x413   :  { %12317 = vrcp.f32 %v845_v19 }
 0x415   :  { %v12312_v46 = vpop.eup %12311  ;;  %v830_v47 = vpop.xlane.xlu1 %829 }
 0x416   :  { %12319 = vrcp.f32 %v830_v47  ;;  %v853_v48 = vmul.f32 %v12312_v46, %v12298_v22  ;;  %v1319_v61 = vpop.permute.xlu0 %1318 }
 0x417   :  { %12321 = vrcp.f32 %v836_v40 }
 0x418   :  { %v12314_v49 = vpop.eup %12313  ;;  %11346 = vmatmul.mubr.msk.f32.vlgmr.msra.gmra.mrb[14].mxu1 %vm167_vm2, %v853_v48  ;;  %12323 = vrcp.f32 %v842_v18 }
 0x419   :  { %v12316_v50 = vpop.eup %12315  ;;  %11354 = vmatpush3.msra.mxu1 %v1243_v39  ;;  %11355 = vmatprep.mubr.msk.f32.mxu1 %vm12629_vm1, %v12626_v10  ;;  %v847_v51 = vmul.f32 %v12314_v49, %v12300_v24  ;;  %v1395_v52 = vpop.permute.xlu1 %1394 }
 0x41a   :  { %11363 = vmatprep.subr.mxu1 %v12626_v10  ;;  %v857_v53 = vmul.f32 %v12316_v50, %v12302_v26 }
 0x41b   :  { %11331 = vmatmul.mubr.msk.f32.vlgmr.msra.gmra.mrb[6].mxu0 %vm167_vm2, %v847_v51 }
 0x41c   :  { %11339 = vmatpush3.msra.mxu0 %v1015_v35  ;;  %11356 = vmatmul.mubr.msk.f32.vlgmr.msra.gmra.mrb[16].mxu1 %vm167_vm2, %v857_v53 }
 0x41d   :  { %v12318_v54 = vpop.eup %12317  ;;  %11364 = vmatpush3.msra.mxu1 %v1395_v52  ;;  %11365 = vmatprep.mubr.msk.f32.mxu1 %vm12629_vm1, %v12626_v10 }
 0x41e   :  { %v861_v55 = vmul.f32 %v12318_v54, %v12306_v30  ;;  %11340 = vmatprep.mubr.msk.f32.mxu0 %vm12629_vm1, %v12626_v10  ;;  %11348 = vmatprep.subr.mxu0 %v12626_v10  ;;  %v1636_v54 = vld [vmem:[#allocation7 + $0x68] sm:$0xff] }
 0x420   :  { %v12320_v56 = vpop.eup %12319  ;;  %11366 = vmatmul.mubr.msk.f32.vlgmr.msra.gmra.mrb[18].mxu1 %vm167_vm2, %v861_v55  ;;  %v1637_v55 = vld [vmem:[#allocation7 + $0x70] sm:$0xff] }
 0x421   :  { %v851_v57 = vmul.f32 %v12320_v56, %v12308_v33  ;;  %v12322_v58 = vpop.eup %12321 }
 0x422   :  { %v855_v59 = vmul.f32 %v12322_v58, %v12841_v21  ;;  %v12324_v60 = vpop.eup %12323 }
 0x423   :  { %11341 = vmatmul.mubr.msk.f32.vlgmr.msra.gmra.mrb[8].mxu0 %vm167_vm2, %v851_v57  ;;  %v859_v62 = vmul.f32 %v12324_v60, %v12847_v28  ;;  %v1638_v57 = vld [vmem:[#allocation7 + $0x78] sm:$0xff]  ;;  %v1641_v60 = vld [vmem:[#allocation7 + $0x90] sm:$0xff] }
 0x424   :  { %11349 = vmatpush3.msra.mxu0 %v1167_v36  ;;  %11350 = vmatprep.mubr.msk.f32.mxu0 %vm12629_vm1, %v12626_v10  ;;  %v12062_v58 = vpack.c.bf16 %v1638_v57, %v1637_v55 }
 0x425   :  { %11358 = vmatprep.subr.mxu0 %v12626_v10 }
 0x427   :  { %11351 = vmatmul.mubr.msk.f32.vlgmr.msra.gmra.mrb[10].mxu0 %vm167_vm2, %v855_v59  ;;  %v1640_v59 = vld [vmem:[#allocation7 + $0x88] sm:$0xff] }
 0x428   :  { %11359 = vmatpush3.msra.mxu0 %v1319_v61  ;;  %11360 = vmatprep.mubr.msk.f32.mxu0 %vm12629_vm1, %v12626_v10  ;;  %v1642_v61 = vld [vmem:[#allocation7 + $0x98] sm:$0xff] }
 0x429   :  { %12051 = vmatprep.subr.bf16.mxu0 %v12050_v4 }
 0x42b   :  { %11361 = vmatmul.mubr.msk.f32.vlgmr.msra.gmra.mrb[12].mxu0 %vm167_vm2, %v859_v62  ;;  %v12066_v62 = vpack.c.bf16 %v1641_v60, %v1640_v59 }
 0x42c   :  { %12053 = vmatpush3.bf16.msra.mxu0 %v12050_v4 }
 0x42d   :  { %12055 = vmatprep.subr.bf16.mxu0 %v12054_v15 }
 0x430   :  { %12057 = vmatpush3.bf16.msra.mxu0 %v12054_v15 }
 0x431   :  { %12067 = vmatprep.subr.bf16.mxu0 %v12066_v62 }
 0x4e2   :  { %v1010_v63 = vpop.f32.mrb[12].mxu1 }
 0x4e3   :  { %1471 = vrot.lane.b32.xlu0 %v1010_v63, %s12624_s25  ;;  %v11337_v0 = vpop.f32.mrb[13].mxu1  ;;  %v1643_v63 = vld [vmem:[#allocation7 + $0xa0] sm:$0xff] }
 0x4e4   :  { %v12070_v0 = vpack.c.bf16 %v1643_v63, %v1642_v61  ;;  %v10738_v63 = vld [vmem:[#allocation7 + $0xd0] ss:$0 sm:$0xff] }
 0x4eb   :  { %v1162_v3 = vpop.f32.mrb[14].mxu1 }
 0x4ec   :  { %v11347_v6 = vpop.f32.mrb[15].mxu1 }
 0x4ee   :  { %v934_v8 = vpop.f32.mrb[6].mxu0 }
 0x4ef   :  { %v1314_v9 = vpop.f32.mrb[16].mxu1  ;;  %v11332_v11 = vpop.f32.mrb[7].mxu0 }
 0x4f0   :  { %1488 = vrot.lane.b32.xlu0 %v1314_v9, %s12624_s25  ;;  %v11357_v14 = vpop.f32.mrb[17].mxu1 }
 0x4f1   :  { %v10730_v14 = vld [vmem:[#allocation7 + $0x50] ss:$0 sm:$0xff] }
 0x4f3   :  { %v1466_v16 = vpop.f32.mrb[18].mxu1 }
 0x4f4   :  { %v11367_v17 = vpop.f32.mrb[19].mxu1 }
 0x4f6   :  { %v1086_v20 = vpop.f32.mrb[8].mxu0 }
 0x4f7   :  { %1475 = vrot.lane.b32.xlu1 %v1086_v20, %s12633_s27  ;;  %v11342_v21 = vpop.f32.mrb[9].mxu0 }
 0x4fa   :  { %v1238_v22 = vpop.f32.mrb[10].mxu0 }
 0x4fb   :  { %v11352_v23 = vpop.f32.mrb[11].mxu0  ;;  %1479 = vrot.lane.b32.xlu1 %v1162_v3, %s12634_s28  ;;  %v12074_v3 = vpack.c.bf16 %v1645_v2, %v1644_v1 }
 0x4fe   :  { %v1390_v24 = vpop.f32.mrb[12].mxu0 }
 0x4ff   :  { %1496 = vrot.lane.b32.xlu1 %v1466_v16, %s12634_s28  ;;  %1492 = vrot.lane.b32.xlu0 %v1390_v24, %s12633_s27  ;;  %v11362_v25 = vpop.f32.mrb[13].mxu0  ;;  %v10731_v16 = vld [vmem:[#allocation7 + $0x58] ss:$0 sm:$0xff] }
 0x500   :  { %v1646_v25 = vld [vmem:[#allocation7 + $0xb8] sm:$0xff] }
 0x555   :  { %v1472_v26 = vpop.permute.xlu0 %1471 }
 0x556   :  { %v1482_v28 = vsel %vm167_vm2, %v934_v8, %v1472_v26  ;;  %v1647_v26 = vld [vmem:[#allocation7 + $0xc0] sm:$0xff] }
 0x562   :  { %v1489_v29 = vpop.permute.xlu0 %1488 }
 0x563   :  { %v1499_v33 = vsel %vm167_vm2, %v1238_v22, %v1489_v29 }
 0x569   :  { %v1476_v27 = vpop.permute.xlu1 %1475 }
 0x56a   :  { %v1484_v30 = vsel %vm1483_vm3, %v1482_v28, %v1476_v27  ;;  %v12078_v27 = vpack.c.bf16 %v1647_v26, %v1646_v25  ;;  %v10732_v28 = vld [vmem:[#allocation7 + $0x80] ss:$0 sm:$0xff] }
 0x56d   :  { %v1480_v31 = vpop.permute.xlu1 %1479 }
 0x56e   :  { %v1486_v32 = vsel %vm1485_vm4, %v1484_v30, %v1480_v31 }
 0x56f   :  { %11376 = vmatprep.mubr.msk.f32.mxu0 %vm69_vm0, %v1486_v32 }
 0x571   :  { %v1497_v34 = vpop.permute.xlu1 %1496  ;;  %v1493_v35 = vpop.permute.xlu0 %1492 }
 0x572   :  { %v1500_v36 = vsel %vm1483_vm3, %v1499_v33, %v1493_v35  ;;  %v10735_v35 = vld [vmem:[#allocation7 + $0xc8] ss:$0 sm:$0xff] }
 0x573   :  { %v1501_v37 = vsel %vm1485_vm4, %v1500_v36, %v1497_v34 }
 0x574   :  { %11377 = vmatmul.mubr.msk.f32.vlgmr.msra.gmra.mrb[14].mxu0 %vm69_vm0, %v1501_v37 }
 0x575   :  { %12069 = vmatpush3.bf16.msra.mxu0 %v12066_v62 }
 0x576   :  { %12071 = vmatprep.subr.bf16.mxu0 %v12070_v0 }
 0x579   :  { %12073 = vmatpush3.bf16.msra.mxu0 %v12070_v0 }
 0x57a   :  { %12075 = vmatprep.subr.bf16.mxu0 %v12074_v3 }
 0x57d   :  { %12077 = vmatpush3.bf16.msra.mxu0 %v12074_v3  ;;  %v10739_v3 = vld [vmem:[#allocation7 + $0xd8] ss:$0 sm:$0xff] }
 0x57e   :  { %12079 = vmatprep.subr.bf16.mxu0 %v12078_v27 }
 0x581   :  { %12081 = vmatpush3.bf16.msra.mxu0 %v12078_v27 }
 0x582   :  { %11430 = vmatprep.subr.mxu0 %v12626_v10 }
 0x647   :  { %v11378_v39 = vpop.f32.mrb[14].mxu0 }
 0x648   :  { %v1589_v40 = vadd.f32 %v11378_v39, %v10727_v38  ;;  %v1583_v41 = vpop.f32.mrb[15].mxu0 }
 0x649   :  { %v1584_v42 = vadd.f32 %v10727_v38, %v1583_v41 }
 0x64a   :  { %v1593_v43 = vadd.f32 %v1589_v40, %v12712_v7 }
 0x64b   :  { %v1592_v44 = vadd.f32 %v1584_v42, %v12708_v5  ;;  %v1635_v5 = vld [vmem:[#allocation7 + $0x60] sm:$0xff] }
 0x64c   :  { %v1599_v45 = vsel %vm69_vm0, %v1593_v43, 0.0  ;;  %v12058_v56 = vpack.c.bf16 %v1636_v54, %v1635_v5  ;;  %v1867_v54 = vld [vmem:[#allocation7 + $0xf8] sm:$0xff] }
 0x64d   :  { %1600 = vadd.xlane.f32.xlu1 %v1599_v45  ;;  %v1596_v18 = vsel %vm69_vm0, %v1592_v44, 0.0 }
 0x64e   :  { %1597 = vadd.xlane.f32.xlu0 %v1596_v18  ;;  %12059 = vmatprep.subr.bf16.mxu1 %v12058_v56 }
 0x64f   :  { %12061 = vmatpush3.bf16.msra.mxu1 %v12058_v56 }
 0x650   :  { %12063 = vmatprep.subr.bf16.mxu1 %v12062_v58 }
 0x653   :  { %12065 = vmatpush3.bf16.msra.mxu1 %v12062_v58 }
 0x6da   :  { %v1601_v19 = vpop.xlane.xlu1 %1600 }
 0x6db   :  { %v1604_v46 = vmul.f32 0.03125, %v1601_v19  ;;  %v1598_v47 = vpop.xlane.xlu0 %1597 }
 0x6dc   :  { %v1603_v48 = vmul.f32 0.03125, %v1598_v47 }
 0x6dd   :  { %v1606_v49 = vsub.f32 %v1593_v43, %v1604_v46 }
 0x6de   :  { %v1605_v50 = vsub.f32 %v1592_v44, %v1603_v48 }
 0x6df   :  { %v1608_v53 = vmul.f32 %v1606_v49, %v1606_v49 }
 0x6e0   :  { %v1607_v51 = vmul.f32 %v1605_v50, %v1605_v50 }
 0x6e1   :  { %v1612_v7 = vsel %vm69_vm0, %v1608_v53, 0.0  ;;  %v1865_v53 = vld [vmem:[#allocation7 + $0xe8] sm:$0xff] }
 0x6e2   :  { %v1609_v52 = vsel %vm69_vm0, %v1607_v51, 0.0 }
 0x6e3   :  { %1610 = vadd.xlane.f32.xlu0 %v1609_v52  ;;  %v1864_v52 = vld [vmem:[#allocation7 + $0xe0] sm:$0xff] }
 0x6e4   :  { %v12082_v5 = vpack.c.bf16 %v1865_v53, %v1864_v52 }
 0x6e6   :  { %12083 = vmatprep.subr.bf16.mxu1 %v12082_v5 }
 0x6e7   :  { %1613 = vadd.xlane.f32.xlu0 %v1612_v7  ;;  %v1866_v7 = vld [vmem:[#allocation7 + $0xf0] sm:$0xff] }
 0x6e8   :  { %v12086_v55 = vpack.c.bf16 %v1867_v54, %v1866_v7 }
 0x770   :  { %v1611_v4 = vpop.xlane.xlu0 %1610 }
 0x771   :  { %v1615_v6 = vmul.f32 0.03125, %v1611_v4 }
 0x773   :  { %v1617_v8 = vadd.f32 1e-05, %v1615_v6 }
 0x774   :  { %v1614_v9 = vpop.xlane.xlu0 %1613 }
 0x775   :  { %12325 = vrsqrt.f32 %v1617_v8  ;;  %v1616_v11 = vmul.f32 0.03125, %v1614_v9 }
 0x777   :  { %v1618_v12 = vadd.f32 1e-05, %v1616_v11  ;;  %v10740_v11 = vld [vmem:[#allocation7 + $0x100] ss:$0 sm:$0xff] }
 0x779   :  { %12327 = vrsqrt.f32 %v1618_v12 }
 0x77f   :  { %v12326_v13 = vpop.eup %12325 }
 0x780   :  { %v1621_v15 = vmul.f32 %v12326_v13, %v1605_v50 }
 0x782   :  { %v1627_v17 = vmul.f32 %v10730_v14, %v1621_v15 }
 0x783   :  { %v12328_v20 = vpop.eup %12327 }
 0x784   :  { %v1622_v21 = vmul.f32 %v12328_v20, %v1606_v49  ;;  %v1633_v22 = vadd.f32 %v10731_v16, %v1627_v17 }
 0x786   :  { %v1628_v23 = vmul.f32 %v10730_v14, %v1622_v21  ;;  %11387 = vmatprep.mubr.msk.f32.mxu1 %vm69_vm0, %v1633_v22 }
 0x788   :  { %v1634_v24 = vadd.f32 %v10731_v16, %v1628_v23 }
 0x78a   :  { %11388 = vmatmul.mubr.msk.f32.vlgmr.msra.gmra.mrb[20].mxu1 %vm69_vm0, %v1634_v24 }
 0x78b   :  { %12085 = vmatpush3.bf16.msra.mxu1 %v12082_v5 }
 0x78c   :  { %12087 = vmatprep.subr.bf16.mxu1 %v12086_v55 }
 0x78f   :  { %12089 = vmatpush3.bf16.msra.mxu1 %v12086_v55 }
 0x790   :  { %11420 = vmatprep.subr.mxu1 %v12626_v10 }
 0x85d   :  { %v11389_v29 = vpop.f32.mrb[20].mxu1 }
 0x85e   :  { %v1731_v30 = vadd.f32 %v11389_v29, %v10732_v28  ;;  %v1725_v31 = vpop.f32.mrb[21].mxu1 }
 0x85f   :  { %v1726_v32 = vadd.f32 %v10732_v28, %v1725_v31 }
 0x860   :  { %v1735_v34 = vmax.f32 %v1731_v30, 0.0 }
 0x861   :  { %v1734_v33 = vmax.f32 %v1726_v32, 0.0 }
 0x863   :  { %11406 = vmatprep.mubr.msk.f32.mxu0 %vm1740_vm5, %v1734_v33 }
 0x864   :  { %11407 = vmatmul.mubr.msk.f32.vlgmr.msra.gmra.mrb[16].mxu0 %vm1740_vm5, %v1735_v34 }
 0x865   :  { %11432 = vmatprep.mubr.msk.f32.mxu0 %vm12629_vm1, %v12626_v10 }
 0x937   :  { %v11408_v36 = vpop.f32.mrb[16].mxu0 }
 0x938   :  { %v1819_v37 = vadd.f32 %v11408_v36, %v10735_v35  ;;  %v1813_v38 = vpop.f32.mrb[17].mxu0 }
 0x939   :  { %v1814_v39 = vadd.f32 %v10735_v35, %v1813_v38 }
 0x93a   :  { %v1823_v40 = vadd.f32 %v1819_v37, %v1634_v24 }
 0x93b   :  { %v1822_v41 = vadd.f32 %v1814_v39, %v1633_v22 }
 0x93c   :  { %v1829_v42 = vsel %vm69_vm0, %v1823_v40, 0.0 }
 0x93d   :  { %1830 = vadd.xlane.f32.xlu0 %v1829_v42  ;;  %v1826_v43 = vsel %vm69_vm0, %v1822_v41, 0.0 }
 0x93e   :  { %1827 = vadd.xlane.f32.xlu1 %v1826_v43 }
 0x9ca   :  { %v1831_v44 = vpop.xlane.xlu0 %1830 }
 0x9cb   :  { %v1833_v45 = vmul.f32 0.03125, %v1831_v44  ;;  %v1828_v18 = vpop.xlane.xlu1 %1827 }
 0x9cc   :  { %v1832_v19 = vmul.f32 0.03125, %v1828_v18 }
 0x9cd   :  { %v1835_v46 = vsub.f32 %v1823_v40, %v1833_v45 }
 0x9ce   :  { %v1834_v47 = vsub.f32 %v1822_v41, %v1832_v19 }
 0x9cf   :  { %v1837_v48 = vmul.f32 %v1835_v46, %v1835_v46 }
 0x9d0   :  { %v1836_v49 = vmul.f32 %v1834_v47, %v1834_v47 }
 0x9d1   :  { %v1841_v50 = vsel %vm69_vm0, %v1837_v48, 0.0 }
 0x9d2   :  { %1842 = vadd.xlane.f32.xlu0 %v1841_v50  ;;  %v1838_v51 = vsel %vm69_vm0, %v1836_v49, 0.0 }
 0x9d3   :  { %1839 = vadd.xlane.f32.xlu1 %v1838_v51 }
 0xa5f   :  { %v1843_v56 = vpop.xlane.xlu0 %1842 }
 0xa60   :  { %v1845_v57 = vmul.f32 0.03125, %v1843_v56  ;;  %v1840_v58 = vpop.xlane.xlu1 %1839 }
 0xa61   :  { %v1844_v59 = vmul.f32 0.03125, %v1840_v58 }
 0xa62   :  { %v1847_v60 = vadd.f32 1e-05, %v1845_v57 }
 0xa63   :  { %v1846_v61 = vadd.f32 1e-05, %v1844_v59 }
 0xa64   :  { %12329 = vrsqrt.f32 %v1847_v60 }
 0xa65   :  { %12331 = vrsqrt.f32 %v1846_v61 }
 0xa6e   :  { %v12330_v62 = vpop.eup %12329 }
 0xa6f   :  { %v12332_v0 = vpop.eup %12331  ;;  %v1851_v1 = vmul.f32 %v12330_v62, %v1835_v46 }
 0xa70   :  { %v1850_v2 = vmul.f32 %v12332_v0, %v1834_v47 }
 0xa71   :  { %v1857_v4 = vmul.f32 %v10738_v63, %v1851_v1 }
 0xa72   :  { %v1856_v6 = vmul.f32 %v10738_v63, %v1850_v2 }
 0xa73   :  { %v12918_v9 = vadd.f32 %v10739_v3, %v1857_v4 }
 0xa74   :  { %v12916_v8 = vadd.f32 %v10739_v3, %v1856_v6 }
 0xa76   :  { %11417 = vmatprep.mubr.msk.f32.mxu1 %vm69_vm0, %v12916_v8 }
 0xa77   :  { %11418 = vmatmul.mubr.msk.f32.vlgmr.msra.gmra.mrb[22].mxu1 %vm69_vm0, %v12918_v9 }
 0xa78   :  { %11422 = vmatprep.mubr.msk.f32.mxu1 %vm12629_vm1, %v12626_v10 }
 0xb4a   :  { %v11419_v12 = vpop.f32.mrb[22].mxu1 }
 0xb4b   :  { %v1945_v13 = vpop.f32.mrb[23].mxu1  ;;  %v12932_v15 = vadd.f32 %v11419_v12, %v10740_v11 }
 0xb4c   :  { %v12926_v14 = vadd.f32 %v10740_v11, %v1945_v13 }
 0xb4e   :  { %1957 = vrot.lane.b32.xlu0 %v12926_v14, %s12630_s22  ;;  %1955 = vrot.lane.b32.xlu1 %v12926_v14, %s12628_s21 }
 0xb52   :  { %1964 = vrot.lane.b32.xlu0 %v12932_v15, %s12630_s22  ;;  %1959 = vrot.lane.b32.xlu1 %v12926_v14, %s12627_s2 }
 0xb56   :  { %1968 = vrot.lane.b32.xlu0 %v12926_v14, %s12631_s23  ;;  %1962 = vrot.lane.b32.xlu1 %v12932_v15, %s12628_s21 }
 0xb5a   :  { %1966 = vrot.lane.b32.xlu1 %v12932_v15, %s12627_s2 }
 0xbc0   :  { %v12944_v16 = vpop.permute.xlu0 %1957  ;;  %v12946_v17 = vpop.permute.xlu1 %1955 }
 0xbc1   :  { %2120 = vrot.lane.b32.xlu0 %v12944_v16, %s12631_s23  ;;  %2044 = vrot.lane.b32.xlu1 %v12946_v17, %s12631_s23 }
 0xbc4   :  { %v12952_v20 = vpop.permute.xlu0 %1964  ;;  %v12954_v21 = vpop.permute.xlu1 %1959 }
 0xbc5   :  { %2272 = vrot.lane.b32.xlu0 %v12932_v15, %s12631_s23  ;;  %2196 = vrot.lane.b32.xlu1 %v12954_v21, %s12631_s23 }
 0xbc8   :  { %v1969_v22 = vpop.permute.xlu0 %1968  ;;  %v12960_v23 = vpop.permute.xlu1 %1962 }
 0xbc9   :  { %2424 = vrot.lane.b32.xlu0 %v12952_v20, %s12631_s23  ;;  %11421 = vmatpush3.xpose.msk.msra.mxu1 %vm167_vm2, %v1969_v22 }
 0xbca   :  { %2348 = vrot.lane.b32.xlu1 %v12960_v23, %s12631_s23  ;;  %11425 = vmatprep.subr.mxu1 %v12626_v10 }
 0xbcc   :  { %11423 = vmatmul.mubr.msk.f32.vlgmr.msra.gmra.mrb[24].mxu1 %vm167_vm2, %v12926_v14  ;;  %v12970_v24 = vpop.permute.xlu1 %1966 }
 0xbcd   :  { %11427 = vmatprep.mubr.msk.f32.mxu1 %vm12629_vm1, %v12626_v10 }
 0xbce   :  { %2500 = vrot.lane.b32.xlu1 %v12970_v24, %s12631_s23 }
 0xc33   :  { %v2121_v25 = vpop.permute.xlu0 %2120  ;;  %v2045_v26 = vpop.permute.xlu1 %2044 }
 0xc34   :  { %11426 = vmatpush3.xpose.msk.msra.mxu1 %vm167_vm2, %v2045_v26  ;;  %11431 = vmatpush3.xpose.msk.msra.mxu0 %vm167_vm2, %v2121_v25 }
 0xc35   :  { %11440 = vmatprep.subr.mxu0 %v12626_v10  ;;  %11435 = vmatprep.subr.mxu1 %v12626_v10 }
 0xc37   :  { %11433 = vmatmul.mubr.msk.f32.vlgmr.msra.gmra.mrb[18].mxu0 %vm167_vm2, %v12944_v16  ;;  %v2273_v27 = vpop.permute.xlu0 %2272  ;;  %11428 = vmatmul.mubr.msk.f32.vlgmr.msra.gmra.mrb[26].mxu1 %vm167_vm2, %v12946_v17  ;;  %v2197_v28 = vpop.permute.xlu1 %2196 }
 0xc38   :  { %11436 = vmatpush3.xpose.msk.msra.mxu1 %vm167_vm2, %v2197_v28  ;;  %11441 = vmatpush3.xpose.msk.msra.mxu0 %vm167_vm2, %v2273_v27 }
 0xc39   :  { %11437 = vmatprep.mubr.msk.f32.mxu1 %vm12629_vm1, %v12626_v10  ;;  %11442 = vmatprep.mubr.msk.f32.mxu0 %vm12629_vm1, %v12626_v10 }
 0xc3a   :  { %11450 = vmatprep.subr.mxu0 %v12626_v10  ;;  %11445 = vmatprep.subr.mxu1 %v12626_v10 }
 0xc3b   :  { %11443 = vmatmul.mubr.msk.f32.vlgmr.msra.gmra.mrb[20].mxu0 %vm167_vm2, %v12932_v15  ;;  %v2425_v29 = vpop.permute.xlu0 %2424  ;;  %11438 = vmatmul.mubr.msk.f32.vlgmr.msra.gmra.mrb[28].mxu1 %vm167_vm2, %v12954_v21 }
 0xc3c   :  { %v2349_v30 = vpop.permute.xlu1 %2348  ;;  %11451 = vmatpush3.xpose.msk.msra.mxu0 %vm167_vm2, %v2425_v29  ;;  %11447 = vmatprep.mubr.msk.f32.mxu1 %vm12629_vm1, %v12626_v10 }
 0xc3d   :  { %11446 = vmatpush3.xpose.msk.msra.mxu1 %vm167_vm2, %v2349_v30  ;;  %11452 = vmatprep.mubr.msk.f32.mxu0 %vm12629_vm1, %v12626_v10 }
 0xc3e   :  { %11455 = vmatprep.subr.mxu1 %v12626_v10  ;;  %11460 = vmatprep.subr.mxu0 %v12626_v10 }
 0xc3f   :  { %11453 = vmatmul.mubr.msk.f32.vlgmr.msra.gmra.mrb[22].mxu0 %vm167_vm2, %v12952_v20 }
 0xc40   :  { %11448 = vmatmul.mubr.msk.f32.vlgmr.msra.gmra.mrb[30].mxu1 %vm167_vm2, %v12960_v23  ;;  %v2501_v31 = vpop.permute.xlu1 %2500  ;;  %11462 = vmatprep.mubr.msk.f32.mxu0 %vm12629_vm1, %v12626_v10 }
 0xc41   :  { %11456 = vmatpush3.xpose.msk.msra.mxu1 %vm167_vm2, %v2501_v31  ;;  %11457 = vmatprep.mubr.msk.f32.mxu1 %vm12629_vm1, %v12626_v10 }
 0xc42   :  { %11465 = vmatprep.subr.mxu1 %v12626_v10 }
 0xc44   :  { %11458 = vmatmul.mubr.msk.f32.vlgmr.msra.gmra.mrb[32].mxu1 %vm167_vm2, %v12970_v24 }
 0xc45   :  { %11467 = vmatprep.mubr.msk.f32.mxu1 %vm12629_vm1, %v12626_v10 }
 0xc9f   :  { %v2040_v32 = vpop.f32.mrb[24].mxu1 }
 0xca0   :  { %v11424_v33 = vpop.f32.mrb[25].mxu1  ;;  %v2576_v34 = vsel %vm167_vm2, %v2040_v32, -inf }
 0xca1   :  { %2577 = vmax.xlane.f32.xlu0 %v2576_v34 }
 0xd0a   :  { %v2116_v35 = vpop.f32.mrb[26].mxu1  ;;  %v2192_v36 = vpop.f32.mrb[18].mxu0 }
 0xd0b   :  { %v11429_v37 = vpop.f32.mrb[27].mxu1  ;;  %v11434_v38 = vpop.f32.mrb[19].mxu0  ;;  %v2582_v39 = vsel %vm167_vm2, %v2192_v36, -inf  ;;  %v2579_v40 = vsel %vm167_vm2, %v2116_v35, -inf }
 0xd0c   :  { %2583 = vmax.xlane.f32.xlu0 %v2582_v39  ;;  %2580 = vmax.xlane.f32.xlu1 %v2579_v40 }
 0xd0e   :  { %v2268_v41 = vpop.f32.mrb[28].mxu1  ;;  %v2344_v42 = vpop.f32.mrb[20].mxu0 }
 0xd0f   :  { %v11439_v43 = vpop.f32.mrb[29].mxu1  ;;  %v11444_v44 = vpop.f32.mrb[21].mxu0  ;;  %v2588_v45 = vsel %vm167_vm2, %v2344_v42, -inf  ;;  %v2585_v18 = vsel %vm167_vm2, %v2268_v41, -inf }
 0xd10   :  { %2589 = vmax.xlane.f32.xlu1 %v2588_v45  ;;  %2586 = vmax.xlane.f32.xlu0 %v2585_v18 }
 0xd12   :  { %v2496_v19 = vpop.f32.mrb[22].mxu0 }
 0xd13   :  { %v2420_v46 = vpop.f32.mrb[30].mxu1  ;;  %v11454_v47 = vpop.f32.mrb[23].mxu0  ;;  %v2594_v48 = vsel %vm167_vm2, %v2496_v19, -inf }
 0xd14   :  { %v11449_v49 = vpop.f32.mrb[31].mxu1  ;;  %2595 = vmax.xlane.f32.xlu1 %v2594_v48  ;;  %v2591_v50 = vsel %vm167_vm2, %v2420_v46, -inf }
 0xd15   :  { %2592 = vmax.xlane.f32.xlu0 %v2591_v50 }
 0xd17   :  { %v2572_v51 = vpop.f32.mrb[32].mxu1 }
 0xd18   :  { %v11459_v52 = vpop.f32.mrb[33].mxu1  ;;  %v2597_v53 = vsel %vm167_vm2, %v2572_v51, -inf }
 0xd19   :  { %2598 = vmax.xlane.f32.xlu0 %v2597_v53 }
 0xd25   :  { %2664 = vrot.lane.b32.xlu1 %v12926_v14, %s12632_s26 }
 0xd29   :  { %2816 = vrot.lane.b32.xlu1 %v12944_v16, %s12632_s26 }
 0xd2d   :  { %2892 = vrot.lane.b32.xlu1 %v12954_v21, %s12632_s26 }
 0xd2e   :  { %v2578_v7 = vpop.xlane.xlu0 %2577 }
 0xd2f   :  { %2740 = vrot.lane.b32.xlu0 %v12946_v17, %s12632_s26  ;;  %v2600_v5 = vsub.f32 %v2040_v32, %v2578_v7 }
 0xd31   :  { %3044 = vrot.lane.b32.xlu1 %v12960_v23, %s12632_s26  ;;  %v2608_v54 = vmul.f32 1.442695, %v2600_v5 }
 0xd33   :  { %2968 = vrot.lane.b32.xlu0 %v12932_v15, %s12632_s26  ;;  %12333 = vpow2.f32 %v2608_v54 }
 0xd3d   :  { %v13038_v55 = vpop.eup %12333 }
 0xd3e   :  { %v2624_v56 = vsel %vm167_vm2, %v13038_v55, 0.0 }
 0xd55   :  { %2625 = vadd.xlane.f32.xlu1 %v2624_v56 }
 0xd99   :  { %v2584_v57 = vpop.xlane.xlu0 %2583  ;;  %v2581_v58 = vpop.xlane.xlu1 %2580 }
 0xd9a   :  { %v2602_v59 = vsub.f32 %v2192_v36, %v2584_v57  ;;  %v2601_v60 = vsub.f32 %v2116_v35, %v2581_v58 }
 0xd9c   :  { %v2612_v61 = vmul.f32 1.442695, %v2602_v59  ;;  %v2610_v62 = vmul.f32 1.442695, %v2601_v60 }
 0xd9d   :  { %v2587_v63 = vpop.xlane.xlu0 %2586  ;;  %v2590_v0 = vpop.xlane.xlu1 %2589 }
 0xd9e   :  { %12335 = vpow2.f32 %v2612_v61  ;;  %v2603_v1 = vsub.f32 %v2268_v41, %v2587_v63  ;;  %v2604_v2 = vsub.f32 %v2344_v42, %v2590_v0 }
 0xd9f   :  { %12337 = vpow2.f32 %v2610_v62 }
 0xda0   :  { %v2614_v3 = vmul.f32 1.442695, %v2603_v1  ;;  %v2616_v4 = vmul.f32 1.442695, %v2604_v2  ;;  %v3302_v1 = vld [vmem:[#allocation7 + $0x108] sm:$0xff]  ;;  %v3303_v2 = vld [vmem:[#allocation7 + $0x110] sm:$0xff] }
 0xda1   :  { %v2596_v6 = vpop.xlane.xlu1 %2595 }
 0xda2   :  { %12339 = vpow2.f32 %v2614_v3  ;;  %v2593_v11 = vpop.xlane.xlu0 %2592  ;;  %v2606_v12 = vsub.f32 %v2496_v19, %v2596_v6  ;;  %v12090_v3 = vpack.c.bf16 %v3303_v2, %v3302_v1  ;;  %v3305_v6 = vld [vmem:[#allocation7 + $0x120] sm:$0xff]  ;;  %v3443_v1 = vld [vmem:[#allocation7 + $0x188] sm:$0xff]  ;;  %v3444_v2 = vld [vmem:[#allocation7 + $0x190] sm:$0xff] }
 0xda3   :  { %12341 = vpow2.f32 %v2616_v4  ;;  %v2605_v13 = vsub.f32 %v2420_v46, %v2593_v11  ;;  %v3304_v4 = vld [vmem:[#allocation7 + $0x118] sm:$0xff] }
 0xda4   :  { %v2620_v14 = vmul.f32 1.442695, %v2606_v12  ;;  %v12094_v11 = vpack.c.bf16 %v3305_v6, %v3304_v4 }
 0xda5   :  { %v2618_v15 = vmul.f32 1.442695, %v2605_v13  ;;  %v2665_v16 = vpop.permute.xlu1 %2664 }
 0xda6   :  { %12343 = vpow2.f32 %v2620_v14  ;;  %v2599_v17 = vpop.xlane.xlu0 %2598  ;;  %11461 = vmatpush3.msra.mxu0 %v2665_v16 }
 0xda7   :  { %12345 = vpow2.f32 %v2618_v15  ;;  %v2607_v21 = vsub.f32 %v2572_v51, %v2599_v17  ;;  %11470 = vmatprep.subr.mxu0 %v12626_v10 }
 0xda8   :  { %v12336_v22 = vpop.eup %12335 }
 0xda9   :  { %v12338_v23 = vpop.eup %12337  ;;  %v2622_v25 = vmul.f32 1.442695, %v2607_v21  ;;  %v2630_v26 = vsel %vm167_vm2, %v12336_v22, 0.0  ;;  %v2817_v39 = vpop.permute.xlu1 %2816 }
 0xdaa   :  { %v2741_v27 = vpop.permute.xlu0 %2740  ;;  %2631 = vadd.xlane.f32.xlu1 %v2630_v26  ;;  %v2627_v28 = vsel %vm167_vm2, %v12338_v23, 0.0 }
 0xdab   :  { %12347 = vpow2.f32 %v2622_v25  ;;  %11466 = vmatpush3.msra.mxu1 %v2741_v27  ;;  %2628 = vadd.xlane.f32.xlu0 %v2627_v28 }
 0xdac   :  { %v12340_v29 = vpop.eup %12339  ;;  %11475 = vmatprep.subr.mxu1 %v12626_v10 }
 0xdad   :  { %v12342_v30 = vpop.eup %12341  ;;  %v2633_v31 = vsel %vm167_vm2, %v12340_v29, 0.0  ;;  %v2893_v40 = vpop.permute.xlu1 %2892 }
 0xdae   :  { %v2636_v32 = vsel %vm167_vm2, %v12342_v30, 0.0 }
 0xdaf   :  { %2634 = vadd.xlane.f32.xlu0 %v2633_v31  ;;  %2637 = vadd.xlane.f32.xlu1 %v2636_v32 }
 0xdb0   :  { %v13048_v33 = vpop.eup %12343 }
 0xdb1   :  { %v12346_v34 = vpop.eup %12345  ;;  %v2642_v35 = vsel %vm167_vm2, %v13048_v33, 0.0  ;;  %v3045_v41 = vpop.permute.xlu1 %3044 }
 0xdb2   :  { %v2639_v36 = vsel %vm167_vm2, %v12346_v34, 0.0 }
 0xdb3   :  { %2640 = vadd.xlane.f32.xlu0 %v2639_v36  ;;  %2643 = vadd.xlane.f32.xlu1 %v2642_v35 }
 0xdb5   :  { %v13053_v37 = vpop.eup %12347 }
 0xdb6   :  { %v2645_v38 = vsel %vm167_vm2, %v13053_v37, 0.0 }
 0xdb7   :  { %2646 = vadd.xlane.f32.xlu0 %v2645_v38 }
 0xdc4   :  { %3196 = vrot.lane.b32.xlu1 %v12970_v24, %s12632_s26  ;;  %v2969_v24 = vpop.permute.xlu0 %2968 }
 0xdcd   :  { %3120 = vrot.lane.b32.xlu0 %v12952_v20, %s12632_s26 }
 0xde2   :  { %v2626_v42 = vpop.xlane.xlu1 %2625 }
 0xde3   :  { %12349 = vrcp.f32 %v2626_v42  ;;  %v10767_v42 = vld [vmem:[#allocation7 + $0x128] ss:$0 sm:$0xff] }
 0xded   :  { %v12350_v43 = vpop.eup %12349 }
 0xdee   :  { %v2649_v44 = vmul.f32 %v12350_v43, %v13038_v55 }
 0xdf0   :  { %11463 = vmatmul.mubr.msk.f32.vlgmr.msra.gmra.mrb[24].mxu0 %vm167_vm2, %v2649_v44 }
 0xdf1   :  { %11471 = vmatpush3.msra.mxu0 %v2817_v39  ;;  %11472 = vmatprep.mubr.msk.f32.mxu0 %vm12629_vm1, %v12626_v10 }
 0xdf2   :  { %11480 = vmatprep.subr.mxu0 %v12626_v10 }
 0xe37   :  { %v2632_v45 = vpop.xlane.xlu1 %2631 }
 0xe38   :  { %v2629_v18 = vpop.xlane.xlu0 %2628  ;;  %12351 = vrcp.f32 %v2632_v45 }
 0xe39   :  { %12353 = vrcp.f32 %v2629_v18 }
 0xe3c   :  { %v2635_v20 = vpop.xlane.xlu0 %2634  ;;  %v2638_v19 = vpop.xlane.xlu1 %2637 }
 0xe3d   :  { %12355 = vrcp.f32 %v2635_v20 }
 0xe3e   :  { %12357 = vrcp.f32 %v2638_v19 }
 0xe40   :  { %v2641_v46 = vpop.xlane.xlu0 %2640  ;;  %v2644_v47 = vpop.xlane.xlu1 %2643 }
 0xe41   :  { %12359 = vrcp.f32 %v2641_v46 }
 0xe42   :  { %v12352_v48 = vpop.eup %12351  ;;  %12361 = vrcp.f32 %v2644_v47 }
 0xe43   :  { %v12354_v49 = vpop.eup %12353  ;;  %v2653_v50 = vmul.f32 %v12352_v48, %v12336_v22 }
 0xe44   :  { %v2647_v51 = vpop.xlane.xlu0 %2646  ;;  %v2651_v52 = vmul.f32 %v12354_v49, %v12338_v23  ;;  %v3197_v60 = vpop.permute.xlu1 %3196 }
 0xe45   :  { %12363 = vrcp.f32 %v2647_v51  ;;  %11473 = vmatmul.mubr.msk.f32.vlgmr.msra.gmra.mrb[26].mxu0 %vm167_vm2, %v2653_v50 }
 0xe46   :  { %11468 = vmatmul.mubr.msk.f32.vlgmr.msra.gmra.mrb[34].mxu1 %vm167_vm2, %v2651_v52  ;;  %11481 = vmatpush3.msra.mxu0 %v2969_v24 }
 0xe47   :  { %v12356_v53 = vpop.eup %12355  ;;  %11476 = vmatpush3.msra.mxu1 %v2893_v40  ;;  %11477 = vmatprep.mubr.msk.f32.mxu1 %vm12629_vm1, %v12626_v10 }
 0xe48   :  { %v12358_v7 = vpop.eup %12357  ;;  %11482 = vmatprep.mubr.msk.f32.mxu0 %vm12629_vm1, %v12626_v10  ;;  %11485 = vmatprep.subr.mxu1 %v12626_v10  ;;  %v2655_v5 = vmul.f32 %v12356_v53, %v12340_v29  ;;  %v3121_v54 = vpop.permute.xlu0 %3120 }
 0xe49   :  { %11490 = vmatprep.subr.mxu0 %v12626_v10  ;;  %v2657_v55 = vmul.f32 %v12358_v7, %v12342_v30 }
 0xe4a   :  { %11478 = vmatmul.mubr.msk.f32.vlgmr.msra.gmra.mrb[36].mxu1 %vm167_vm2, %v2655_v5 }
 0xe4b   :  { %v12360_v56 = vpop.eup %12359  ;;  %11483 = vmatmul.mubr.msk.f32.vlgmr.msra.gmra.mrb[28].mxu0 %vm167_vm2, %v2657_v55  ;;  %11486 = vmatpush3.msra.mxu1 %v3045_v41  ;;  %v3436_v55 = vld [vmem:[#allocation7 + $0x150] sm:$0xff] }
 0xe4c   :  { %v12362_v57 = vpop.eup %12361  ;;  %11491 = vmatpush3.msra.mxu0 %v3121_v54  ;;  %11487 = vmatprep.mubr.msk.f32.mxu1 %vm12629_vm1, %v12626_v10  ;;  %v2659_v58 = vmul.f32 %v12360_v56, %v12346_v34  ;;  %v3435_v54 = vld [vmem:[#allocation7 + $0x148] sm:$0xff] }
 0xe4d   :  { %11492 = vmatprep.mubr.msk.f32.mxu0 %vm12629_vm1, %v12626_v10  ;;  %11495 = vmatprep.subr.mxu1 %v12626_v10  ;;  %v2661_v59 = vmul.f32 %v12362_v57, %v13048_v33  ;;  %v3437_v57 = vld [vmem:[#allocation7 + $0x158] sm:$0xff] }
 0xe4e   :  { %11488 = vmatmul.mubr.msk.f32.vlgmr.msra.gmra.mrb[38].mxu1 %vm167_vm2, %v2659_v58  ;;  %12091 = vmatprep.subr.bf16.mxu0 %v12090_v3  ;;  %v12102_v58 = vpack.c.bf16 %v3437_v57, %v3436_v55 }
 0xe4f   :  { %v12364_v61 = vpop.eup %12363  ;;  %11493 = vmatmul.mubr.msk.f32.vlgmr.msra.gmra.mrb[30].mxu0 %vm167_vm2, %v2661_v59  ;;  %11496 = vmatpush3.msra.mxu1 %v3197_v60  ;;  %v3439_v59 = vld [vmem:[#allocation7 + $0x168] sm:$0xff]  ;;  %v3440_v60 = vld [vmem:[#allocation7 + $0x170] sm:$0xff] }
 0xe50   :  { %11497 = vmatprep.mubr.msk.f32.mxu1 %vm12629_vm1, %v12626_v10  ;;  %v2663_v62 = vmul.f32 %v12364_v61, %v13053_v37  ;;  %12093 = vmatpush3.bf16.msra.mxu0 %v12090_v3  ;;  %v3441_v61 = vld [vmem:[#allocation7 + $0x178] sm:$0xff]  ;;  %v12114_v3 = vpack.c.bf16 %v3444_v2, %v3443_v1 }
 0xe51   :  { %12095 = vmatprep.subr.bf16.mxu0 %v12094_v11 }
 0xe52   :  { %11498 = vmatmul.mubr.msk.f32.vlgmr.msra.gmra.mrb[40].mxu1 %vm167_vm2, %v2663_v62  ;;  %v12106_v62 = vpack.c.bf16 %v3440_v60, %v3439_v59 }
 0xe54   :  { %12097 = vmatpush3.bf16.msra.mxu0 %v12094_v11 }
 0xe55   :  { %12107 = vmatprep.subr.bf16.mxu0 %v12106_v62 }
 0xec3   :  { %v2736_v63 = vpop.f32.mrb[24].mxu0 }
 0xec4   :  { %v11464_v0 = vpop.f32.mrb[25].mxu0 }
 0xf18   :  { %v2888_v12 = vpop.f32.mrb[26].mxu0 }
 0xf19   :  { %v2812_v13 = vpop.f32.mrb[34].mxu1  ;;  %3277 = vrot.lane.b32.xlu1 %v2888_v12, %s12633_s27  ;;  %v11474_v14 = vpop.f32.mrb[27].mxu0 }
 0xf1a   :  { %3273 = vrot.lane.b32.xlu0 %v2812_v13, %s12624_s25  ;;  %v11469_v15 = vpop.f32.mrb[35].mxu1 }
 0xf1d   :  { %v2964_v16 = vpop.f32.mrb[36].mxu1 }
 0xf1e   :  { %v3040_v17 = vpop.f32.mrb[28].mxu0  ;;  %v11479_v21 = vpop.f32.mrb[37].mxu1  ;;  %3281 = vrot.lane.b32.xlu1 %v2964_v16, %s12634_s28  ;;  %v10770_v16 = vld [vmem:[#allocation7 + $0x130] ss:$0 sm:$0xff] }
 0xf1f   :  { %v11484_v22 = vpop.f32.mrb[29].mxu0  ;;  %v10771_v21 = vld [vmem:[#allocation7 + $0x138] ss:$0 sm:$0xff] }
 0xf21   :  { %v3116_v23 = vpop.f32.mrb[38].mxu1 }
 0xf22   :  { %v3192_v25 = vpop.f32.mrb[30].mxu0  ;;  %3288 = vrot.lane.b32.xlu0 %v3116_v23, %s12624_s25  ;;  %v11489_v26 = vpop.f32.mrb[39].mxu1 }
 0xf23   :  { %v11494_v27 = vpop.f32.mrb[31].mxu0 }
 0xf25   :  { %v3268_v28 = vpop.f32.mrb[40].mxu1 }
 0xf26   :  { %3292 = vrot.lane.b32.xlu0 %v3192_v25, %s12633_s27  ;;  %3296 = vrot.lane.b32.xlu1 %v3268_v28, %s12634_s28  ;;  %v11499_v29 = vpop.f32.mrb[41].mxu1 }
 0xf27   :  { %v3445_v29 = vld [vmem:[#allocation7 + $0x198] sm:$0xff] }
 0xf8b   :  { %v3278_v30 = vpop.permute.xlu1 %3277 }
 0xf8c   :  { %v3274_v31 = vpop.permute.xlu0 %3273 }
 0xf8d   :  { %v3284_v32 = vsel %vm167_vm2, %v2736_v63, %v3274_v31  ;;  %v3442_v63 = vld [vmem:[#allocation7 + $0x180] sm:$0xff] }
 0xf8e   :  { %v3285_v33 = vsel %vm1483_vm3, %v3284_v32, %v3278_v30  ;;  %v12110_v0 = vpack.c.bf16 %v3442_v63, %v3441_v61  ;;  %v3446_v30 = vld [vmem:[#allocation7 + $0x1a0] sm:$0xff]  ;;  %v10778_v63 = vld [vmem:[#allocation7 + $0x1b0] ss:$0 sm:$0xff] }
 0xf8f   :  { %v12118_v31 = vpack.c.bf16 %v3446_v30, %v3445_v29  ;;  %v10772_v32 = vld [vmem:[#allocation7 + $0x160] ss:$0 sm:$0xff] }
 0xf90   :  { %v3282_v34 = vpop.permute.xlu1 %3281 }
 0xf91   :  { %v3286_v35 = vsel %vm1485_vm4, %v3285_v33, %v3282_v34 }
 0xf92   :  { %11508 = vmatprep.mubr.msk.f32.mxu0 %vm69_vm0, %v3286_v35 }
 0xf94   :  { %v3289_v36 = vpop.permute.xlu0 %3288 }
 0xf95   :  { %v3299_v37 = vsel %vm167_vm2, %v3040_v17, %v3289_v36 }
 0xf98   :  { %v3293_v38 = vpop.permute.xlu0 %3292  ;;  %v3297_v39 = vpop.permute.xlu1 %3296 }
 0xf99   :  { %v3300_v40 = vsel %vm1483_vm3, %v3299_v37, %v3293_v38 }
 0xf9a   :  { %v3301_v41 = vsel %vm1485_vm4, %v3300_v40, %v3297_v39  ;;  %v10775_v39 = vld [vmem:[#allocation7 + $0x1a8] ss:$0 sm:$0xff] }
 0xf9b   :  { %11509 = vmatmul.mubr.msk.f32.vlgmr.msra.gmra.mrb[32].mxu0 %vm69_vm0, %v3301_v41 }
 0xf9c   :  { %12109 = vmatpush3.bf16.msra.mxu0 %v12106_v62 }
 0xf9d   :  { %12111 = vmatprep.subr.bf16.mxu0 %v12110_v0 }
 0xfa0   :  { %12113 = vmatpush3.bf16.msra.mxu0 %v12110_v0 }
 0xfa1   :  { %12115 = vmatprep.subr.bf16.mxu0 %v12114_v3 }
 0xfa4   :  { %12117 = vmatpush3.bf16.msra.mxu0 %v12114_v3  ;;  %v10779_v3 = vld [vmem:[#allocation7 + $0x1b8] ss:$0 sm:$0xff] }
 0xfa5   :  { %12119 = vmatprep.subr.bf16.mxu0 %v12118_v31 }
 0xfa8   :  { %12121 = vmatpush3.bf16.msra.mxu0 %v12118_v31 }
 0xfa9   :  { %11562 = vmatprep.subr.mxu0 %v12626_v10 }
0x106e   :  { %v11510_v43 = vpop.f32.mrb[32].mxu0 }
0x106f   :  { %v3389_v44 = vadd.f32 %v11510_v43, %v10767_v42  ;;  %v3383_v24 = vpop.f32.mrb[33].mxu0 }
0x1070   :  { %v3384_v45 = vadd.f32 %v10767_v42, %v3383_v24 }
0x1071   :  { %v3393_v18 = vadd.f32 %v3389_v44, %v12918_v9 }
0x1072   :  { %v3392_v20 = vadd.f32 %v3384_v45, %v12916_v8  ;;  %v3434_v8 = vld [vmem:[#allocation7 + $0x140] sm:$0xff] }
0x1073   :  { %v3399_v19 = vsel %vm69_vm0, %v3393_v18, 0.0  ;;  %v12098_v56 = vpack.c.bf16 %v3435_v54, %v3434_v8  ;;  %v3665_v54 = vld [vmem:[#allocation7 + $0x1d8] sm:$0xff] }
0x1074   :  { %3400 = vadd.xlane.f32.xlu1 %v3399_v19  ;;  %v3396_v46 = vsel %vm69_vm0, %v3392_v20, 0.0 }
0x1075   :  { %3397 = vadd.xlane.f32.xlu0 %v3396_v46  ;;  %12099 = vmatprep.subr.bf16.mxu1 %v12098_v56 }
0x1076   :  { %12101 = vmatpush3.bf16.msra.mxu1 %v12098_v56 }
0x1077   :  { %12103 = vmatprep.subr.bf16.mxu1 %v12102_v58 }
0x107a   :  { %12105 = vmatpush3.bf16.msra.mxu1 %v12102_v58 }
0x1101   :  { %v3401_v47 = vpop.xlane.xlu1 %3400 }
0x1102   :  { %v3403_v48 = vmul.f32 0.03125, %v3401_v47  ;;  %v3398_v49 = vpop.xlane.xlu0 %3397 }
0x1103   :  { %v3402_v50 = vmul.f32 0.03125, %v3398_v49 }
0x1104   :  { %v3405_v51 = vsub.f32 %v3393_v18, %v3403_v48 }
0x1105   :  { %v3404_v52 = vsub.f32 %v3392_v20, %v3402_v50 }
0x1106   :  { %v3407_v5 = vmul.f32 %v3405_v51, %v3405_v51 }
0x1107   :  { %v3406_v53 = vmul.f32 %v3404_v52, %v3404_v52 }
0x1108   :  { %v3411_v9 = vsel %vm69_vm0, %v3407_v5, 0.0  ;;  %v3663_v5 = vld [vmem:[#allocation7 + $0x1c8] sm:$0xff] }
0x1109   :  { %v3408_v7 = vsel %vm69_vm0, %v3406_v53, 0.0 }
0x110a   :  { %3409 = vadd.xlane.f32.xlu0 %v3408_v7  ;;  %v3662_v7 = vld [vmem:[#allocation7 + $0x1c0] sm:$0xff] }
0x110b   :  { %v12122_v8 = vpack.c.bf16 %v3663_v5, %v3662_v7 }
0x110d   :  { %12123 = vmatprep.subr.bf16.mxu1 %v12122_v8 }
0x110e   :  { %3412 = vadd.xlane.f32.xlu0 %v3411_v9  ;;  %v3664_v9 = vld [vmem:[#allocation7 + $0x1d0] sm:$0xff] }
0x110f   :  { %v12126_v55 = vpack.c.bf16 %v3665_v54, %v3664_v9 }
0x1197   :  { %v3410_v4 = vpop.xlane.xlu0 %3409 }
0x1198   :  { %v3414_v6 = vmul.f32 0.03125, %v3410_v4 }
0x119a   :  { %v3416_v11 = vadd.f32 1e-05, %v3414_v6 }
0x119b   :  { %v3413_v12 = vpop.xlane.xlu0 %3412 }
0x119c   :  { %12365 = vrsqrt.f32 %v3416_v11  ;;  %v3415_v13 = vmul.f32 0.03125, %v3413_v12 }
0x119e   :  { %v3417_v14 = vadd.f32 1e-05, %v3415_v13  ;;  %v10780_v13 = vld [vmem:[#allocation7 + $0x1e0] ss:$0 sm:$0xff] }
0x11a0   :  { %12367 = vrsqrt.f32 %v3417_v14 }
0x11a6   :  { %v12366_v15 = vpop.eup %12365 }
0x11a7   :  { %v3420_v17 = vmul.f32 %v12366_v15, %v3404_v52 }
0x11a9   :  { %v3426_v22 = vmul.f32 %v10770_v16, %v3420_v17 }
0x11aa   :  { %v12368_v23 = vpop.eup %12367 }
0x11ab   :  { %v3421_v25 = vmul.f32 %v12368_v23, %v3405_v51  ;;  %v3432_v26 = vadd.f32 %v10771_v21, %v3426_v22 }
0x11ad   :  { %v3427_v27 = vmul.f32 %v10770_v16, %v3421_v25  ;;  %11519 = vmatprep.mubr.msk.f32.mxu1 %vm69_vm0, %v3432_v26 }
0x11af   :  { %v3433_v28 = vadd.f32 %v10771_v21, %v3427_v27 }
0x11b1   :  { %11520 = vmatmul.mubr.msk.f32.vlgmr.msra.gmra.mrb[42].mxu1 %vm69_vm0, %v3433_v28 }
0x11b2   :  { %12125 = vmatpush3.bf16.msra.mxu1 %v12122_v8 }
0x11b3   :  { %12127 = vmatprep.subr.bf16.mxu1 %v12126_v55 }
0x11b6   :  { %12129 = vmatpush3.bf16.msra.mxu1 %v12126_v55 }
0x11b7   :  { %11552 = vmatprep.subr.mxu1 %v12626_v10 }
0x1284   :  { %v11521_v33 = vpop.f32.mrb[42].mxu1 }
0x1285   :  { %v3530_v34 = vadd.f32 %v11521_v33, %v10772_v32  ;;  %v3524_v35 = vpop.f32.mrb[43].mxu1 }
0x1286   :  { %v3525_v36 = vadd.f32 %v10772_v32, %v3524_v35 }
0x1287   :  { %v3534_v38 = vmax.f32 %v3530_v34, 0.0 }
0x1288   :  { %v3533_v37 = vmax.f32 %v3525_v36, 0.0 }
0x128a   :  { %11538 = vmatprep.mubr.msk.f32.mxu0 %vm1740_vm5, %v3533_v37 }
0x128b   :  { %11539 = vmatmul.mubr.msk.f32.vlgmr.msra.gmra.mrb[34].mxu0 %vm1740_vm5, %v3534_v38 }
0x128c   :  { %11564 = vmatprep.mubr.msk.f32.mxu0 %vm12629_vm1, %v12626_v10 }
0x135e   :  { %v11540_v40 = vpop.f32.mrb[34].mxu0 }
0x135f   :  { %v3617_v41 = vadd.f32 %v11540_v40, %v10775_v39  ;;  %v3611_v42 = vpop.f32.mrb[35].mxu0 }
0x1360   :  { %v3612_v43 = vadd.f32 %v10775_v39, %v3611_v42 }
0x1361   :  { %v3621_v44 = vadd.f32 %v3617_v41, %v3433_v28 }
0x1362   :  { %v3620_v24 = vadd.f32 %v3612_v43, %v3432_v26 }
0x1363   :  { %v3627_v45 = vsel %vm69_vm0, %v3621_v44, 0.0 }
0x1364   :  { %3628 = vadd.xlane.f32.xlu0 %v3627_v45  ;;  %v3624_v18 = vsel %vm69_vm0, %v3620_v24, 0.0 }
0x1365   :  { %3625 = vadd.xlane.f32.xlu1 %v3624_v18 }
0x13f1   :  { %v3629_v20 = vpop.xlane.xlu0 %3628 }
0x13f2   :  { %v3631_v19 = vmul.f32 0.03125, %v3629_v20  ;;  %v3626_v46 = vpop.xlane.xlu1 %3625 }
0x13f3   :  { %v3630_v47 = vmul.f32 0.03125, %v3626_v46 }
0x13f4   :  { %v3633_v48 = vsub.f32 %v3621_v44, %v3631_v19 }
0x13f5   :  { %v3632_v49 = vsub.f32 %v3620_v24, %v3630_v47 }
0x13f6   :  { %v3635_v50 = vmul.f32 %v3633_v48, %v3633_v48 }
0x13f7   :  { %v3634_v51 = vmul.f32 %v3632_v49, %v3632_v49 }
0x13f8   :  { %v3639_v52 = vsel %vm69_vm0, %v3635_v50, 0.0 }
0x13f9   :  { %3640 = vadd.xlane.f32.xlu0 %v3639_v52  ;;  %v3636_v53 = vsel %vm69_vm0, %v3634_v51, 0.0 }
0x13fa   :  { %3637 = vadd.xlane.f32.xlu1 %v3636_v53 }
0x1486   :  { %v3641_v56 = vpop.xlane.xlu0 %3640 }
0x1487   :  { %v3643_v57 = vmul.f32 0.03125, %v3641_v56  ;;  %v3638_v58 = vpop.xlane.xlu1 %3637 }
0x1488   :  { %v3642_v59 = vmul.f32 0.03125, %v3638_v58 }
0x1489   :  { %v3645_v60 = vadd.f32 1e-05, %v3643_v57 }
0x148a   :  { %v3644_v61 = vadd.f32 1e-05, %v3642_v59 }
0x148b   :  { %12369 = vrsqrt.f32 %v3645_v60 }
0x148c   :  { %12371 = vrsqrt.f32 %v3644_v61 }
0x1495   :  { %v12370_v62 = vpop.eup %12369 }
0x1496   :  { %v12372_v0 = vpop.eup %12371  ;;  %v3649_v1 = vmul.f32 %v12370_v62, %v3633_v48 }
0x1497   :  { %v3648_v2 = vmul.f32 %v12372_v0, %v3632_v49 }
0x1498   :  { %v3655_v4 = vmul.f32 %v10778_v63, %v3649_v1 }
0x1499   :  { %v3654_v6 = vmul.f32 %v10778_v63, %v3648_v2 }
0x149a   :  { %v13122_v12 = vadd.f32 %v10779_v3, %v3655_v4 }
0x149b   :  { %v13120_v11 = vadd.f32 %v10779_v3, %v3654_v6 }
0x149d   :  { %11549 = vmatprep.mubr.msk.f32.mxu1 %vm69_vm0, %v13120_v11 }
0x149e   :  { %11550 = vmatmul.mubr.msk.f32.vlgmr.msra.gmra.mrb[44].mxu1 %vm69_vm0, %v13122_v12 }
0x149f   :  { %11554 = vmatprep.mubr.msk.f32.mxu1 %vm12629_vm1, %v12626_v10 }
0x1571   :  { %v11551_v14 = vpop.f32.mrb[44].mxu1 }
0x1572   :  { %v3743_v15 = vpop.f32.mrb[45].mxu1  ;;  %v13136_v17 = vadd.f32 %v11551_v14, %v10780_v13 }
0x1573   :  { %v13130_v16 = vadd.f32 %v10780_v13, %v3743_v15 }
0x1575   :  { %3755 = vrot.lane.b32.xlu0 %v13130_v16, %s12630_s22  ;;  %3753 = vrot.lane.b32.xlu1 %v13130_v16, %s12628_s21 }
0x1579   :  { %3762 = vrot.lane.b32.xlu0 %v13136_v17, %s12630_s22  ;;  %3757 = vrot.lane.b32.xlu1 %v13130_v16, %s12627_s2 }
0x157d   :  { %3766 = vrot.lane.b32.xlu0 %v13130_v16, %s12631_s23  ;;  %3760 = vrot.lane.b32.xlu1 %v13136_v17, %s12628_s21 }
0x1581   :  { %3764 = vrot.lane.b32.xlu1 %v13136_v17, %s12627_s2 }
0x15e7   :  { %v13148_v21 = vpop.permute.xlu0 %3755  ;;  %v13150_v22 = vpop.permute.xlu1 %3753 }
0x15e8   :  { %3918 = vrot.lane.b32.xlu0 %v13148_v21, %s12631_s23  ;;  %3842 = vrot.lane.b32.xlu1 %v13150_v22, %s12631_s23 }
0x15eb   :  { %v13156_v23 = vpop.permute.xlu0 %3762  ;;  %v13158_v25 = vpop.permute.xlu1 %3757 }
0x15ec   :  { %4070 = vrot.lane.b32.xlu0 %v13136_v17, %s12631_s23  ;;  %3994 = vrot.lane.b32.xlu1 %v13158_v25, %s12631_s23 }
0x15ef   :  { %v3767_v26 = vpop.permute.xlu0 %3766  ;;  %v13164_v27 = vpop.permute.xlu1 %3760 }
0x15f0   :  { %4222 = vrot.lane.b32.xlu0 %v13156_v23, %s12631_s23  ;;  %11553 = vmatpush3.xpose.msk.msra.mxu1 %vm167_vm2, %v3767_v26 }
0x15f1   :  { %4146 = vrot.lane.b32.xlu1 %v13164_v27, %s12631_s23  ;;  %11557 = vmatprep.subr.mxu1 %v12626_v10 }
0x15f3   :  { %11555 = vmatmul.mubr.msk.f32.vlgmr.msra.gmra.mrb[46].mxu1 %vm167_vm2, %v13130_v16  ;;  %v13174_v28 = vpop.permute.xlu1 %3764 }
0x15f4   :  { %11559 = vmatprep.mubr.msk.f32.mxu1 %vm12629_vm1, %v12626_v10 }
0x15f5   :  { %4298 = vrot.lane.b32.xlu1 %v13174_v28, %s12631_s23 }
0x165a   :  { %v3919_v29 = vpop.permute.xlu0 %3918  ;;  %v3843_v30 = vpop.permute.xlu1 %3842 }
0x165b   :  { %11558 = vmatpush3.xpose.msk.msra.mxu1 %vm167_vm2, %v3843_v30  ;;  %11563 = vmatpush3.xpose.msk.msra.mxu0 %vm167_vm2, %v3919_v29 }
0x165c   :  { %11572 = vmatprep.subr.mxu0 %v12626_v10  ;;  %11567 = vmatprep.subr.mxu1 %v12626_v10 }
0x165e   :  { %11565 = vmatmul.mubr.msk.f32.vlgmr.msra.gmra.mrb[36].mxu0 %vm167_vm2, %v13148_v21  ;;  %v4071_v31 = vpop.permute.xlu0 %4070  ;;  %11560 = vmatmul.mubr.msk.f32.vlgmr.msra.gmra.mrb[48].mxu1 %vm167_vm2, %v13150_v22  ;;  %v3995_v32 = vpop.permute.xlu1 %3994 }
0x165f   :  { %11568 = vmatpush3.xpose.msk.msra.mxu1 %vm167_vm2, %v3995_v32  ;;  %11573 = vmatpush3.xpose.msk.msra.mxu0 %vm167_vm2, %v4071_v31 }
0x1660   :  { %11569 = vmatprep.mubr.msk.f32.mxu1 %vm12629_vm1, %v12626_v10  ;;  %11574 = vmatprep.mubr.msk.f32.mxu0 %vm12629_vm1, %v12626_v10 }
0x1661   :  { %11582 = vmatprep.subr.mxu0 %v12626_v10  ;;  %11577 = vmatprep.subr.mxu1 %v12626_v10 }
0x1662   :  { %11575 = vmatmul.mubr.msk.f32.vlgmr.msra.gmra.mrb[38].mxu0 %vm167_vm2, %v13136_v17  ;;  %v4223_v33 = vpop.permute.xlu0 %4222  ;;  %11570 = vmatmul.mubr.msk.f32.vlgmr.msra.gmra.mrb[50].mxu1 %vm167_vm2, %v13158_v25 }
0x1663   :  { %v4147_v34 = vpop.permute.xlu1 %4146  ;;  %11583 = vmatpush3.xpose.msk.msra.mxu0 %vm167_vm2, %v4223_v33  ;;  %11579 = vmatprep.mubr.msk.f32.mxu1 %vm12629_vm1, %v12626_v10 }
0x1664   :  { %11578 = vmatpush3.xpose.msk.msra.mxu1 %vm167_vm2, %v4147_v34  ;;  %11584 = vmatprep.mubr.msk.f32.mxu0 %vm12629_vm1, %v12626_v10 }
0x1665   :  { %11587 = vmatprep.subr.mxu1 %v12626_v10  ;;  %11592 = vmatprep.subr.mxu0 %v12626_v10 }
0x1666   :  { %11585 = vmatmul.mubr.msk.f32.vlgmr.msra.gmra.mrb[40].mxu0 %vm167_vm2, %v13156_v23 }
0x1667   :  { %11580 = vmatmul.mubr.msk.f32.vlgmr.msra.gmra.mrb[52].mxu1 %vm167_vm2, %v13164_v27  ;;  %v4299_v35 = vpop.permute.xlu1 %4298  ;;  %11594 = vmatprep.mubr.msk.f32.mxu0 %vm12629_vm1, %v12626_v10 }
0x1668   :  { %11588 = vmatpush3.xpose.msk.msra.mxu1 %vm167_vm2, %v4299_v35  ;;  %11589 = vmatprep.mubr.msk.f32.mxu1 %vm12629_vm1, %v12626_v10 }
0x1669   :  { %11597 = vmatprep.subr.mxu1 %v12626_v10 }
0x166b   :  { %11590 = vmatmul.mubr.msk.f32.vlgmr.msra.gmra.mrb[54].mxu1 %vm167_vm2, %v13174_v28 }
0x166c   :  { %11599 = vmatprep.mubr.msk.f32.mxu1 %vm12629_vm1, %v12626_v10 }
0x16c6   :  { %v3838_v36 = vpop.f32.mrb[46].mxu1 }
0x16c7   :  { %v11556_v37 = vpop.f32.mrb[47].mxu1  ;;  %v4374_v38 = vsel %vm167_vm2, %v3838_v36, -inf }
0x16c8   :  { %4375 = vmax.xlane.f32.xlu0 %v4374_v38 }
0x1731   :  { %v3914_v39 = vpop.f32.mrb[48].mxu1  ;;  %v3990_v40 = vpop.f32.mrb[36].mxu0 }
0x1732   :  { %v11561_v41 = vpop.f32.mrb[49].mxu1  ;;  %v11566_v42 = vpop.f32.mrb[37].mxu0  ;;  %v4380_v43 = vsel %vm167_vm2, %v3990_v40, -inf  ;;  %v4377_v44 = vsel %vm167_vm2, %v3914_v39, -inf }
0x1733   :  { %4381 = vmax.xlane.f32.xlu0 %v4380_v43  ;;  %4378 = vmax.xlane.f32.xlu1 %v4377_v44 }
0x1735   :  { %v4066_v24 = vpop.f32.mrb[50].mxu1  ;;  %v4142_v45 = vpop.f32.mrb[38].mxu0 }
0x1736   :  { %v11571_v18 = vpop.f32.mrb[51].mxu1  ;;  %v11576_v20 = vpop.f32.mrb[39].mxu0  ;;  %v4386_v19 = vsel %vm167_vm2, %v4142_v45, -inf  ;;  %v4383_v46 = vsel %vm167_vm2, %v4066_v24, -inf }
0x1737   :  { %4387 = vmax.xlane.f32.xlu1 %v4386_v19  ;;  %4384 = vmax.xlane.f32.xlu0 %v4383_v46 }
0x1739   :  { %v4294_v47 = vpop.f32.mrb[40].mxu0 }
0x173a   :  { %v4218_v48 = vpop.f32.mrb[52].mxu1  ;;  %v11586_v49 = vpop.f32.mrb[41].mxu0  ;;  %v4392_v50 = vsel %vm167_vm2, %v4294_v47, -inf }
0x173b   :  { %v11581_v51 = vpop.f32.mrb[53].mxu1  ;;  %4393 = vmax.xlane.f32.xlu1 %v4392_v50  ;;  %v4389_v52 = vsel %vm167_vm2, %v4218_v48, -inf }
0x173c   :  { %4390 = vmax.xlane.f32.xlu0 %v4389_v52 }
0x173e   :  { %v4370_v53 = vpop.f32.mrb[54].mxu1 }
0x173f   :  { %v11591_v7 = vpop.f32.mrb[55].mxu1  ;;  %v4395_v5 = vsel %vm167_vm2, %v4370_v53, -inf }
0x1740   :  { %4396 = vmax.xlane.f32.xlu0 %v4395_v5 }
0x174c   :  { %4462 = vrot.lane.b32.xlu1 %v13130_v16, %s12632_s26 }
0x1750   :  { %4614 = vrot.lane.b32.xlu1 %v13148_v21, %s12632_s26 }
0x1754   :  { %4690 = vrot.lane.b32.xlu1 %v13158_v25, %s12632_s26 }
0x1755   :  { %v4376_v9 = vpop.xlane.xlu0 %4375 }
0x1756   :  { %4538 = vrot.lane.b32.xlu0 %v13150_v22, %s12632_s26  ;;  %v4398_v8 = vsub.f32 %v3838_v36, %v4376_v9 }
0x1758   :  { %4842 = vrot.lane.b32.xlu1 %v13164_v27, %s12632_s26  ;;  %v4406_v54 = vmul.f32 1.442695, %v4398_v8 }
0x175a   :  { %4766 = vrot.lane.b32.xlu0 %v13136_v17, %s12632_s26  ;;  %12373 = vpow2.f32 %v4406_v54 }
0x1764   :  { %v13242_v55 = vpop.eup %12373 }
0x1765   :  { %v4422_v56 = vsel %vm167_vm2, %v13242_v55, 0.0 }
0x177c   :  { %4423 = vadd.xlane.f32.xlu1 %v4422_v56 }
0x17c0   :  { %v4382_v57 = vpop.xlane.xlu0 %4381  ;;  %v4379_v58 = vpop.xlane.xlu1 %4378 }
0x17c1   :  { %v4400_v59 = vsub.f32 %v3990_v40, %v4382_v57  ;;  %v4399_v60 = vsub.f32 %v3914_v39, %v4379_v58 }
0x17c3   :  { %v4410_v61 = vmul.f32 1.442695, %v4400_v59  ;;  %v4408_v62 = vmul.f32 1.442695, %v4399_v60 }
0x17c4   :  { %v4385_v63 = vpop.xlane.xlu0 %4384  ;;  %v4388_v0 = vpop.xlane.xlu1 %4387 }
0x17c5   :  { %12375 = vpow2.f32 %v4410_v61  ;;  %v4401_v1 = vsub.f32 %v4066_v24, %v4385_v63  ;;  %v4402_v2 = vsub.f32 %v4142_v45, %v4388_v0 }
0x17c6   :  { %12377 = vpow2.f32 %v4408_v62 }
0x17c7   :  { %v4412_v3 = vmul.f32 1.442695, %v4401_v1  ;;  %v4414_v4 = vmul.f32 1.442695, %v4402_v2  ;;  %v5100_v1 = vld [vmem:[#allocation7 + $0x1e8] sm:$0xff]  ;;  %v5101_v2 = vld [vmem:[#allocation7 + $0x1f0] sm:$0xff] }
0x17c8   :  { %v4394_v6 = vpop.xlane.xlu1 %4393 }
0x17c9   :  { %12379 = vpow2.f32 %v4412_v3  ;;  %v4391_v13 = vpop.xlane.xlu0 %4390  ;;  %v4404_v14 = vsub.f32 %v4294_v47, %v4394_v6  ;;  %v12130_v3 = vpack.c.bf16 %v5101_v2, %v5100_v1  ;;  %v5103_v6 = vld [vmem:[#allocation7 + $0x200] sm:$0xff] }
0x17ca   :  { %12381 = vpow2.f32 %v4414_v4  ;;  %v4403_v15 = vsub.f32 %v4218_v48, %v4391_v13  ;;  %v5102_v4 = vld [vmem:[#allocation7 + $0x1f8] sm:$0xff]  ;;  %v10812_v2 = vld [vmem:[#allocation7 + $0x240] ss:$0 sm:$0xff] }
0x17cb   :  { %v4418_v16 = vmul.f32 1.442695, %v4404_v14  ;;  %v12134_v13 = vpack.c.bf16 %v5103_v6, %v5102_v4 }
0x17cc   :  { %v4416_v17 = vmul.f32 1.442695, %v4403_v15  ;;  %v4463_v21 = vpop.permute.xlu1 %4462 }
0x17cd   :  { %12383 = vpow2.f32 %v4418_v16  ;;  %v4397_v22 = vpop.xlane.xlu0 %4396  ;;  %11593 = vmatpush3.msra.mxu0 %v4463_v21 }
0x17ce   :  { %12385 = vpow2.f32 %v4416_v17  ;;  %v4405_v25 = vsub.f32 %v4370_v53, %v4397_v22  ;;  %11602 = vmatprep.subr.mxu0 %v12626_v10 }
0x17cf   :  { %v12376_v26 = vpop.eup %12375 }
0x17d0   :  { %v12378_v27 = vpop.eup %12377  ;;  %v4420_v29 = vmul.f32 1.442695, %v4405_v25  ;;  %v4428_v30 = vsel %vm167_vm2, %v12376_v26, 0.0  ;;  %v4615_v43 = vpop.permute.xlu1 %4614 }
0x17d1   :  { %v4539_v31 = vpop.permute.xlu0 %4538  ;;  %4429 = vadd.xlane.f32.xlu1 %v4428_v30  ;;  %v4425_v32 = vsel %vm167_vm2, %v12378_v27, 0.0 }
0x17d2   :  { %12387 = vpow2.f32 %v4420_v29  ;;  %11598 = vmatpush3.msra.mxu1 %v4539_v31  ;;  %4426 = vadd.xlane.f32.xlu0 %v4425_v32 }
0x17d3   :  { %v12380_v33 = vpop.eup %12379  ;;  %11607 = vmatprep.subr.mxu1 %v12626_v10 }
0x17d4   :  { %v12382_v34 = vpop.eup %12381  ;;  %v4431_v35 = vsel %vm167_vm2, %v12380_v33, 0.0  ;;  %v4691_v44 = vpop.permute.xlu1 %4690 }
0x17d5   :  { %v4434_v36 = vsel %vm167_vm2, %v12382_v34, 0.0 }
0x17d6   :  { %4432 = vadd.xlane.f32.xlu0 %v4431_v35  ;;  %4435 = vadd.xlane.f32.xlu1 %v4434_v36 }
0x17d7   :  { %v13252_v37 = vpop.eup %12383 }
0x17d8   :  { %v12386_v38 = vpop.eup %12385  ;;  %v4440_v39 = vsel %vm167_vm2, %v13252_v37, 0.0  ;;  %v4843_v24 = vpop.permute.xlu1 %4842 }
0x17d9   :  { %v4437_v40 = vsel %vm167_vm2, %v12386_v38, 0.0 }
0x17da   :  { %4438 = vadd.xlane.f32.xlu0 %v4437_v40  ;;  %4441 = vadd.xlane.f32.xlu1 %v4440_v39 }
0x17dc   :  { %v13257_v41 = vpop.eup %12387 }
0x17dd   :  { %v4443_v42 = vsel %vm167_vm2, %v13257_v41, 0.0 }
0x17de   :  { %4444 = vadd.xlane.f32.xlu0 %v4443_v42 }
0x17eb   :  { %4994 = vrot.lane.b32.xlu1 %v13174_v28, %s12632_s26  ;;  %v4767_v28 = vpop.permute.xlu0 %4766 }
0x17f4   :  { %4918 = vrot.lane.b32.xlu0 %v13156_v23, %s12632_s26 }
0x1809   :  { %v4424_v45 = vpop.xlane.xlu1 %4423 }
0x180a   :  { %12389 = vrcp.f32 %v4424_v45  ;;  %v10807_v45 = vld [vmem:[#allocation7 + $0x208] ss:$0 sm:$0xff] }
0x1814   :  { %v12390_v18 = vpop.eup %12389 }
0x1815   :  { %v4447_v20 = vmul.f32 %v12390_v18, %v13242_v55 }
0x1817   :  { %11595 = vmatmul.mubr.msk.f32.vlgmr.msra.gmra.mrb[42].mxu0 %vm167_vm2, %v4447_v20 }
0x1818   :  { %11603 = vmatpush3.msra.mxu0 %v4615_v43  ;;  %11604 = vmatprep.mubr.msk.f32.mxu0 %vm12629_vm1, %v12626_v10 }
0x1819   :  { %11612 = vmatprep.subr.mxu0 %v12626_v10 }
0x185e   :  { %v4430_v19 = vpop.xlane.xlu1 %4429 }
0x185f   :  { %v4427_v46 = vpop.xlane.xlu0 %4426  ;;  %12391 = vrcp.f32 %v4430_v19 }
0x1860   :  { %12393 = vrcp.f32 %v4427_v46 }
0x1863   :  { %v4433_v23 = vpop.xlane.xlu0 %4432  ;;  %v4436_v47 = vpop.xlane.xlu1 %4435 }
0x1864   :  { %12395 = vrcp.f32 %v4433_v23 }
0x1865   :  { %12397 = vrcp.f32 %v4436_v47 }
0x1867   :  { %v4439_v48 = vpop.xlane.xlu0 %4438  ;;  %v4442_v49 = vpop.xlane.xlu1 %4441 }
0x1868   :  { %12399 = vrcp.f32 %v4439_v48 }
0x1869   :  { %v12392_v50 = vpop.eup %12391  ;;  %12401 = vrcp.f32 %v4442_v49  ;;  %v5232_v49 = vld [vmem:[#allocation7 + $0x220] sm:$0xff] }
0x186a   :  { %v12394_v51 = vpop.eup %12393  ;;  %v4451_v52 = vmul.f32 %v12392_v50, %v12376_v26  ;;  %v5233_v50 = vld [vmem:[#allocation7 + $0x228] sm:$0xff] }
0x186b   :  { %v4445_v53 = vpop.xlane.xlu0 %4444  ;;  %v4449_v7 = vmul.f32 %v12394_v51, %v12378_v27  ;;  %v4995_v60 = vpop.permute.xlu1 %4994  ;;  %v12273_v51 = vpack.i.bf16 %v5233_v50, %v5232_v49 }
0x186c   :  { %12403 = vrcp.f32 %v4445_v53  ;;  %11605 = vmatmul.mubr.msk.f32.vlgmr.msra.gmra.mrb[44].mxu0 %vm167_vm2, %v4451_v52 }
0x186d   :  { %11600 = vmatmul.mubr.msk.f32.vlgmr.msra.gmra.mrb[56].mxu1 %vm167_vm2, %v4449_v7  ;;  %11613 = vmatpush3.msra.mxu0 %v4767_v28 }
0x186e   :  { %v12396_v5 = vpop.eup %12395  ;;  %11608 = vmatpush3.msra.mxu1 %v4691_v44  ;;  %11609 = vmatprep.mubr.msk.f32.mxu1 %vm12629_vm1, %v12626_v10 }
0x186f   :  { %v12398_v9 = vpop.eup %12397  ;;  %11614 = vmatprep.mubr.msk.f32.mxu0 %vm12629_vm1, %v12626_v10  ;;  %11617 = vmatprep.subr.mxu1 %v12626_v10  ;;  %v4453_v8 = vmul.f32 %v12396_v5, %v12380_v33  ;;  %v4919_v54 = vpop.permute.xlu0 %4918 }
0x1870   :  { %11622 = vmatprep.subr.mxu0 %v12626_v10  ;;  %v4455_v55 = vmul.f32 %v12398_v9, %v12382_v34 }
0x1871   :  { %11610 = vmatmul.mubr.msk.f32.vlgmr.msra.gmra.mrb[58].mxu1 %vm167_vm2, %v4453_v8 }
0x1872   :  { %v12400_v56 = vpop.eup %12399  ;;  %11615 = vmatmul.mubr.msk.f32.vlgmr.msra.gmra.mrb[46].mxu0 %vm167_vm2, %v4455_v55  ;;  %11618 = vmatpush3.msra.mxu1 %v4843_v24 }
0x1873   :  { %v12402_v57 = vpop.eup %12401  ;;  %11623 = vmatpush3.msra.mxu0 %v4919_v54  ;;  %11619 = vmatprep.mubr.msk.f32.mxu1 %vm12629_vm1, %v12626_v10  ;;  %v4457_v58 = vmul.f32 %v12400_v56, %v12386_v38 }
0x1874   :  { %11624 = vmatprep.mubr.msk.f32.mxu0 %vm12629_vm1, %v12626_v10  ;;  %11627 = vmatprep.subr.mxu1 %v12626_v10  ;;  %v4459_v59 = vmul.f32 %v12402_v57, %v13252_v37  ;;  %v5234_v57 = vld [vmem:[#allocation7 + $0x230] sm:$0xff] }
0x1875   :  { %11620 = vmatmul.mubr.msk.f32.vlgmr.msra.gmra.mrb[60].mxu1 %vm167_vm2, %v4457_v58  ;;  %12131 = vmatprep.subr.bf16.mxu0 %v12130_v3  ;;  %v5235_v58 = vld [vmem:[#allocation7 + $0x238] sm:$0xff] }
0x1876   :  { %v12404_v61 = vpop.eup %12403  ;;  %11625 = vmatmul.mubr.msk.f32.vlgmr.msra.gmra.mrb[48].mxu0 %vm167_vm2, %v4459_v59  ;;  %11628 = vmatpush3.msra.mxu1 %v4995_v60  ;;  %v12142_v1 = vpack.c.bf16 %v5235_v58, %v5234_v57 }
0x1877   :  { %11629 = vmatprep.mubr.msk.f32.mxu1 %vm12629_vm1, %v12626_v10  ;;  %v4461_v62 = vmul.f32 %v12404_v61, %v13257_v41  ;;  %12133 = vmatpush3.bf16.msra.mxu0 %v12130_v3  ;;  %v12278_v61 = vpack.i.bf16 %v5235_v58, %v5234_v57 }
0x1878   :  { %12135 = vmatprep.subr.bf16.mxu0 %v12134_v13 }
0x1879   :  { %11630 = vmatmul.mubr.msk.f32.vlgmr.msra.gmra.mrb[62].mxu1 %vm167_vm2, %v4461_v62 }
0x187b   :  { %12137 = vmatpush3.bf16.msra.mxu0 %v12134_v13 }
0x18ea   :  { %v4534_v63 = vpop.f32.mrb[42].mxu0 }
0x18eb   :  { %v11596_v0 = vpop.f32.mrb[43].mxu0 }
0x18ec   :  { %v12138_v0 = vpack.c.bf16 %v5233_v50, %v5232_v49 }
0x18ee   :  { %12139 = vmatprep.subr.bf16.mxu1 %v12138_v0 }
0x18ef   :  { %12141 = vmatpush3.bf16.msra.mxu1 %v12138_v0 }
0x18f0   :  { %12143 = vmatprep.subr.bf16.mxu1 %v12142_v1 }
0x18f3   :  { %12145 = vmatpush3.bf16.msra.mxu1 %v12142_v1 }
0x18f4   :  { %11665 = vmatprep.subr.mxu1 %v12626_v10 }
0x193f   :  { %v4686_v14 = vpop.f32.mrb[44].mxu0 }
0x1940   :  { %v4610_v15 = vpop.f32.mrb[56].mxu1  ;;  %5075 = vrot.lane.b32.xlu1 %v4686_v14, %s12633_s27  ;;  %v11606_v16 = vpop.f32.mrb[45].mxu0 }
0x1941   :  { %5071 = vrot.lane.b32.xlu0 %v4610_v15, %s12624_s25  ;;  %v11601_v17 = vpop.f32.mrb[57].mxu1 }
0x1944   :  { %v4762_v21 = vpop.f32.mrb[58].mxu1 }
0x1945   :  { %v4838_v22 = vpop.f32.mrb[46].mxu0  ;;  %v11611_v25 = vpop.f32.mrb[59].mxu1  ;;  %5079 = vrot.lane.b32.xlu1 %v4762_v21, %s12634_s28 }
0x1946   :  { %v11616_v26 = vpop.f32.mrb[47].mxu0  ;;  %v59_v25 = vld [vmem:[#allocation5 + $0x8] sm:$0xff] }
0x1948   :  { %v4914_v27 = vpop.f32.mrb[60].mxu1 }
0x1949   :  { %v4990_v29 = vpop.f32.mrb[48].mxu0  ;;  %5086 = vrot.lane.b32.xlu0 %v4914_v27, %s12624_s25  ;;  %v11621_v30 = vpop.f32.mrb[61].mxu1 }
0x194a   :  { %v11626_v31 = vpop.f32.mrb[49].mxu0 }
0x194c   :  { %v5066_v32 = vpop.f32.mrb[62].mxu1 }
0x194d   :  { %5090 = vrot.lane.b32.xlu0 %v4990_v29, %s12633_s27  ;;  %5094 = vrot.lane.b32.xlu1 %v5066_v32, %s12634_s28  ;;  %v11631_v33 = vpop.f32.mrb[63].mxu1  ;;  %v10810_v29 = vld [vmem:[#allocation7 + $0x210] ss:$0 sm:$0xff] }
0x194e   :  { %v10811_v33 = vld [vmem:[#allocation7 + $0x218] ss:$0 sm:$0xff] }
0x19b2   :  { %v5076_v34 = vpop.permute.xlu1 %5075 }
0x19b3   :  { %v5072_v35 = vpop.permute.xlu0 %5071 }
0x19b4   :  { %v5082_v36 = vsel %vm167_vm2, %v4534_v63, %v5072_v35  ;;  %v58_v63 = vld [vmem:[#allocation5] sm:$0xff] }
0x19b5   :  { %v5083_v37 = vsel %vm1483_vm3, %v5082_v36, %v5076_v34 }
0x19b7   :  { %v5080_v38 = vpop.permute.xlu1 %5079 }
0x19b8   :  { %v5084_v39 = vsel %vm1485_vm4, %v5083_v37, %v5080_v38 }
0x19b9   :  { %11640 = vmatprep.mubr.msk.f32.mxu0 %vm69_vm0, %v5084_v39 }
0x19bb   :  { %v5087_v40 = vpop.permute.xlu0 %5086 }
0x19bc   :  { %v5097_v41 = vsel %vm167_vm2, %v4838_v22, %v5087_v40 }
0x19bf   :  { %v5091_v42 = vpop.permute.xlu0 %5090  ;;  %v5095_v43 = vpop.permute.xlu1 %5094 }
0x19c0   :  { %v5098_v44 = vsel %vm1483_vm3, %v5097_v41, %v5091_v42 }
0x19c1   :  { %v5099_v24 = vsel %vm1485_vm4, %v5098_v44, %v5095_v43 }
0x19c2   :  { %11641 = vmatmul.mubr.msk.f32.vlgmr.msra.gmra.mrb[50].mxu0 %vm69_vm0, %v5099_v24 }
0x19c3   :  { %11662 = vmatprep.mubr.msk.f32.mxu0 %vm69_vm0, %v58_v63 }
0x1a95   :  { %v11642_v18 = vpop.f32.mrb[50].mxu0 }
0x1a96   :  { %v5187_v20 = vadd.f32 %v11642_v18, %v10807_v45  ;;  %v5181_v28 = vpop.f32.mrb[51].mxu0 }
0x1a97   :  { %v5182_v19 = vadd.f32 %v10807_v45, %v5181_v28 }
0x1a98   :  { %v5191_v46 = vadd.f32 %v5187_v20, %v13122_v12 }
0x1a99   :  { %v5190_v23 = vadd.f32 %v5182_v19, %v13120_v11 }
0x1a9a   :  { %v5197_v47 = vsel %vm69_vm0, %v5191_v46, 0.0 }
0x1a9b   :  { %5198 = vadd.xlane.f32.xlu1 %v5197_v47  ;;  %v5194_v48 = vsel %vm69_vm0, %v5190_v23, 0.0 }
0x1a9c   :  { %5195 = vadd.xlane.f32.xlu0 %v5194_v48 }
0x1aac   :  { %12274 = vrot.lane.b32.xlu1 %v12273_v51, %s12631_s23 }
0x1ab0   :  { %5339 = vrot.lane.b32.xlu1 %v10812_v2, %s12631_s23 }
0x1b28   :  { %v5199_v52 = vpop.xlane.xlu1 %5198 }
0x1b29   :  { %v5201_v53 = vmul.f32 0.03125, %v5199_v52  ;;  %v5196_v7 = vpop.xlane.xlu0 %5195 }
0x1b2a   :  { %v5200_v5 = vmul.f32 0.03125, %v5196_v7 }
0x1b2b   :  { %v5203_v9 = vsub.f32 %v5191_v46, %v5201_v53 }
0x1b2c   :  { %v5202_v8 = vsub.f32 %v5190_v23, %v5200_v5  ;;  %v12275_v56 = vpop.permute.xlu1 %12274 }
0x1b2d   :  { %v5205_v12 = vmul.f32 %v5203_v9, %v5203_v9  ;;  %v12277_v59 = vunpack.i.h.bf16 %v12275_v56  ;;  %v12276_v60 = vunpack.i.l.bf16 %v12275_v56 }
0x1b2e   :  { %v5204_v54 = vmul.f32 %v5202_v8, %v5202_v8 }
0x1b2f   :  { %v5209_v11 = vsel %vm69_vm0, %v5205_v12, 0.0  ;;  %v12146_v62 = vpack.c.bf16 %v12277_v59, %v12276_v60 }
0x1b30   :  { %5210 = vadd.xlane.f32.xlu0 %v5209_v11  ;;  %v5206_v55 = vsel %vm69_vm0, %v5204_v54, 0.0  ;;  %v5340_v37 = vpop.permute.xlu1 %5339 }
0x1b31   :  { %12147 = vmatprep.subr.bf16.mxu0 %v12146_v62 }
0x1b32   :  { %12149 = vmatpush3.bf16.msra.mxu0 %v12146_v62 }
0x1b34   :  { %5207 = vadd.xlane.f32.xlu0 %v5206_v55 }
0x1b4a   :  { %12279 = vrot.lane.b32.xlu0 %v12278_v61, %s12631_s23 }
0x1bbd   :  { %v5211_v3 = vpop.xlane.xlu0 %5210 }
0x1bbe   :  { %v5213_v4 = vmul.f32 0.03125, %v5211_v3 }
0x1bc0   :  { %v5215_v6 = vadd.f32 1e-05, %v5213_v4 }
0x1bc1   :  { %v5208_v13 = vpop.xlane.xlu0 %5207 }
0x1bc2   :  { %12405 = vrsqrt.f32 %v5215_v6  ;;  %v5212_v14 = vmul.f32 0.03125, %v5208_v13 }
0x1bc4   :  { %v5214_v15 = vadd.f32 1e-05, %v5212_v14 }
0x1bc5   :  { %v12280_v16 = vpop.permute.xlu0 %12279 }
0x1bc6   :  { %12407 = vrsqrt.f32 %v5214_v15  ;;  %v12282_v17 = vunpack.i.h.bf16 %v12280_v16  ;;  %v12281_v21 = vunpack.i.l.bf16 %v12280_v16 }
0x1bc8   :  { %v12150_v22 = vpack.c.bf16 %v12282_v17, %v12281_v21 }
0x1bca   :  { %12151 = vmatprep.subr.bf16.mxu0 %v12150_v22 }
0x1bcb   :  { %12153 = vmatpush3.bf16.msra.mxu0 %v12150_v22 }
0x1bcc   :  { %v12406_v26 = vpop.eup %12405  ;;  %11675 = vmatprep.subr.mxu0 %v12626_v10 }
0x1bcd   :  { %v5219_v27 = vmul.f32 %v12406_v26, %v5203_v9 }
0x1bce   :  { %11663 = vmatmul.mubr.msk.f32.vlgmr.msra.gmra.mrb[52].mxu0 %vm69_vm0, %v59_v25 }
0x1bcf   :  { %11677 = vmatprep.mubr.msk.f32.mxu0 %vm12629_vm1, %v12626_v10  ;;  %v5225_v32 = vmul.f32 %v10810_v29, %v5219_v27 }
0x1bd0   :  { %v12408_v30 = vpop.eup %12407 }
0x1bd1   :  { %v5218_v31 = vmul.f32 %v12408_v30, %v5202_v8  ;;  %v13323_v36 = vadd.f32 %v10811_v33, %v5225_v32 }
0x1bd3   :  { %v5224_v34 = vmul.f32 %v10810_v29, %v5218_v31 }
0x1bd5   :  { %v13321_v35 = vadd.f32 %v10811_v33, %v5224_v34 }
0x1bd7   :  { %11651 = vmatprep.mubr.msk.f32.mxu1 %vm69_vm0, %v13321_v35 }
0x1bd8   :  { %11652 = vmatmul.mubr.msk.f32.vlgmr.msra.gmra.mrb[64].mxu1 %vm69_vm0, %v13323_v36 }
0x1bd9   :  { %11667 = vmatprep.mubr.msk.f32.mxu1 %vm12629_vm1, %v12626_v10 }
0x1ca1   :  { %v11664_v38 = vpop.f32.mrb[52].mxu0 }
0x1ca2   :  { %v5414_v39 = vpop.f32.mrb[53].mxu0  ;;  %v13342_v41 = vadd.f32 %v11664_v38, %v5340_v37 }
0x1ca3   :  { %v13331_v40 = vadd.f32 %v5414_v39, %v5340_v37 }
0x1ca5   :  { %5438 = vrot.lane.b32.xlu1 %v13331_v40, %s12628_s21  ;;  %5442 = vrot.lane.b32.xlu0 %v13331_v40, %s12627_s2 }
0x1ca6   :  { %11666 = vmatpush3.xpose.msk.msra.mxu1 %vm167_vm2, %v13331_v40 }
0x1ca7   :  { %11670 = vmatprep.subr.mxu1 %v12626_v10 }
0x1ca9   :  { %5440 = vrot.lane.b32.xlu1 %v13331_v40, %s12630_s22 }
0x1cab   :  { %v11653_v42 = vpop.f32.mrb[64].mxu1 }
0x1cac   :  { %v5319_v43 = vadd.f32 %v11653_v42, %v10812_v2  ;;  %v5313_v44 = vpop.f32.mrb[65].mxu1 }
0x1cad   :  { %v5314_v24 = vadd.f32 %v10812_v2, %v5313_v44  ;;  %5445 = vrot.lane.b32.xlu1 %v13342_v41, %s12628_s21 }
0x1cae   :  { %5431 = vrot.lane.b32.xlu0 %v5319_v43, %s12628_s21 }
0x1caf   :  { %11668 = vmatmul.mubr.msk.f32.vlgmr.msra.gmra.mrb[66].mxu1 %vm167_vm2, %v5314_v24 }
0x1cb0   :  { %11672 = vmatprep.mubr.msk.f32.mxu1 %vm12629_vm1, %v12626_v10 }
0x1cb1   :  { %5426 = vrot.lane.b32.xlu1 %v5314_v24, %s12630_s22 }
0x1cb2   :  { %5424 = vrot.lane.b32.xlu0 %v5314_v24, %s12628_s21 }
0x1cb5   :  { %5447 = vrot.lane.b32.xlu1 %v13342_v41, %s12630_s22 }
0x1cb6   :  { %5428 = vrot.lane.b32.xlu0 %v5314_v24, %s12627_s2 }
0x1cb9   :  { %5433 = vrot.lane.b32.xlu1 %v5319_v43, %s12630_s22 }
0x1cba   :  { %5449 = vrot.lane.b32.xlu0 %v13342_v41, %s12627_s2 }
0x1cbe   :  { %5435 = vrot.lane.b32.xlu0 %v5319_v43, %s12627_s2 }
0x1d17   :  { %v13359_v45 = vpop.permute.xlu1 %5438  ;;  %v13364_v18 = vpop.permute.xlu0 %5442 }
0x1d18   :  { %11671 = vmatpush3.xpose.msk.msra.mxu1 %vm167_vm2, %v13359_v45 }
0x1d19   :  { %11680 = vmatprep.subr.mxu1 %v12626_v10 }
0x1d1b   :  { %v13366_v20 = vpop.permute.xlu1 %5440 }
0x1d1c   :  { %11676 = vmatpush3.xpose.msk.msra.mxu0 %vm167_vm2, %v13366_v20 }
0x1d1d   :  { %11685 = vmatprep.subr.mxu0 %v12626_v10 }
0x1d1f   :  { %v13371_v28 = vpop.permute.xlu1 %5445 }
0x1d20   :  { %v5432_v19 = vpop.permute.xlu0 %5431 }
0x1d23   :  { %v5427_v46 = vpop.permute.xlu1 %5426 }
0x1d24   :  { %v5425_v23 = vpop.permute.xlu0 %5424  ;;  %11678 = vmatmul.mubr.msk.f32.vlgmr.msra.gmra.mrb[54].mxu0 %vm167_vm2, %v5427_v46 }
0x1d25   :  { %11686 = vmatpush3.xpose.msk.msra.mxu0 %vm167_vm2, %v13342_v41  ;;  %11673 = vmatmul.mubr.msk.f32.vlgmr.msra.gmra.mrb[68].mxu1 %vm167_vm2, %v5425_v23 }
0x1d26   :  { %11681 = vmatpush3.xpose.msk.msra.mxu1 %vm167_vm2, %v13364_v18  ;;  %11687 = vmatprep.mubr.msk.f32.mxu0 %vm12629_vm1, %v12626_v10 }
0x1d27   :  { %11695 = vmatprep.subr.mxu0 %v12626_v10  ;;  %v13382_v47 = vpop.permute.xlu1 %5447  ;;  %11682 = vmatprep.mubr.msk.f32.mxu1 %vm12629_vm1, %v12626_v10 }
0x1d28   :  { %v5429_v48 = vpop.permute.xlu0 %5428  ;;  %11688 = vmatmul.mubr.msk.f32.vlgmr.msra.gmra.mrb[56].mxu0 %vm167_vm2, %v5319_v43  ;;  %11690 = vmatprep.subr.mxu1 %v12626_v10 }
0x1d29   :  { %11696 = vmatpush3.xpose.msk.msra.mxu0 %vm167_vm2, %v13382_v47  ;;  %11683 = vmatmul.mubr.msk.f32.vlgmr.msra.gmra.mrb[70].mxu1 %vm167_vm2, %v5429_v48 }
0x1d2a   :  { %11691 = vmatpush3.xpose.msk.msra.mxu1 %vm167_vm2, %v13371_v28  ;;  %11697 = vmatprep.mubr.msk.f32.mxu0 %vm12629_vm1, %v12626_v10 }
0x1d2b   :  { %v5434_v49 = vpop.permute.xlu1 %5433  ;;  %11692 = vmatprep.mubr.msk.f32.mxu1 %vm12629_vm1, %v12626_v10  ;;  %11700 = vmatprep.subr.mxu1 %v12626_v10 }
0x1d2c   :  { %v13398_v50 = vpop.permute.xlu0 %5449  ;;  %11698 = vmatmul.mubr.msk.f32.vlgmr.msra.gmra.mrb[58].mxu0 %vm167_vm2, %v5434_v49  ;;  %11705 = vmatprep.subr.mxu0 %v12626_v10 }
0x1d2d   :  { %11693 = vmatmul.mubr.msk.f32.vlgmr.msra.gmra.mrb[72].mxu1 %vm167_vm2, %v5432_v19  ;;  %11707 = vmatprep.mubr.msk.f32.mxu0 %vm12629_vm1, %v12626_v10 }
0x1d2e   :  { %11701 = vmatpush3.xpose.msk.msra.mxu1 %vm167_vm2, %v13398_v50  ;;  %11702 = vmatprep.mubr.msk.f32.mxu1 %vm12629_vm1, %v12626_v10 }
0x1d2f   :  { %11710 = vmatprep.subr.mxu1 %v12626_v10 }
0x1d30   :  { %v5436_v51 = vpop.permute.xlu0 %5435 }
0x1d31   :  { %11703 = vmatmul.mubr.msk.f32.vlgmr.msra.gmra.mrb[74].mxu1 %vm167_vm2, %v5436_v51 }
0x1d32   :  { %11712 = vmatprep.mubr.msk.f32.mxu1 %vm12629_vm1, %v12626_v10 }
0x1d82   :  { %v5521_v52 = vpop.f32.mrb[66].mxu1 }
0x1d83   :  { %v11669_v53 = vpop.f32.mrb[67].mxu1  ;;  %v6043_v7 = vsel %vm167_vm2, %v5521_v52, -inf }
0x1d84   :  { %6044 = vmax.xlane.f32.xlu1 %v6043_v7 }
0x1df7   :  { %v5669_v5 = vpop.f32.mrb[54].mxu0 }
0x1df8   :  { %v5595_v9 = vpop.f32.mrb[68].mxu1  ;;  %v11679_v8 = vpop.f32.mrb[55].mxu0  ;;  %v6049_v58 = vsel %vm167_vm2, %v5669_v5, -inf }
0x1df9   :  { %v11674_v12 = vpop.f32.mrb[69].mxu1  ;;  %v6046_v11 = vsel %vm167_vm2, %v5595_v9, -inf }
0x1dfa   :  { %6047 = vmax.xlane.f32.xlu0 %v6046_v11 }
0x1dfb   :  { %v5817_v54 = vpop.f32.mrb[56].mxu0 }
0x1dfc   :  { %v5743_v55 = vpop.f32.mrb[70].mxu1  ;;  %v11689_v56 = vpop.f32.mrb[57].mxu0  ;;  %v6055_v0 = vsel %vm167_vm2, %v5817_v54, -inf }
0x1dfd   :  { %v11684_v57 = vpop.f32.mrb[71].mxu1  ;;  %v6052_v59 = vsel %vm167_vm2, %v5743_v55, -inf }
0x1dfe   :  { %6050 = vmax.xlane.f32.xlu0 %v6049_v58  ;;  %6053 = vmax.xlane.f32.xlu1 %v6052_v59 }
0x1dff   :  { %v5965_v60 = vpop.f32.mrb[58].mxu0 }
0x1e00   :  { %v5891_v61 = vpop.f32.mrb[72].mxu1  ;;  %v11699_v62 = vpop.f32.mrb[59].mxu0  ;;  %v6061_v4 = vsel %vm167_vm2, %v5965_v60, -inf }
0x1e01   :  { %v11694_v63 = vpop.f32.mrb[73].mxu1  ;;  %v6058_v1 = vsel %vm167_vm2, %v5891_v61, -inf }
0x1e02   :  { %6056 = vmax.xlane.f32.xlu0 %v6055_v0  ;;  %6059 = vmax.xlane.f32.xlu1 %v6058_v1 }
0x1e04   :  { %v6039_v2 = vpop.f32.mrb[74].mxu1 }
0x1e05   :  { %v11704_v3 = vpop.f32.mrb[75].mxu1  ;;  %v6064_v6 = vsel %vm167_vm2, %v6039_v2, -inf }
0x1e06   :  { %6062 = vmax.xlane.f32.xlu0 %v6061_v4  ;;  %6065 = vmax.xlane.f32.xlu1 %v6064_v6 }
0x1e11   :  { %v6045_v13 = vpop.xlane.xlu1 %6044 }
0x1e12   :  { %v6067_v14 = vsub.f32 %v5521_v52, %v6045_v13 }
0x1e14   :  { %v6075_v15 = vmul.f32 1.442695, %v6067_v14 }
0x1e16   :  { %12409 = vpow2.f32 %v6075_v15 }
0x1e17   :  { %6207 = vrot.lane.b32.xlu1 %v13359_v45, %s12631_s23 }
0x1e1b   :  { %6283 = vrot.lane.b32.xlu1 %v13366_v20, %s12631_s23 }
0x1e1c   :  { %6131 = vrot.lane.b32.xlu0 %v13331_v40, %s12631_s23 }
0x1e1f   :  { %6435 = vrot.lane.b32.xlu1 %v13342_v41, %s12631_s23 }
0x1e20   :  { %6359 = vrot.lane.b32.xlu0 %v13364_v18, %s12631_s23  ;;  %v13433_v16 = vpop.eup %12409 }
0x1e21   :  { %v6091_v17 = vsel %vm167_vm2, %v13433_v16, 0.0 }
0x1e24   :  { %6511 = vrot.lane.b32.xlu0 %v13371_v28, %s12631_s23 }
0x1e43   :  { %6092 = vadd.xlane.f32.xlu0 %v6091_v17 }
0x1e87   :  { %v6048_v21 = vpop.xlane.xlu0 %6047 }
0x1e88   :  { %v6068_v22 = vsub.f32 %v5595_v9, %v6048_v21 }
0x1e8a   :  { %v6077_v25 = vmul.f32 1.442695, %v6068_v22 }
0x1e8b   :  { %v6051_v26 = vpop.xlane.xlu0 %6050  ;;  %v6054_v27 = vpop.xlane.xlu1 %6053 }
0x1e8c   :  { %12411 = vpow2.f32 %v6077_v25  ;;  %v6069_v29 = vsub.f32 %v5669_v5, %v6051_v26  ;;  %v6070_v30 = vsub.f32 %v5743_v55, %v6054_v27 }
0x1e8e   :  { %v6079_v31 = vmul.f32 1.442695, %v6069_v29  ;;  %v6081_v32 = vmul.f32 1.442695, %v6070_v30 }
0x1e8f   :  { %v6057_v33 = vpop.xlane.xlu0 %6056  ;;  %v6060_v34 = vpop.xlane.xlu1 %6059 }
0x1e90   :  { %12413 = vpow2.f32 %v6079_v31  ;;  %v6071_v37 = vsub.f32 %v5817_v54, %v6057_v33  ;;  %v6072_v38 = vsub.f32 %v5891_v61, %v6060_v34  ;;  %v6770_v33 = vld [vmem:[#allocation7 + $0x250] sm:$0xff] }
0x1e91   :  { %12415 = vpow2.f32 %v6081_v32  ;;  %v6769_v32 = vld [vmem:[#allocation7 + $0x248] sm:$0xff] }
0x1e92   :  { %v6083_v39 = vmul.f32 1.442695, %v6071_v37  ;;  %v6085_v40 = vmul.f32 1.442695, %v6072_v38  ;;  %v12154_v34 = vpack.c.bf16 %v6770_v33, %v6769_v32  ;;  %v6771_v37 = vld [vmem:[#allocation7 + $0x258] sm:$0xff]  ;;  %v6772_v38 = vld [vmem:[#allocation7 + $0x260] sm:$0xff] }
0x1e93   :  { %v6063_v41 = vpop.xlane.xlu0 %6062  ;;  %v6066_v42 = vpop.xlane.xlu1 %6065  ;;  %v6910_v32 = vld [vmem:[#allocation7 + $0x2c8] sm:$0xff]  ;;  %v6911_v33 = vld [vmem:[#allocation7 + $0x2d0] sm:$0xff] }
0x1e94   :  { %12417 = vpow2.f32 %v6083_v39  ;;  %v6073_v43 = vsub.f32 %v5965_v60, %v6063_v41  ;;  %v6074_v44 = vsub.f32 %v6039_v2, %v6066_v42  ;;  %v12158_v39 = vpack.c.bf16 %v6772_v38, %v6771_v37 }
0x1e95   :  { %12419 = vpow2.f32 %v6085_v40 }
0x1e96   :  { %v12412_v24 = vpop.eup %12411  ;;  %v6087_v45 = vmul.f32 1.442695, %v6073_v43  ;;  %v6089_v18 = vmul.f32 1.442695, %v6074_v44 }
0x1e97   :  { %v6132_v20 = vpop.permute.xlu0 %6131  ;;  %v6208_v28 = vpop.permute.xlu1 %6207  ;;  %v6094_v19 = vsel %vm167_vm2, %v12412_v24, 0.0 }
0x1e98   :  { %12421 = vpow2.f32 %v6087_v45  ;;  %11706 = vmatpush3.msra.mxu0 %v6132_v20  ;;  %6095 = vadd.xlane.f32.xlu1 %v6094_v19 }
0x1e99   :  { %12423 = vpow2.f32 %v6089_v18  ;;  %11711 = vmatpush3.msra.mxu1 %v6208_v28  ;;  %11715 = vmatprep.subr.mxu0 %v12626_v10 }
0x1e9a   :  { %v12414_v46 = vpop.eup %12413  ;;  %11720 = vmatprep.subr.mxu1 %v12626_v10 }
0x1e9b   :  { %v12416_v23 = vpop.eup %12415  ;;  %v6097_v48 = vsel %vm167_vm2, %v12414_v46, 0.0  ;;  %v6360_v11 = vpop.permute.xlu0 %6359 }
0x1e9c   :  { %6098 = vadd.xlane.f32.xlu0 %v6097_v48  ;;  %v6100_v49 = vsel %vm167_vm2, %v12416_v23, 0.0  ;;  %v6284_v58 = vpop.permute.xlu1 %6283 }
0x1e9d   :  { %6101 = vadd.xlane.f32.xlu1 %v6100_v49 }
0x1e9e   :  { %v12418_v51 = vpop.eup %12417 }
0x1e9f   :  { %v12420_v52 = vpop.eup %12419  ;;  %v6103_v53 = vsel %vm167_vm2, %v12418_v51, 0.0  ;;  %v6512_v54 = vpop.permute.xlu0 %6511 }
0x1ea0   :  { %6104 = vadd.xlane.f32.xlu0 %v6103_v53  ;;  %v6106_v7 = vsel %vm167_vm2, %v12420_v52, 0.0 }
0x1ea1   :  { %6107 = vadd.xlane.f32.xlu1 %v6106_v7 }
0x1ea2   :  { %v13444_v5 = vpop.eup %12421 }
0x1ea3   :  { %v13446_v9 = vpop.eup %12423  ;;  %v6109_v8 = vsel %vm167_vm2, %v13444_v5, 0.0 }
0x1ea4   :  { %6110 = vadd.xlane.f32.xlu0 %v6109_v8  ;;  %v6112_v12 = vsel %vm167_vm2, %v13446_v9, 0.0 }
0x1ea5   :  { %6113 = vadd.xlane.f32.xlu1 %v6112_v12 }
0x1eb6   :  { %6587 = vrot.lane.b32.xlu1 %v13382_v47, %s12631_s23  ;;  %v6436_v47 = vpop.permute.xlu1 %6435 }
0x1eba   :  { %6663 = vrot.lane.b32.xlu0 %v13398_v50, %s12631_s23 }
0x1ed0   :  { %v6093_v55 = vpop.xlane.xlu0 %6092 }
0x1ed1   :  { %12425 = vrcp.f32 %v6093_v55 }
0x1edb   :  { %v12426_v56 = vpop.eup %12425 }
0x1edc   :  { %v6116_v57 = vmul.f32 %v12426_v56, %v13433_v16  ;;  %v10841_v56 = vld [vmem:[#allocation7 + $0x268] ss:$0 sm:$0xff] }
0x1ede   :  { %11708 = vmatmul.mubr.msk.f32.vlgmr.msra.gmra.mrb[60].mxu0 %vm167_vm2, %v6116_v57 }
0x1edf   :  { %11716 = vmatpush3.msra.mxu0 %v6284_v58  ;;  %11717 = vmatprep.mubr.msk.f32.mxu0 %vm12629_vm1, %v12626_v10 }
0x1ee0   :  { %11725 = vmatprep.subr.mxu0 %v12626_v10 }
0x1f25   :  { %v6096_v59 = vpop.xlane.xlu1 %6095 }
0x1f26   :  { %12427 = vrcp.f32 %v6096_v59 }
0x1f29   :  { %v6099_v50 = vpop.xlane.xlu0 %6098 }
0x1f2a   :  { %12429 = vrcp.f32 %v6099_v50  ;;  %v6102_v60 = vpop.xlane.xlu1 %6101 }
0x1f2b   :  { %12431 = vrcp.f32 %v6102_v60 }
0x1f2d   :  { %v6105_v61 = vpop.xlane.xlu0 %6104 }
0x1f2e   :  { %12433 = vrcp.f32 %v6105_v61  ;;  %v6108_v62 = vpop.xlane.xlu1 %6107 }
0x1f2f   :  { %12435 = vrcp.f32 %v6108_v62 }
0x1f30   :  { %v12428_v63 = vpop.eup %12427 }
0x1f31   :  { %v6111_v0 = vpop.xlane.xlu0 %6110  ;;  %v6118_v1 = vmul.f32 %v12428_v63, %v12412_v24 }
0x1f32   :  { %12437 = vrcp.f32 %v6111_v0  ;;  %v6114_v2 = vpop.xlane.xlu1 %6113 }
0x1f33   :  { %12439 = vrcp.f32 %v6114_v2  ;;  %11713 = vmatmul.mubr.msk.f32.vlgmr.msra.gmra.mrb[76].mxu1 %vm167_vm2, %v6118_v1 }
0x1f34   :  { %v12430_v3 = vpop.eup %12429  ;;  %11721 = vmatpush3.msra.mxu1 %v6360_v11  ;;  %11722 = vmatprep.mubr.msk.f32.mxu1 %vm12629_vm1, %v12626_v10 }
0x1f35   :  { %v12432_v4 = vpop.eup %12431  ;;  %11730 = vmatprep.subr.mxu1 %v12626_v10  ;;  %v6120_v6 = vmul.f32 %v12430_v3, %v12414_v46  ;;  %v6664_v25 = vpop.permute.xlu0 %6663 }
0x1f36   :  { %v6122_v13 = vmul.f32 %v12432_v4, %v12416_v23  ;;  %v6588_v21 = vpop.permute.xlu1 %6587 }
0x1f37   :  { %11718 = vmatmul.mubr.msk.f32.vlgmr.msra.gmra.mrb[62].mxu0 %vm167_vm2, %v6120_v6 }
0x1f38   :  { %v12434_v14 = vpop.eup %12433  ;;  %11723 = vmatmul.mubr.msk.f32.vlgmr.msra.gmra.mrb[78].mxu1 %vm167_vm2, %v6122_v13  ;;  %11726 = vmatpush3.msra.mxu0 %v6436_v47 }
0x1f39   :  { %v12436_v15 = vpop.eup %12435  ;;  %11731 = vmatpush3.msra.mxu1 %v6512_v54  ;;  %11727 = vmatprep.mubr.msk.f32.mxu0 %vm12629_vm1, %v12626_v10  ;;  %v6124_v16 = vmul.f32 %v12434_v14, %v12418_v51 }
0x1f3a   :  { %11732 = vmatprep.mubr.msk.f32.mxu1 %vm12629_vm1, %v12626_v10  ;;  %11735 = vmatprep.subr.mxu0 %v12626_v10  ;;  %v6126_v17 = vmul.f32 %v12436_v15, %v12420_v52  ;;  %v6902_v15 = vld [vmem:[#allocation7 + $0x288] sm:$0xff] }
0x1f3b   :  { %11740 = vmatprep.subr.mxu1 %v12626_v10  ;;  %11728 = vmatmul.mubr.msk.f32.vlgmr.msra.gmra.mrb[64].mxu0 %vm167_vm2, %v6124_v16  ;;  %v6903_v16 = vld [vmem:[#allocation7 + $0x290] sm:$0xff] }
0x1f3c   :  { %v12438_v22 = vpop.eup %12437  ;;  %11733 = vmatmul.mubr.msk.f32.vlgmr.msra.gmra.mrb[80].mxu1 %vm167_vm2, %v6126_v17  ;;  %11736 = vmatpush3.msra.mxu0 %v6588_v21  ;;  %v6904_v21 = vld [vmem:[#allocation7 + $0x298] sm:$0xff] }
0x1f3d   :  { %v12440_v26 = vpop.eup %12439  ;;  %11741 = vmatpush3.msra.mxu1 %v6664_v25  ;;  %11737 = vmatprep.mubr.msk.f32.mxu0 %vm12629_vm1, %v12626_v10  ;;  %v6128_v27 = vmul.f32 %v12438_v22, %v13444_v5  ;;  %v12166_v22 = vpack.c.bf16 %v6904_v21, %v6903_v16  ;;  %v6906_v25 = vld [vmem:[#allocation7 + $0x2a8] sm:$0xff] }
0x1f3e   :  { %11742 = vmatprep.mubr.msk.f32.mxu1 %vm12629_vm1, %v12626_v10  ;;  %v6130_v29 = vmul.f32 %v12440_v26, %v13446_v9  ;;  %12155 = vmatprep.subr.bf16.mxu0 %v12154_v34  ;;  %v6907_v26 = vld [vmem:[#allocation7 + $0x2b0] sm:$0xff] }
0x1f3f   :  { %11738 = vmatmul.mubr.msk.f32.vlgmr.msra.gmra.mrb[66].mxu0 %vm167_vm2, %v6128_v27  ;;  %v6908_v27 = vld [vmem:[#allocation7 + $0x2b8] sm:$0xff] }
0x1f40   :  { %11743 = vmatmul.mubr.msk.f32.vlgmr.msra.gmra.mrb[82].mxu1 %vm167_vm2, %v6130_v29  ;;  %12157 = vmatpush3.bf16.msra.mxu0 %v12154_v34  ;;  %v12170_v29 = vpack.c.bf16 %v6907_v26, %v6906_v25  ;;  %v12178_v34 = vpack.c.bf16 %v6911_v33, %v6910_v32 }
0x1f41   :  { %12159 = vmatprep.subr.bf16.mxu0 %v12158_v39 }
0x1f44   :  { %12161 = vmatpush3.bf16.msra.mxu0 %v12158_v39 }
0x1f45   :  { %12171 = vmatprep.subr.bf16.mxu0 %v12170_v29 }
0x1fb1   :  { %v6203_v30 = vpop.f32.mrb[60].mxu0 }
0x1fb2   :  { %v11709_v31 = vpop.f32.mrb[61].mxu0 }
0x2006   :  { %v6279_v40 = vpop.f32.mrb[76].mxu1 }
0x2007   :  { %6740 = vrot.lane.b32.xlu1 %v6279_v40, %s12624_s25  ;;  %v11714_v41 = vpop.f32.mrb[77].mxu1 }
0x200a   :  { %v6355_v42 = vpop.f32.mrb[62].mxu0 }
0x200b   :  { %v6431_v43 = vpop.f32.mrb[78].mxu1  ;;  %6744 = vrot.lane.b32.xlu0 %v6355_v42, %s12633_s27  ;;  %v11719_v44 = vpop.f32.mrb[63].mxu0 }
0x200c   :  { %v11724_v24 = vpop.f32.mrb[79].mxu1  ;;  %v10844_v44 = vld [vmem:[#allocation7 + $0x270] ss:$0 sm:$0xff] }
0x200e   :  { %v6507_v45 = vpop.f32.mrb[64].mxu0 }
0x200f   :  { %v6583_v18 = vpop.f32.mrb[80].mxu1  ;;  %v11729_v20 = vpop.f32.mrb[65].mxu0  ;;  %6748 = vrot.lane.b32.xlu0 %v6431_v43, %s12634_s28 }
0x2010   :  { %6755 = vrot.lane.b32.xlu1 %v6583_v18, %s12624_s25  ;;  %v11734_v28 = vpop.f32.mrb[81].mxu1  ;;  %v10845_v20 = vld [vmem:[#allocation7 + $0x278] ss:$0 sm:$0xff] }
0x2012   :  { %v6659_v19 = vpop.f32.mrb[66].mxu0 }
0x2013   :  { %v6735_v46 = vpop.f32.mrb[82].mxu1  ;;  %v11739_v23 = vpop.f32.mrb[67].mxu0 }
0x2014   :  { %6759 = vrot.lane.b32.xlu1 %v6659_v19, %s12633_s27  ;;  %6763 = vrot.lane.b32.xlu0 %v6735_v46, %s12634_s28  ;;  %v11744_v48 = vpop.f32.mrb[83].mxu1 }
0x2015   :  { %v6912_v48 = vld [vmem:[#allocation7 + $0x2d8] sm:$0xff] }
0x2079   :  { %v6741_v49 = vpop.permute.xlu1 %6740 }
0x207a   :  { %v6751_v52 = vsel %vm167_vm2, %v6203_v30, %v6741_v49  ;;  %v6909_v30 = vld [vmem:[#allocation7 + $0x2c0] sm:$0xff] }
0x207b   :  { %v12174_v31 = vpack.c.bf16 %v6909_v30, %v6908_v27  ;;  %v6913_v49 = vld [vmem:[#allocation7 + $0x2e0] sm:$0xff]  ;;  %v10852_v30 = vld [vmem:[#allocation7 + $0x2f0] ss:$0 sm:$0xff] }
0x207d   :  { %v6745_v51 = vpop.permute.xlu0 %6744 }
0x207e   :  { %v6752_v53 = vsel %vm1483_vm3, %v6751_v52, %v6745_v51  ;;  %v12182_v51 = vpack.c.bf16 %v6913_v49, %v6912_v48  ;;  %v10846_v52 = vld [vmem:[#allocation7 + $0x2a0] ss:$0 sm:$0xff] }
0x2081   :  { %v6749_v7 = vpop.permute.xlu0 %6748 }
0x2082   :  { %v6753_v5 = vsel %vm1485_vm4, %v6752_v53, %v6749_v7  ;;  %v6756_v9 = vpop.permute.xlu1 %6755 }
0x2083   :  { %11753 = vmatprep.mubr.msk.f32.mxu0 %vm69_vm0, %v6753_v5  ;;  %v6766_v8 = vsel %vm167_vm2, %v6507_v45, %v6756_v9 }
0x2086   :  { %v6760_v12 = vpop.permute.xlu1 %6759  ;;  %v6764_v11 = vpop.permute.xlu0 %6763 }
0x2087   :  { %v6767_v54 = vsel %vm1483_vm3, %v6766_v8, %v6760_v12 }
0x2088   :  { %v6768_v55 = vsel %vm1485_vm4, %v6767_v54, %v6764_v11  ;;  %v10849_v11 = vld [vmem:[#allocation7 + $0x2e8] ss:$0 sm:$0xff] }
0x2089   :  { %11754 = vmatmul.mubr.msk.f32.vlgmr.msra.gmra.mrb[68].mxu0 %vm69_vm0, %v6768_v55 }
0x208a   :  { %12173 = vmatpush3.bf16.msra.mxu0 %v12170_v29 }
0x208b   :  { %12175 = vmatprep.subr.bf16.mxu0 %v12174_v31 }
0x208e   :  { %12177 = vmatpush3.bf16.msra.mxu0 %v12174_v31 }
0x208f   :  { %12179 = vmatprep.subr.bf16.mxu0 %v12178_v34 }
0x2092   :  { %12181 = vmatpush3.bf16.msra.mxu0 %v12178_v34  ;;  %v10853_v34 = vld [vmem:[#allocation7 + $0x2f8] ss:$0 sm:$0xff] }
0x2093   :  { %12183 = vmatprep.subr.bf16.mxu0 %v12182_v51 }
0x2096   :  { %12185 = vmatpush3.bf16.msra.mxu0 %v12182_v51 }
0x2097   :  { %11807 = vmatprep.subr.mxu0 %v12626_v10 }
0x215c   :  { %v11755_v57 = vpop.f32.mrb[68].mxu0 }
0x215d   :  { %v6856_v58 = vadd.f32 %v11755_v57, %v10841_v56  ;;  %v6850_v47 = vpop.f32.mrb[69].mxu0 }
0x215e   :  { %v6851_v59 = vadd.f32 %v10841_v56, %v6850_v47 }
0x215f   :  { %v6860_v50 = vadd.f32 %v6856_v58, %v13323_v36 }
0x2160   :  { %v6859_v60 = vadd.f32 %v6851_v59, %v13321_v35  ;;  %v6901_v35 = vld [vmem:[#allocation7 + $0x280] sm:$0xff] }
0x2161   :  { %v6866_v61 = vsel %vm69_vm0, %v6860_v50, 0.0  ;;  %v12162_v17 = vpack.c.bf16 %v6902_v15, %v6901_v35  ;;  %v7132_v15 = vld [vmem:[#allocation7 + $0x318] sm:$0xff] }
0x2162   :  { %6867 = vadd.xlane.f32.xlu0 %v6866_v61  ;;  %v6863_v62 = vsel %vm69_vm0, %v6859_v60, 0.0 }
0x2163   :  { %6864 = vadd.xlane.f32.xlu1 %v6863_v62  ;;  %12163 = vmatprep.subr.bf16.mxu1 %v12162_v17 }
0x2164   :  { %12165 = vmatpush3.bf16.msra.mxu1 %v12162_v17 }
0x2165   :  { %12167 = vmatprep.subr.bf16.mxu1 %v12166_v22 }
0x2168   :  { %12169 = vmatpush3.bf16.msra.mxu1 %v12166_v22 }
0x21ef   :  { %v6868_v63 = vpop.xlane.xlu0 %6867 }
0x21f0   :  { %v6870_v0 = vmul.f32 0.03125, %v6868_v63  ;;  %v6865_v1 = vpop.xlane.xlu1 %6864 }
0x21f1   :  { %v6869_v2 = vmul.f32 0.03125, %v6865_v1 }
0x21f2   :  { %v6872_v3 = vsub.f32 %v6860_v50, %v6870_v0 }
0x21f3   :  { %v6871_v4 = vsub.f32 %v6859_v60, %v6869_v2 }
0x21f4   :  { %v6874_v6 = vmul.f32 %v6872_v3, %v6872_v3 }
0x21f5   :  { %v6873_v13 = vmul.f32 %v6871_v4, %v6871_v4 }
0x21f6   :  { %v6878_v14 = vsel %vm69_vm0, %v6874_v6, 0.0 }
0x21f7   :  { %6879 = vadd.xlane.f32.xlu1 %v6878_v14  ;;  %v6875_v36 = vsel %vm69_vm0, %v6873_v13, 0.0  ;;  %v7129_v13 = vld [vmem:[#allocation7 + $0x300] sm:$0xff]  ;;  %v7130_v14 = vld [vmem:[#allocation7 + $0x308] sm:$0xff] }
0x21f8   :  { %6876 = vadd.xlane.f32.xlu0 %v6875_v36  ;;  %v7131_v36 = vld [vmem:[#allocation7 + $0x310] sm:$0xff]  ;;  %v12186_v35 = vpack.c.bf16 %v7130_v14, %v7129_v13 }
0x21f9   :  { %v12190_v16 = vpack.c.bf16 %v7132_v15, %v7131_v36 }
0x21fa   :  { %12187 = vmatprep.subr.bf16.mxu1 %v12186_v35 }
0x2284   :  { %v6880_v37 = vpop.xlane.xlu1 %6879 }
0x2285   :  { %v6882_v38 = vmul.f32 0.03125, %v6880_v37  ;;  %v6877_v39 = vpop.xlane.xlu0 %6876 }
0x2286   :  { %v6881_v40 = vmul.f32 0.03125, %v6877_v39 }
0x2287   :  { %v6884_v41 = vadd.f32 1e-05, %v6882_v38 }
0x2288   :  { %v6883_v42 = vadd.f32 1e-05, %v6881_v40 }
0x2289   :  { %12441 = vrsqrt.f32 %v6884_v41  ;;  %v10854_v41 = vld [vmem:[#allocation7 + $0x320] ss:$0 sm:$0xff] }
0x228a   :  { %12443 = vrsqrt.f32 %v6883_v42 }
0x2293   :  { %v12442_v43 = vpop.eup %12441 }
0x2294   :  { %v12444_v24 = vpop.eup %12443  ;;  %v6888_v45 = vmul.f32 %v12442_v43, %v6872_v3 }
0x2295   :  { %v6887_v18 = vmul.f32 %v12444_v24, %v6871_v4 }
0x2296   :  { %v6894_v28 = vmul.f32 %v10844_v44, %v6888_v45 }
0x2297   :  { %v6893_v19 = vmul.f32 %v10844_v44, %v6887_v18 }
0x2298   :  { %v6900_v23 = vadd.f32 %v10845_v20, %v6894_v28 }
0x2299   :  { %v6899_v46 = vadd.f32 %v10845_v20, %v6893_v19 }
0x229b   :  { %11764 = vmatprep.mubr.msk.f32.mxu1 %vm69_vm0, %v6899_v46 }
0x229c   :  { %11765 = vmatmul.mubr.msk.f32.vlgmr.msra.gmra.mrb[84].mxu1 %vm69_vm0, %v6900_v23 }
0x229d   :  { %12189 = vmatpush3.bf16.msra.mxu1 %v12186_v35 }
0x229e   :  { %12191 = vmatprep.subr.bf16.mxu1 %v12190_v16 }
0x22a1   :  { %12193 = vmatpush3.bf16.msra.mxu1 %v12190_v16 }
0x22a2   :  { %11797 = vmatprep.subr.mxu1 %v12626_v10 }
0x236f   :  { %v11766_v53 = vpop.f32.mrb[84].mxu1 }
0x2370   :  { %v6997_v7 = vadd.f32 %v11766_v53, %v10846_v52  ;;  %v6991_v5 = vpop.f32.mrb[85].mxu1 }
0x2371   :  { %v6992_v9 = vadd.f32 %v10846_v52, %v6991_v5 }
0x2372   :  { %v7001_v12 = vmax.f32 %v6997_v7, 0.0 }
0x2373   :  { %v7000_v8 = vmax.f32 %v6992_v9, 0.0 }
0x2375   :  { %11783 = vmatprep.mubr.msk.f32.mxu0 %vm1740_vm5, %v7000_v8 }
0x2376   :  { %11784 = vmatmul.mubr.msk.f32.vlgmr.msra.gmra.mrb[70].mxu0 %vm1740_vm5, %v7001_v12 }
0x2377   :  { %11809 = vmatprep.mubr.msk.f32.mxu0 %vm12629_vm1, %v12626_v10 }
0x2449   :  { %v11785_v54 = vpop.f32.mrb[70].mxu0 }
0x244a   :  { %v7084_v55 = vadd.f32 %v11785_v54, %v10849_v11  ;;  %v7078_v56 = vpop.f32.mrb[71].mxu0 }
0x244b   :  { %v7079_v57 = vadd.f32 %v10849_v11, %v7078_v56 }
0x244c   :  { %v7088_v58 = vadd.f32 %v7084_v55, %v6900_v23 }
0x244d   :  { %v7087_v47 = vadd.f32 %v7079_v57, %v6899_v46 }
0x244e   :  { %v7094_v59 = vsel %vm69_vm0, %v7088_v58, 0.0 }
0x244f   :  { %7095 = vadd.xlane.f32.xlu1 %v7094_v59  ;;  %v7091_v50 = vsel %vm69_vm0, %v7087_v47, 0.0 }
0x2450   :  { %7092 = vadd.xlane.f32.xlu0 %v7091_v50 }
0x24dc   :  { %v7096_v60 = vpop.xlane.xlu1 %7095 }
0x24dd   :  { %v7098_v61 = vmul.f32 0.03125, %v7096_v60  ;;  %v7093_v62 = vpop.xlane.xlu0 %7092 }
0x24de   :  { %v7097_v63 = vmul.f32 0.03125, %v7093_v62 }
0x24df   :  { %v7100_v0 = vsub.f32 %v7088_v58, %v7098_v61 }
0x24e0   :  { %v7099_v1 = vsub.f32 %v7087_v47, %v7097_v63 }
0x24e1   :  { %v7102_v2 = vmul.f32 %v7100_v0, %v7100_v0 }
0x24e2   :  { %v7101_v3 = vmul.f32 %v7099_v1, %v7099_v1 }
0x24e3   :  { %v7106_v4 = vsel %vm69_vm0, %v7102_v2, 0.0 }
0x24e4   :  { %7107 = vadd.xlane.f32.xlu1 %v7106_v4  ;;  %v7103_v6 = vsel %vm69_vm0, %v7101_v3, 0.0 }
0x24e5   :  { %7104 = vadd.xlane.f32.xlu0 %v7103_v6 }
0x2571   :  { %v7108_v17 = vpop.xlane.xlu1 %7107 }
0x2572   :  { %v7110_v21 = vmul.f32 0.03125, %v7108_v17  ;;  %v7105_v22 = vpop.xlane.xlu0 %7104 }
0x2573   :  { %v7109_v25 = vmul.f32 0.03125, %v7105_v22 }
0x2574   :  { %v7112_v26 = vadd.f32 1e-05, %v7110_v21 }
0x2575   :  { %v7111_v27 = vadd.f32 1e-05, %v7109_v25 }
0x2576   :  { %12445 = vrsqrt.f32 %v7112_v26 }
0x2577   :  { %12447 = vrsqrt.f32 %v7111_v27 }
0x2580   :  { %v12446_v29 = vpop.eup %12445 }
0x2581   :  { %v12448_v31 = vpop.eup %12447  ;;  %v7116_v32 = vmul.f32 %v12446_v29, %v7100_v0 }
0x2582   :  { %v7115_v33 = vmul.f32 %v12448_v31, %v7099_v1 }
0x2583   :  { %v7122_v37 = vmul.f32 %v10852_v30, %v7116_v32 }
0x2584   :  { %v7121_v38 = vmul.f32 %v10852_v30, %v7115_v33 }
0x2585   :  { %v13517_v40 = vadd.f32 %v10853_v34, %v7122_v37 }
0x2586   :  { %v13515_v39 = vadd.f32 %v10853_v34, %v7121_v38 }
0x2588   :  { %11794 = vmatprep.mubr.msk.f32.mxu1 %vm69_vm0, %v13515_v39 }
0x2589   :  { %11795 = vmatmul.mubr.msk.f32.vlgmr.msra.gmra.mrb[86].mxu1 %vm69_vm0, %v13517_v40 }
0x258a   :  { %11799 = vmatprep.mubr.msk.f32.mxu1 %vm12629_vm1, %v12626_v10 }
0x265c   :  { %v11796_v42 = vpop.f32.mrb[86].mxu1 }
0x265d   :  { %v7210_v43 = vpop.f32.mrb[87].mxu1  ;;  %v13531_v24 = vadd.f32 %v11796_v42, %v10854_v41 }
0x265e   :  { %v13525_v44 = vadd.f32 %v10854_v41, %v7210_v43 }
0x2660   :  { %7222 = vrot.lane.b32.xlu1 %v13525_v44, %s12630_s22  ;;  %7220 = vrot.lane.b32.xlu0 %v13525_v44, %s12628_s21 }
0x2664   :  { %7224 = vrot.lane.b32.xlu1 %v13525_v44, %s12627_s2  ;;  %7227 = vrot.lane.b32.xlu0 %v13531_v24, %s12628_s21 }
0x2668   :  { %7229 = vrot.lane.b32.xlu1 %v13531_v24, %s12630_s22  ;;  %7231 = vrot.lane.b32.xlu0 %v13531_v24, %s12627_s2 }
0x266c   :  { %7233 = vrot.lane.b32.xlu1 %v13525_v44, %s12631_s23 }
0x26d2   :  { %v13543_v45 = vpop.permute.xlu1 %7222  ;;  %v13545_v18 = vpop.permute.xlu0 %7220 }
0x26d3   :  { %7385 = vrot.lane.b32.xlu1 %v13543_v45, %s12631_s23  ;;  %7309 = vrot.lane.b32.xlu0 %v13545_v18, %s12631_s23 }
0x26d6   :  { %v13551_v20 = vpop.permute.xlu1 %7224  ;;  %v13557_v28 = vpop.permute.xlu0 %7227 }
0x26d7   :  { %7537 = vrot.lane.b32.xlu1 %v13531_v24, %s12631_s23  ;;  %7461 = vrot.lane.b32.xlu0 %v13551_v20, %s12631_s23 }
0x26da   :  { %v13559_v19 = vpop.permute.xlu1 %7229  ;;  %v13565_v46 = vpop.permute.xlu0 %7231 }
0x26db   :  { %7689 = vrot.lane.b32.xlu1 %v13559_v19, %s12631_s23  ;;  %7613 = vrot.lane.b32.xlu0 %v13557_v28, %s12631_s23 }
0x26de   :  { %v7234_v23 = vpop.permute.xlu1 %7233 }
0x26df   :  { %11798 = vmatpush3.xpose.msk.msra.mxu1 %vm167_vm2, %v7234_v23  ;;  %7765 = vrot.lane.b32.xlu0 %v13565_v46, %s12631_s23 }
0x26e0   :  { %11802 = vmatprep.subr.mxu1 %v12626_v10 }
0x26e2   :  { %11800 = vmatmul.mubr.msk.f32.vlgmr.msra.gmra.mrb[88].mxu1 %vm167_vm2, %v13525_v44 }
0x26e3   :  { %11804 = vmatprep.mubr.msk.f32.mxu1 %vm12629_vm1, %v12626_v10 }
0x2745   :  { %v7386_v48 = vpop.permute.xlu1 %7385  ;;  %v7310_v49 = vpop.permute.xlu0 %7309 }
0x2746   :  { %11803 = vmatpush3.xpose.msk.msra.mxu1 %vm167_vm2, %v7310_v49  ;;  %11808 = vmatpush3.xpose.msk.msra.mxu0 %vm167_vm2, %v7386_v48 }
0x2747   :  { %11817 = vmatprep.subr.mxu0 %v12626_v10  ;;  %11812 = vmatprep.subr.mxu1 %v12626_v10 }
0x2749   :  { %11810 = vmatmul.mubr.msk.f32.vlgmr.msra.gmra.mrb[72].mxu0 %vm167_vm2, %v13543_v45  ;;  %v7538_v51 = vpop.permute.xlu1 %7537  ;;  %11805 = vmatmul.mubr.msk.f32.vlgmr.msra.gmra.mrb[90].mxu1 %vm167_vm2, %v13545_v18  ;;  %v7462_v52 = vpop.permute.xlu0 %7461 }
0x274a   :  { %11813 = vmatpush3.xpose.msk.msra.mxu1 %vm167_vm2, %v7462_v52  ;;  %11818 = vmatpush3.xpose.msk.msra.mxu0 %vm167_vm2, %v7538_v51 }
0x274b   :  { %11814 = vmatprep.mubr.msk.f32.mxu1 %vm12629_vm1, %v12626_v10  ;;  %11819 = vmatprep.mubr.msk.f32.mxu0 %vm12629_vm1, %v12626_v10 }
0x274c   :  { %11827 = vmatprep.subr.mxu0 %v12626_v10  ;;  %11822 = vmatprep.subr.mxu1 %v12626_v10 }
0x274d   :  { %11820 = vmatmul.mubr.msk.f32.vlgmr.msra.gmra.mrb[74].mxu0 %vm167_vm2, %v13531_v24  ;;  %v7690_v53 = vpop.permute.xlu1 %7689  ;;  %11815 = vmatmul.mubr.msk.f32.vlgmr.msra.gmra.mrb[92].mxu1 %vm167_vm2, %v13551_v20  ;;  %v7614_v7 = vpop.permute.xlu0 %7613 }
0x274e   :  { %11823 = vmatpush3.xpose.msk.msra.mxu1 %vm167_vm2, %v7614_v7  ;;  %11828 = vmatpush3.xpose.msk.msra.mxu0 %vm167_vm2, %v7690_v53 }
0x274f   :  { %11824 = vmatprep.mubr.msk.f32.mxu1 %vm12629_vm1, %v12626_v10  ;;  %11829 = vmatprep.mubr.msk.f32.mxu0 %vm12629_vm1, %v12626_v10 }
0x2750   :  { %11832 = vmatprep.subr.mxu1 %v12626_v10  ;;  %11837 = vmatprep.subr.mxu0 %v12626_v10 }
0x2751   :  { %11825 = vmatmul.mubr.msk.f32.vlgmr.msra.gmra.mrb[94].mxu1 %vm167_vm2, %v13557_v28  ;;  %11830 = vmatmul.mubr.msk.f32.vlgmr.msra.gmra.mrb[76].mxu0 %vm167_vm2, %v13559_v19  ;;  %v7766_v5 = vpop.permute.xlu0 %7765 }
0x2752   :  { %11833 = vmatpush3.xpose.msk.msra.mxu1 %vm167_vm2, %v7766_v5  ;;  %11834 = vmatprep.mubr.msk.f32.mxu1 %vm12629_vm1, %v12626_v10 }
0x2753   :  { %11842 = vmatprep.subr.mxu1 %v12626_v10  ;;  %11839 = vmatprep.mubr.msk.f32.mxu0 %vm12629_vm1, %v12626_v10 }
0x2755   :  { %11835 = vmatmul.mubr.msk.f32.vlgmr.msra.gmra.mrb[96].mxu1 %vm167_vm2, %v13565_v46 }
0x2756   :  { %11844 = vmatprep.mubr.msk.f32.mxu1 %vm12629_vm1, %v12626_v10 }
0x27b5   :  { %v7305_v9 = vpop.f32.mrb[88].mxu1 }
0x27b6   :  { %v11801_v8 = vpop.f32.mrb[89].mxu1  ;;  %v7841_v12 = vsel %vm167_vm2, %v7305_v9, -inf }
0x27b7   :  { %7842 = vmax.xlane.f32.xlu1 %v7841_v12 }
0x281c   :  { %v7381_v11 = vpop.f32.mrb[90].mxu1  ;;  %v7457_v54 = vpop.f32.mrb[72].mxu0 }
0x281d   :  { %v11806_v55 = vpop.f32.mrb[91].mxu1  ;;  %v11811_v56 = vpop.f32.mrb[73].mxu0  ;;  %v7844_v57 = vsel %vm167_vm2, %v7381_v11, -inf  ;;  %v7847_v60 = vsel %vm167_vm2, %v7457_v54, -inf }
0x281e   :  { %7845 = vmax.xlane.f32.xlu0 %v7844_v57 }
0x2820   :  { %v7533_v58 = vpop.f32.mrb[92].mxu1  ;;  %v7609_v47 = vpop.f32.mrb[74].mxu0 }
0x2821   :  { %v11816_v59 = vpop.f32.mrb[93].mxu1  ;;  %v11821_v50 = vpop.f32.mrb[75].mxu0  ;;  %v7850_v61 = vsel %vm167_vm2, %v7533_v58, -inf  ;;  %v7853_v2 = vsel %vm167_vm2, %v7609_v47, -inf }
0x2822   :  { %7848 = vmax.xlane.f32.xlu0 %v7847_v60  ;;  %7851 = vmax.xlane.f32.xlu1 %v7850_v61 }
0x2824   :  { %v7685_v62 = vpop.f32.mrb[94].mxu1  ;;  %v7761_v63 = vpop.f32.mrb[76].mxu0 }
0x2825   :  { %v11826_v0 = vpop.f32.mrb[95].mxu1  ;;  %v11831_v1 = vpop.f32.mrb[77].mxu0  ;;  %v7856_v3 = vsel %vm167_vm2, %v7685_v62, -inf  ;;  %v7859_v13 = vsel %vm167_vm2, %v7761_v63, -inf }
0x2826   :  { %7854 = vmax.xlane.f32.xlu0 %v7853_v2  ;;  %7857 = vmax.xlane.f32.xlu1 %v7856_v3 }
0x2828   :  { %v7837_v4 = vpop.f32.mrb[96].mxu1 }
0x2829   :  { %v11836_v6 = vpop.f32.mrb[97].mxu1  ;;  %v7862_v14 = vsel %vm167_vm2, %v7837_v4, -inf }
0x282a   :  { %7860 = vmax.xlane.f32.xlu0 %v7859_v13  ;;  %7863 = vmax.xlane.f32.xlu1 %v7862_v14 }
0x283b   :  { %8005 = vrot.lane.b32.xlu1 %v13545_v18, %s12632_s26 }
0x283f   :  { %8081 = vrot.lane.b32.xlu1 %v13543_v45, %s12632_s26 }
0x2840   :  { %7929 = vrot.lane.b32.xlu0 %v13525_v44, %s12632_s26 }
0x2843   :  { %8233 = vrot.lane.b32.xlu1 %v13531_v24, %s12632_s26 }
0x2844   :  { %8157 = vrot.lane.b32.xlu0 %v13551_v20, %s12632_s26  ;;  %v7843_v36 = vpop.xlane.xlu1 %7842 }
0x2845   :  { %v7865_v35 = vsub.f32 %v7305_v9, %v7843_v36 }
0x2847   :  { %v7873_v15 = vmul.f32 1.442695, %v7865_v35 }
0x2848   :  { %8309 = vrot.lane.b32.xlu0 %v13557_v28, %s12632_s26 }
0x2849   :  { %12449 = vpow2.f32 %v7873_v15 }
0x2853   :  { %v13637_v16 = vpop.eup %12449 }
0x2854   :  { %v7889_v17 = vsel %vm167_vm2, %v13637_v16, 0.0 }
0x2867   :  { %7890 = vadd.xlane.f32.xlu0 %v7889_v17 }
0x28ab   :  { %v7846_v21 = vpop.xlane.xlu0 %7845 }
0x28ac   :  { %v7866_v22 = vsub.f32 %v7381_v11, %v7846_v21 }
0x28ae   :  { %v7875_v25 = vmul.f32 1.442695, %v7866_v22 }
0x28af   :  { %v7852_v26 = vpop.xlane.xlu1 %7851  ;;  %v7849_v27 = vpop.xlane.xlu0 %7848 }
0x28b0   :  { %12451 = vpow2.f32 %v7875_v25  ;;  %v7868_v29 = vsub.f32 %v7533_v58, %v7852_v26  ;;  %v7867_v30 = vsub.f32 %v7457_v54, %v7849_v27 }
0x28b2   :  { %v7879_v31 = vmul.f32 1.442695, %v7868_v29  ;;  %v7877_v32 = vmul.f32 1.442695, %v7867_v30 }
0x28b3   :  { %v7858_v33 = vpop.xlane.xlu1 %7857  ;;  %v7855_v34 = vpop.xlane.xlu0 %7854 }
0x28b4   :  { %12453 = vpow2.f32 %v7879_v31  ;;  %v7870_v37 = vsub.f32 %v7685_v62, %v7858_v33  ;;  %v7869_v38 = vsub.f32 %v7609_v47, %v7855_v34  ;;  %v8568_v33 = vld [vmem:[#allocation7 + $0x330] sm:$0xff] }
0x28b5   :  { %12455 = vpow2.f32 %v7877_v32  ;;  %v8567_v32 = vld [vmem:[#allocation7 + $0x328] sm:$0xff] }
0x28b6   :  { %v7883_v41 = vmul.f32 1.442695, %v7870_v37  ;;  %v7881_v42 = vmul.f32 1.442695, %v7869_v38  ;;  %v12194_v34 = vpack.c.bf16 %v8568_v33, %v8567_v32  ;;  %v8569_v37 = vld [vmem:[#allocation7 + $0x338] sm:$0xff]  ;;  %v8570_v38 = vld [vmem:[#allocation7 + $0x340] sm:$0xff] }
0x28b7   :  { %v7864_v43 = vpop.xlane.xlu1 %7863  ;;  %v7861_v44 = vpop.xlane.xlu0 %7860 }
0x28b8   :  { %12457 = vpow2.f32 %v7883_v41  ;;  %v7872_v24 = vsub.f32 %v7837_v4, %v7864_v43  ;;  %v7871_v45 = vsub.f32 %v7761_v63, %v7861_v44  ;;  %v12198_v41 = vpack.c.bf16 %v8570_v38, %v8569_v37 }
0x28b9   :  { %12459 = vpow2.f32 %v7881_v42 }
0x28ba   :  { %v12452_v18 = vpop.eup %12451  ;;  %v7887_v20 = vmul.f32 1.442695, %v7872_v24  ;;  %v7885_v28 = vmul.f32 1.442695, %v7871_v45 }
0x28bb   :  { %v8006_v23 = vpop.permute.xlu1 %8005  ;;  %v7930_v48 = vpop.permute.xlu0 %7929  ;;  %v7892_v49 = vsel %vm167_vm2, %v12452_v18, 0.0 }
0x28bc   :  { %12461 = vpow2.f32 %v7887_v20  ;;  %11843 = vmatpush3.msra.mxu1 %v8006_v23  ;;  %7893 = vadd.xlane.f32.xlu1 %v7892_v49 }
0x28bd   :  { %12463 = vpow2.f32 %v7885_v28  ;;  %11838 = vmatpush3.msra.mxu0 %v7930_v48  ;;  %11852 = vmatprep.subr.mxu1 %v12626_v10 }
0x28be   :  { %v12454_v51 = vpop.eup %12453  ;;  %11847 = vmatprep.subr.mxu0 %v12626_v10 }
0x28bf   :  { %v12456_v52 = vpop.eup %12455  ;;  %v7898_v53 = vsel %vm167_vm2, %v12454_v51, 0.0  ;;  %v8158_v57 = vpop.permute.xlu0 %8157 }
0x28c0   :  { %7899 = vadd.xlane.f32.xlu1 %v7898_v53  ;;  %v7895_v7 = vsel %vm167_vm2, %v12456_v52, 0.0  ;;  %v8082_v60 = vpop.permute.xlu1 %8081 }
0x28c1   :  { %7896 = vadd.xlane.f32.xlu0 %v7895_v7 }
0x28c2   :  { %v12458_v5 = vpop.eup %12457 }
0x28c3   :  { %v12460_v9 = vpop.eup %12459  ;;  %v7904_v8 = vsel %vm167_vm2, %v12458_v5, 0.0  ;;  %v8310_v58 = vpop.permute.xlu0 %8309 }
0x28c4   :  { %7905 = vadd.xlane.f32.xlu1 %v7904_v8  ;;  %v7901_v12 = vsel %vm167_vm2, %v12460_v9, 0.0 }
0x28c5   :  { %7902 = vadd.xlane.f32.xlu0 %v7901_v12 }
0x28c6   :  { %v13648_v11 = vpop.eup %12461 }
0x28c7   :  { %v13650_v54 = vpop.eup %12463  ;;  %v7910_v55 = vsel %vm167_vm2, %v13648_v11, 0.0 }
0x28c8   :  { %7911 = vadd.xlane.f32.xlu1 %v7910_v55  ;;  %v7907_v56 = vsel %vm167_vm2, %v13650_v54, 0.0 }
0x28c9   :  { %7908 = vadd.xlane.f32.xlu0 %v7907_v56 }
0x28d9   :  { %8385 = vrot.lane.b32.xlu1 %v13559_v19, %s12632_s26  ;;  %v8234_v19 = vpop.permute.xlu1 %8233 }
0x28df   :  { %8461 = vrot.lane.b32.xlu0 %v13565_v46, %s12632_s26 }
0x28f4   :  { %v7891_v47 = vpop.xlane.xlu0 %7890 }
0x28f5   :  { %12465 = vrcp.f32 %v7891_v47 }
0x28ff   :  { %v12466_v59 = vpop.eup %12465 }
0x2900   :  { %v7914_v50 = vmul.f32 %v12466_v59, %v13637_v16  ;;  %v12525_v59 = vld [vmem:[#allocation5] sm:$0xff] }
0x2902   :  { %11840 = vmatmul.mubr.msk.f32.vlgmr.msra.gmra.mrb[78].mxu0 %vm167_vm2, %v7914_v50  ;;  %v10881_v50 = vld [vmem:[#allocation7 + $0x348] ss:$0 sm:$0xff] }
0x2903   :  { %11848 = vmatpush3.msra.mxu0 %v8082_v60  ;;  %11849 = vmatprep.mubr.msk.f32.mxu0 %vm12629_vm1, %v12626_v10 }
0x2904   :  { %11857 = vmatprep.subr.mxu0 %v12626_v10 }
0x2949   :  { %v7894_v61 = vpop.xlane.xlu1 %7893 }
0x294a   :  { %12467 = vrcp.f32 %v7894_v61 }
0x294d   :  { %v7900_v46 = vpop.xlane.xlu1 %7899 }
0x294e   :  { %12469 = vrcp.f32 %v7900_v46  ;;  %v7897_v62 = vpop.xlane.xlu0 %7896 }
0x294f   :  { %12471 = vrcp.f32 %v7897_v62 }
0x2951   :  { %v7906_v63 = vpop.xlane.xlu1 %7905 }
0x2952   :  { %12473 = vrcp.f32 %v7906_v63  ;;  %v7903_v0 = vpop.xlane.xlu0 %7902 }
0x2953   :  { %12475 = vrcp.f32 %v7903_v0 }
0x2954   :  { %v12468_v1 = vpop.eup %12467 }
0x2955   :  { %v7916_v2 = vmul.f32 %v12468_v1, %v12452_v18  ;;  %v7912_v3 = vpop.xlane.xlu1 %7911 }
0x2956   :  { %12477 = vrcp.f32 %v7912_v3  ;;  %v7909_v4 = vpop.xlane.xlu0 %7908 }
0x2957   :  { %12479 = vrcp.f32 %v7909_v4  ;;  %11845 = vmatmul.mubr.msk.f32.vlgmr.msra.gmra.mrb[98].mxu1 %vm167_vm2, %v7916_v2 }
0x2958   :  { %v12470_v6 = vpop.eup %12469  ;;  %11853 = vmatpush3.msra.mxu1 %v8158_v57  ;;  %11854 = vmatprep.mubr.msk.f32.mxu1 %vm12629_vm1, %v12626_v10 }
0x2959   :  { %v12472_v13 = vpop.eup %12471  ;;  %v7920_v14 = vmul.f32 %v12470_v6, %v12454_v51  ;;  %11862 = vmatprep.subr.mxu1 %v12626_v10  ;;  %v8386_v25 = vpop.permute.xlu1 %8385 }
0x295a   :  { %v7918_v36 = vmul.f32 %v12472_v13, %v12456_v52  ;;  %v8462_v21 = vpop.permute.xlu0 %8461 }
0x295b   :  { %11855 = vmatmul.mubr.msk.f32.vlgmr.msra.gmra.mrb[100].mxu1 %vm167_vm2, %v7920_v14 }
0x295c   :  { %v12474_v35 = vpop.eup %12473  ;;  %11850 = vmatmul.mubr.msk.f32.vlgmr.msra.gmra.mrb[80].mxu0 %vm167_vm2, %v7918_v36  ;;  %11863 = vmatpush3.msra.mxu1 %v8310_v58 }
0x295d   :  { %v12476_v15 = vpop.eup %12475  ;;  %v7924_v16 = vmul.f32 %v12474_v35, %v12458_v5  ;;  %11858 = vmatpush3.msra.mxu0 %v8234_v19  ;;  %11859 = vmatprep.mubr.msk.f32.mxu0 %vm12629_vm1, %v12626_v10 }
0x295e   :  { %v7922_v17 = vmul.f32 %v12476_v15, %v12460_v9  ;;  %11864 = vmatprep.mubr.msk.f32.mxu1 %vm12629_vm1, %v12626_v10  ;;  %11867 = vmatprep.subr.mxu0 %v12626_v10 }
0x295f   :  { %11872 = vmatprep.subr.mxu1 %v12626_v10  ;;  %11865 = vmatmul.mubr.msk.f32.vlgmr.msra.gmra.mrb[102].mxu1 %vm167_vm2, %v7924_v16  ;;  %v8702_v16 = vld [vmem:[#allocation7 + $0x378] sm:$0xff] }
0x2960   :  { %v12478_v22 = vpop.eup %12477  ;;  %11860 = vmatmul.mubr.msk.f32.vlgmr.msra.gmra.mrb[82].mxu0 %vm167_vm2, %v7922_v17  ;;  %11873 = vmatpush3.msra.mxu1 %v8462_v21  ;;  %v8699_v21 = vld [vmem:[#allocation7 + $0x360] sm:$0xff] }
0x2961   :  { %v12480_v26 = vpop.eup %12479  ;;  %v7928_v27 = vmul.f32 %v12478_v22, %v13648_v11  ;;  %11868 = vmatpush3.msra.mxu0 %v8386_v25  ;;  %11869 = vmatprep.mubr.msk.f32.mxu0 %vm12629_vm1, %v12626_v10  ;;  %v8700_v22 = vld [vmem:[#allocation7 + $0x368] sm:$0xff] }
0x2962   :  { %v7926_v29 = vmul.f32 %v12480_v26, %v13650_v54  ;;  %11874 = vmatprep.mubr.msk.f32.mxu1 %vm12629_vm1, %v12626_v10  ;;  %12195 = vmatprep.subr.bf16.mxu0 %v12194_v34  ;;  %v12283_v25 = vpack.i.bf16 %v8700_v22, %v8699_v21  ;;  %v12202_v26 = vpack.c.bf16 %v8700_v22, %v8699_v21 }
0x2963   :  { %11875 = vmatmul.mubr.msk.f32.vlgmr.msra.gmra.mrb[104].mxu1 %vm167_vm2, %v7928_v27 }
0x2964   :  { %11870 = vmatmul.mubr.msk.f32.vlgmr.msra.gmra.mrb[84].mxu0 %vm167_vm2, %v7926_v29  ;;  %12203 = vmatprep.subr.bf16.mxu1 %v12202_v26  ;;  %v10886_v29 = vld [vmem:[#allocation7 + $0x380] ss:$0 sm:$0xff] }
0x2965   :  { %12197 = vmatpush3.bf16.msra.mxu0 %v12194_v34  ;;  %12205 = vmatpush3.bf16.msra.mxu1 %v12202_v26 }
0x2966   :  { %12199 = vmatprep.subr.bf16.mxu0 %v12198_v41 }
0x2969   :  { %12201 = vmatpush3.bf16.msra.mxu0 %v12198_v41 }
0x29d5   :  { %v8001_v30 = vpop.f32.mrb[78].mxu0 }
0x29d6   :  { %v11841_v31 = vpop.f32.mrb[79].mxu0 }
0x2a2a   :  { %v8077_v42 = vpop.f32.mrb[98].mxu1 }
0x2a2b   :  { %8538 = vrot.lane.b32.xlu1 %v8077_v42, %s12624_s25  ;;  %v11846_v43 = vpop.f32.mrb[99].mxu1 }
0x2a2e   :  { %v8229_v44 = vpop.f32.mrb[100].mxu1 }
0x2a2f   :  { %v8153_v24 = vpop.f32.mrb[80].mxu0  ;;  %v11856_v45 = vpop.f32.mrb[101].mxu1 }
0x2a30   :  { %8542 = vrot.lane.b32.xlu0 %v8153_v24, %s12633_s27  ;;  %v11851_v18 = vpop.f32.mrb[81].mxu0 }
0x2a32   :  { %v8381_v20 = vpop.f32.mrb[102].mxu1 }
0x2a33   :  { %v8305_v28 = vpop.f32.mrb[82].mxu0  ;;  %8553 = vrot.lane.b32.xlu1 %v8381_v20, %s12624_s25  ;;  %v11866_v23 = vpop.f32.mrb[103].mxu1 }
0x2a34   :  { %8546 = vrot.lane.b32.xlu0 %v8229_v44, %s12634_s28  ;;  %v11861_v48 = vpop.f32.mrb[83].mxu0 }
0x2a36   :  { %v8533_v49 = vpop.f32.mrb[104].mxu1 }
0x2a37   :  { %v8457_v51 = vpop.f32.mrb[84].mxu0  ;;  %v11876_v52 = vpop.f32.mrb[105].mxu1 }
0x2a38   :  { %8557 = vrot.lane.b32.xlu1 %v8457_v51, %s12633_s27  ;;  %v11871_v53 = vpop.f32.mrb[85].mxu0  ;;  %8561 = vrot.lane.b32.xlu0 %v8533_v49, %s12634_s28  ;;  %v12526_v51 = vld [vmem:[#allocation5 + $0x8] sm:$0xff] }
0x2a39   :  { %v10885_v52 = vld [vmem:[#allocation7 + $0x358] ss:$0 sm:$0xff] }
0x2a9d   :  { %v8539_v7 = vpop.permute.xlu1 %8538 }
0x2a9e   :  { %v8549_v9 = vsel %vm167_vm2, %v8001_v30, %v8539_v7 }
0x2aa2   :  { %v8543_v5 = vpop.permute.xlu0 %8542 }
0x2aa3   :  { %v8550_v12 = vsel %vm1483_vm3, %v8549_v9, %v8543_v5 }
0x2aa5   :  { %v8554_v8 = vpop.permute.xlu1 %8553 }
0x2aa6   :  { %v8547_v11 = vpop.permute.xlu0 %8546  ;;  %v8564_v55 = vsel %vm167_vm2, %v8305_v28, %v8554_v8  ;;  %v10884_v28 = vld [vmem:[#allocation7 + $0x350] ss:$0 sm:$0xff] }
0x2aa7   :  { %v8551_v54 = vsel %vm1485_vm4, %v8550_v12, %v8547_v11 }
0x2aa8   :  { %11885 = vmatprep.mubr.msk.f32.mxu0 %vm69_vm0, %v8551_v54 }
0x2aaa   :  { %v8558_v56 = vpop.permute.xlu1 %8557  ;;  %v8562_v57 = vpop.permute.xlu0 %8561 }
0x2aab   :  { %v8565_v58 = vsel %vm1483_vm3, %v8564_v55, %v8558_v56 }
0x2aac   :  { %v8566_v47 = vsel %vm1485_vm4, %v8565_v58, %v8562_v57 }
0x2aad   :  { %11886 = vmatmul.mubr.msk.f32.vlgmr.msra.gmra.mrb[86].mxu0 %vm69_vm0, %v8566_v47 }
0x2aae   :  { %11907 = vmatprep.mubr.msk.f32.mxu0 %vm69_vm0, %v12525_v59 }
0x2b80   :  { %v11887_v60 = vpop.f32.mrb[86].mxu0 }
0x2b81   :  { %v8654_v19 = vadd.f32 %v11887_v60, %v10881_v50  ;;  %v8648_v61 = vpop.f32.mrb[87].mxu0 }
0x2b82   :  { %v8649_v46 = vadd.f32 %v10881_v50, %v8648_v61 }
0x2b83   :  { %v8658_v62 = vadd.f32 %v8654_v19, %v13517_v40 }
0x2b84   :  { %v8657_v63 = vadd.f32 %v8649_v46, %v13515_v39  ;;  %v8701_v39 = vld [vmem:[#allocation7 + $0x370] sm:$0xff] }
0x2b85   :  { %v8664_v0 = vsel %vm69_vm0, %v8658_v62, 0.0  ;;  %v12288_v17 = vpack.i.bf16 %v8702_v16, %v8701_v39  ;;  %v12206_v27 = vpack.c.bf16 %v8702_v16, %v8701_v39 }
0x2b86   :  { %8665 = vadd.xlane.f32.xlu0 %v8664_v0  ;;  %v8661_v1 = vsel %vm69_vm0, %v8657_v63, 0.0 }
0x2b87   :  { %8662 = vadd.xlane.f32.xlu1 %v8661_v1  ;;  %12207 = vmatprep.subr.bf16.mxu1 %v12206_v27 }
0x2b88   :  { %12209 = vmatpush3.bf16.msra.mxu1 %v12206_v27 }
0x2b89   :  { %11910 = vmatprep.subr.mxu1 %v12626_v10 }
0x2c13   :  { %v8666_v2 = vpop.xlane.xlu0 %8665 }
0x2c14   :  { %v8668_v3 = vmul.f32 0.03125, %v8666_v2  ;;  %v8663_v4 = vpop.xlane.xlu1 %8662 }
0x2c15   :  { %v8667_v6 = vmul.f32 0.03125, %v8663_v4 }
0x2c16   :  { %v8670_v13 = vsub.f32 %v8658_v62, %v8668_v3 }
0x2c17   :  { %v8669_v14 = vsub.f32 %v8657_v63, %v8667_v6 }
0x2c18   :  { %v8672_v36 = vmul.f32 %v8670_v13, %v8670_v13 }
0x2c19   :  { %v8671_v35 = vmul.f32 %v8669_v14, %v8669_v14 }
0x2c1a   :  { %v8676_v15 = vsel %vm69_vm0, %v8672_v36, 0.0 }
0x2c1b   :  { %8677 = vadd.xlane.f32.xlu1 %v8676_v15  ;;  %v8673_v40 = vsel %vm69_vm0, %v8671_v35, 0.0 }
0x2c1c   :  { %8674 = vadd.xlane.f32.xlu0 %v8673_v40 }
0x2c2c   :  { %12289 = vrot.lane.b32.xlu1 %v12288_v17, %s12631_s23 }
0x2c30   :  { %8806 = vrot.lane.b32.xlu1 %v10886_v29, %s12631_s23 }
0x2c32   :  { %12284 = vrot.lane.b32.xlu0 %v12283_v25, %s12631_s23 }
0x2ca8   :  { %v8678_v30 = vpop.xlane.xlu1 %8677 }
0x2ca9   :  { %v8680_v31 = vmul.f32 0.03125, %v8678_v30  ;;  %v8675_v32 = vpop.xlane.xlu0 %8674 }
0x2caa   :  { %v8679_v33 = vmul.f32 0.03125, %v8675_v32 }
0x2cab   :  { %v8682_v34 = vadd.f32 1e-05, %v8680_v31 }
0x2cac   :  { %v8681_v37 = vadd.f32 1e-05, %v8679_v33  ;;  %v12290_v38 = vpop.permute.xlu1 %12289 }
0x2cad   :  { %12481 = vrsqrt.f32 %v8682_v34  ;;  %v12285_v41 = vpop.permute.xlu0 %12284  ;;  %v12292_v42 = vunpack.i.h.bf16 %v12290_v38  ;;  %v12291_v43 = vunpack.i.l.bf16 %v12290_v38 }
0x2cae   :  { %12483 = vrsqrt.f32 %v8681_v37  ;;  %v12287_v44 = vunpack.i.h.bf16 %v12285_v41  ;;  %v12286_v24 = vunpack.i.l.bf16 %v12285_v41 }
0x2caf   :  { %v12214_v18 = vpack.c.bf16 %v12292_v42, %v12291_v43 }
0x2cb0   :  { %v12210_v45 = vpack.c.bf16 %v12287_v44, %v12286_v24  ;;  %v8807_v8 = vpop.permute.xlu1 %8806 }
0x2cb2   :  { %12211 = vmatprep.subr.bf16.mxu0 %v12210_v45 }
0x2cb3   :  { %12213 = vmatpush3.bf16.msra.mxu0 %v12210_v45 }
0x2cb4   :  { %12215 = vmatprep.subr.bf16.mxu0 %v12214_v18 }
0x2cb7   :  { %v12482_v20 = vpop.eup %12481  ;;  %12217 = vmatpush3.bf16.msra.mxu0 %v12214_v18 }
0x2cb8   :  { %v12484_v23 = vpop.eup %12483  ;;  %v8686_v48 = vmul.f32 %v12482_v20, %v8670_v13  ;;  %11920 = vmatprep.subr.mxu0 %v12626_v10 }
0x2cb9   :  { %v8685_v49 = vmul.f32 %v12484_v23, %v8669_v14 }
0x2cba   :  { %11908 = vmatmul.mubr.msk.f32.vlgmr.msra.gmra.mrb[88].mxu0 %vm69_vm0, %v12526_v51  ;;  %v8692_v53 = vmul.f32 %v10884_v28, %v8686_v48 }
0x2cbb   :  { %v8691_v7 = vmul.f32 %v10884_v28, %v8685_v49  ;;  %11922 = vmatprep.mubr.msk.f32.mxu0 %vm12629_vm1, %v12626_v10 }
0x2cbc   :  { %v13718_v9 = vadd.f32 %v10885_v52, %v8692_v53 }
0x2cbd   :  { %v13716_v5 = vadd.f32 %v10885_v52, %v8691_v7 }
0x2cbf   :  { %11896 = vmatprep.mubr.msk.f32.mxu1 %vm69_vm0, %v13716_v5 }
0x2cc0   :  { %11897 = vmatmul.mubr.msk.f32.vlgmr.msra.gmra.mrb[106].mxu1 %vm69_vm0, %v13718_v9 }
0x2cc1   :  { %11912 = vmatprep.mubr.msk.f32.mxu1 %vm12629_vm1, %v12626_v10 }
0x2d8d   :  { %v11909_v12 = vpop.f32.mrb[88].mxu0 }
0x2d8e   :  { %v8875_v11 = vpop.f32.mrb[89].mxu0  ;;  %v13738_v47 = vadd.f32 %v11909_v12, %v8807_v8 }
0x2d8f   :  { %v13726_v54 = vadd.f32 %v8875_v11, %v8807_v8 }
0x2d91   :  { %8903 = vrot.lane.b32.xlu1 %v13726_v54, %s12627_s2  ;;  %8899 = vrot.lane.b32.xlu0 %v13726_v54, %s12628_s21 }
0x2d92   :  { %11911 = vmatpush3.xpose.msk.msra.mxu1 %vm167_vm2, %v13726_v54 }
0x2d93   :  { %v11898_v55 = vpop.f32.mrb[106].mxu1  ;;  %11915 = vmatprep.subr.mxu1 %v12626_v10 }
0x2d94   :  { %v8786_v56 = vadd.f32 %v11898_v55, %v10886_v29  ;;  %v8780_v57 = vpop.f32.mrb[107].mxu1 }
0x2d95   :  { %v8781_v58 = vadd.f32 %v10886_v29, %v8780_v57  ;;  %8901 = vrot.lane.b32.xlu0 %v13726_v54, %s12630_s22 }
0x2d96   :  { %8892 = vrot.lane.b32.xlu1 %v8786_v56, %s12628_s21 }
0x2d97   :  { %11913 = vmatmul.mubr.msk.f32.vlgmr.msra.gmra.mrb[108].mxu1 %vm167_vm2, %v8781_v58 }
0x2d98   :  { %11917 = vmatprep.mubr.msk.f32.mxu1 %vm12629_vm1, %v12626_v10 }
0x2d99   :  { %8906 = vrot.lane.b32.xlu0 %v13738_v47, %s12628_s21 }
0x2d9a   :  { %8885 = vrot.lane.b32.xlu1 %v8781_v58, %s12628_s21 }
0x2d9d   :  { %8887 = vrot.lane.b32.xlu0 %v8781_v58, %s12630_s22 }
0x2d9e   :  { %8889 = vrot.lane.b32.xlu1 %v8781_v58, %s12627_s2 }
0x2da1   :  { %8908 = vrot.lane.b32.xlu0 %v13738_v47, %s12630_s22 }
0x2da2   :  { %8910 = vrot.lane.b32.xlu1 %v13738_v47, %s12627_s2 }
0x2da5   :  { %8894 = vrot.lane.b32.xlu0 %v8786_v56, %s12630_s22 }
0x2da6   :  { %8896 = vrot.lane.b32.xlu1 %v8786_v56, %s12627_s2 }
0x2e03   :  { %v13754_v59 = vpop.permute.xlu1 %8903  ;;  %v13756_v50 = vpop.permute.xlu0 %8899 }
0x2e04   :  { %11916 = vmatpush3.xpose.msk.msra.mxu1 %vm167_vm2, %v13756_v50 }
0x2e05   :  { %11925 = vmatprep.subr.mxu1 %v12626_v10 }
0x2e07   :  { %v13761_v60 = vpop.permute.xlu0 %8901 }
0x2e08   :  { %v8893_v19 = vpop.permute.xlu1 %8892  ;;  %11921 = vmatpush3.xpose.msk.msra.mxu0 %vm167_vm2, %v13761_v60 }
0x2e09   :  { %11930 = vmatprep.subr.mxu0 %v12626_v10 }
0x2e0b   :  { %v13766_v61 = vpop.permute.xlu0 %8906 }
0x2e0c   :  { %v8886_v46 = vpop.permute.xlu1 %8885 }
0x2e0d   :  { %11918 = vmatmul.mubr.msk.f32.vlgmr.msra.gmra.mrb[110].mxu1 %vm167_vm2, %v8886_v46 }
0x2e0e   :  { %11926 = vmatpush3.xpose.msk.msra.mxu1 %vm167_vm2, %v13754_v59  ;;  %11927 = vmatprep.mubr.msk.f32.mxu1 %vm12629_vm1, %v12626_v10 }
0x2e0f   :  { %v8888_v62 = vpop.permute.xlu0 %8887  ;;  %11935 = vmatprep.subr.mxu1 %v12626_v10 }
0x2e10   :  { %v8890_v63 = vpop.permute.xlu1 %8889  ;;  %11923 = vmatmul.mubr.msk.f32.vlgmr.msra.gmra.mrb[90].mxu0 %vm167_vm2, %v8888_v62 }
0x2e11   :  { %11931 = vmatpush3.xpose.msk.msra.mxu0 %vm167_vm2, %v13738_v47  ;;  %11928 = vmatmul.mubr.msk.f32.vlgmr.msra.gmra.mrb[112].mxu1 %vm167_vm2, %v8890_v63 }
0x2e12   :  { %11936 = vmatpush3.xpose.msk.msra.mxu1 %vm167_vm2, %v13766_v61  ;;  %11932 = vmatprep.mubr.msk.f32.mxu0 %vm12629_vm1, %v12626_v10 }
0x2e13   :  { %11940 = vmatprep.subr.mxu0 %v12626_v10  ;;  %v13783_v0 = vpop.permute.xlu0 %8908  ;;  %11937 = vmatprep.mubr.msk.f32.mxu1 %vm12629_vm1, %v12626_v10 }
0x2e14   :  { %v13787_v1 = vpop.permute.xlu1 %8910  ;;  %11933 = vmatmul.mubr.msk.f32.vlgmr.msra.gmra.mrb[92].mxu0 %vm167_vm2, %v8786_v56  ;;  %11945 = vmatprep.subr.mxu1 %v12626_v10 }
0x2e15   :  { %11941 = vmatpush3.xpose.msk.msra.mxu0 %vm167_vm2, %v13783_v0  ;;  %11938 = vmatmul.mubr.msk.f32.vlgmr.msra.gmra.mrb[114].mxu1 %vm167_vm2, %v8893_v19 }
0x2e16   :  { %11946 = vmatpush3.xpose.msk.msra.mxu1 %vm167_vm2, %v13787_v1  ;;  %11942 = vmatprep.mubr.msk.f32.mxu0 %vm12629_vm1, %v12626_v10 }
0x2e17   :  { %v8895_v2 = vpop.permute.xlu0 %8894  ;;  %11947 = vmatprep.mubr.msk.f32.mxu1 %vm12629_vm1, %v12626_v10  ;;  %11950 = vmatprep.subr.mxu0 %v12626_v10 }
0x2e18   :  { %v8897_v3 = vpop.permute.xlu1 %8896  ;;  %11943 = vmatmul.mubr.msk.f32.vlgmr.msra.gmra.mrb[94].mxu0 %vm167_vm2, %v8895_v2  ;;  %11955 = vmatprep.subr.mxu1 %v12626_v10 }
0x2e19   :  { %11948 = vmatmul.mubr.msk.f32.vlgmr.msra.gmra.mrb[116].mxu1 %vm167_vm2, %v8897_v3  ;;  %11952 = vmatprep.mubr.msk.f32.mxu0 %vm12629_vm1, %v12626_v10 }
0x2e1a   :  { %11957 = vmatprep.mubr.msk.f32.mxu1 %vm12629_vm1, %v12626_v10 }
0x2e6a   :  { %v8982_v4 = vpop.f32.mrb[108].mxu1 }
0x2e6b   :  { %v11914_v6 = vpop.f32.mrb[109].mxu1  ;;  %v9504_v13 = vsel %vm167_vm2, %v8982_v4, -inf }
0x2e6c   :  { %9505 = vmax.xlane.f32.xlu0 %v9504_v13 }
0x2ee0   :  { %v9056_v14 = vpop.f32.mrb[110].mxu1 }
0x2ee1   :  { %v11919_v36 = vpop.f32.mrb[111].mxu1  ;;  %v9507_v35 = vsel %vm167_vm2, %v9056_v14, -inf }
0x2ee2   :  { %9508 = vmax.xlane.f32.xlu1 %v9507_v35 }
0x2ee3   :  { %v9130_v15 = vpop.f32.mrb[90].mxu0 }
0x2ee4   :  { %v11924_v40 = vpop.f32.mrb[91].mxu0  ;;  %v9204_v39 = vpop.f32.mrb[112].mxu1  ;;  %v9510_v16 = vsel %vm167_vm2, %v9130_v15, -inf }
0x2ee5   :  { %9511 = vmax.xlane.f32.xlu0 %v9510_v16  ;;  %v11929_v17 = vpop.f32.mrb[113].mxu1  ;;  %v9513_v27 = vsel %vm167_vm2, %v9204_v39, -inf }
0x2ee7   :  { %v9278_v21 = vpop.f32.mrb[92].mxu0 }
0x2ee8   :  { %v11934_v22 = vpop.f32.mrb[93].mxu0  ;;  %v9352_v25 = vpop.f32.mrb[114].mxu1  ;;  %v9516_v26 = vsel %vm167_vm2, %v9278_v21, -inf }
0x2ee9   :  { %9517 = vmax.xlane.f32.xlu1 %v9516_v26  ;;  %9514 = vmax.xlane.f32.xlu0 %v9513_v27  ;;  %v11939_v29 = vpop.f32.mrb[115].mxu1  ;;  %v9519_v34 = vsel %vm167_vm2, %v9352_v25, -inf }
0x2eeb   :  { %v9426_v30 = vpop.f32.mrb[94].mxu0 }
0x2eec   :  { %v11944_v31 = vpop.f32.mrb[95].mxu0  ;;  %v9500_v32 = vpop.f32.mrb[116].mxu1  ;;  %v9522_v33 = vsel %vm167_vm2, %v9426_v30, -inf }
0x2eed   :  { %9523 = vmax.xlane.f32.xlu1 %v9522_v33  ;;  %9520 = vmax.xlane.f32.xlu0 %v9519_v34  ;;  %v11949_v37 = vpop.f32.mrb[117].mxu1  ;;  %v9525_v38 = vsel %vm167_vm2, %v9500_v32, -inf }
0x2ef1   :  { %9526 = vmax.xlane.f32.xlu0 %v9525_v38 }
0x2ef9   :  { %v9506_v41 = vpop.xlane.xlu0 %9505 }
0x2efa   :  { %v9528_v42 = vsub.f32 %v8982_v4, %v9506_v41 }
0x2efc   :  { %v9536_v43 = vmul.f32 1.442695, %v9528_v42 }
0x2efe   :  { %9592 = vrot.lane.b32.xlu1 %v13726_v54, %s12631_s23  ;;  %12485 = vpow2.f32 %v9536_v43 }
0x2f02   :  { %9744 = vrot.lane.b32.xlu1 %v13761_v60, %s12631_s23 }
0x2f06   :  { %9820 = vrot.lane.b32.xlu1 %v13754_v59, %s12631_s23 }
0x2f07   :  { %9668 = vrot.lane.b32.xlu0 %v13756_v50, %s12631_s23 }
0x2f08   :  { %v13828_v44 = vpop.eup %12485 }
0x2f09   :  { %v9552_v24 = vsel %vm167_vm2, %v13828_v44, 0.0 }
0x2f0a   :  { %9972 = vrot.lane.b32.xlu1 %v13766_v61, %s12631_s23 }
0x2f0b   :  { %9896 = vrot.lane.b32.xlu0 %v13738_v47, %s12631_s23 }
0x2f2e   :  { %9553 = vadd.xlane.f32.xlu1 %v9552_v24 }
0x2f6f   :  { %v9509_v45 = vpop.xlane.xlu1 %9508 }
0x2f70   :  { %v9529_v18 = vsub.f32 %v9056_v14, %v9509_v45 }
0x2f72   :  { %v9538_v20 = vmul.f32 1.442695, %v9529_v18  ;;  %v9512_v28 = vpop.xlane.xlu0 %9511 }
0x2f73   :  { %v9530_v23 = vsub.f32 %v9130_v15, %v9512_v28 }
0x2f74   :  { %12487 = vpow2.f32 %v9538_v20 }
0x2f75   :  { %v9540_v48 = vmul.f32 1.442695, %v9530_v23 }
0x2f76   :  { %v9518_v49 = vpop.xlane.xlu1 %9517  ;;  %v9515_v51 = vpop.xlane.xlu0 %9514 }
0x2f77   :  { %12489 = vpow2.f32 %v9540_v48  ;;  %v9532_v52 = vsub.f32 %v9278_v21, %v9518_v49  ;;  %v9531_v53 = vsub.f32 %v9204_v39, %v9515_v51 }
0x2f79   :  { %v9544_v7 = vmul.f32 1.442695, %v9532_v52  ;;  %v9542_v8 = vmul.f32 1.442695, %v9531_v53  ;;  %v10230_v52 = vld [vmem:[#allocation7 + $0x388] sm:$0xff]  ;;  %v10231_v53 = vld [vmem:[#allocation7 + $0x390] sm:$0xff] }
0x2f7a   :  { %v9524_v12 = vpop.xlane.xlu1 %9523  ;;  %v9521_v11 = vpop.xlane.xlu0 %9520 }
0x2f7b   :  { %12491 = vpow2.f32 %v9544_v7  ;;  %v9534_v54 = vsub.f32 %v9426_v30, %v9524_v12  ;;  %v9533_v55 = vsub.f32 %v9352_v25, %v9521_v11  ;;  %v12218_v7 = vpack.c.bf16 %v10231_v53, %v10230_v52  ;;  %v10232_v12 = vld [vmem:[#allocation7 + $0x398] sm:$0xff]  ;;  %v10233_v11 = vld [vmem:[#allocation7 + $0x3a0] sm:$0xff]  ;;  %v10372_v52 = vld [vmem:[#allocation7 + $0x410] sm:$0xff] }
0x2f7c   :  { %12493 = vpow2.f32 %v9542_v8 }
0x2f7d   :  { %v9548_v56 = vmul.f32 1.442695, %v9534_v54  ;;  %v9546_v57 = vmul.f32 1.442695, %v9533_v55  ;;  %v12222_v55 = vpack.c.bf16 %v10233_v11, %v10232_v12 }
0x2f7e   :  { %v12488_v58 = vpop.eup %12487  ;;  %v9593_v47 = vpop.permute.xlu1 %9592 }
0x2f7f   :  { %v9527_v59 = vpop.xlane.xlu0 %9526  ;;  %12495 = vpow2.f32 %v9548_v56  ;;  %11951 = vmatpush3.msra.mxu0 %v9593_v47  ;;  %v9555_v60 = vsel %vm167_vm2, %v12488_v58, 0.0 }
0x2f80   :  { %v9535_v50 = vsub.f32 %v9500_v32, %v9527_v59  ;;  %12497 = vpow2.f32 %v9546_v57  ;;  %9556 = vadd.xlane.f32.xlu0 %v9555_v60  ;;  %11960 = vmatprep.subr.mxu0 %v12626_v10 }
0x2f81   :  { %v12490_v19 = vpop.eup %12489 }
0x2f82   :  { %v9550_v61 = vmul.f32 1.442695, %v9535_v50  ;;  %v9558_v62 = vsel %vm167_vm2, %v12490_v19, 0.0  ;;  %v9745_v40 = vpop.permute.xlu1 %9744 }
0x2f83   :  { %v9669_v46 = vpop.permute.xlu0 %9668  ;;  %9559 = vadd.xlane.f32.xlu1 %v9558_v62 }
0x2f84   :  { %12499 = vpow2.f32 %v9550_v61  ;;  %11956 = vmatpush3.msra.mxu1 %v9669_v46 }
0x2f85   :  { %11965 = vmatprep.subr.mxu1 %v12626_v10  ;;  %v12492_v63 = vpop.eup %12491 }
0x2f86   :  { %v12494_v2 = vpop.eup %12493  ;;  %v9564_v3 = vsel %vm167_vm2, %v12492_v63, 0.0  ;;  %v9821_v39 = vpop.permute.xlu1 %9820 }
0x2f87   :  { %9565 = vadd.xlane.f32.xlu1 %v9564_v3  ;;  %v9561_v4 = vsel %vm167_vm2, %v12494_v2, 0.0 }
0x2f88   :  { %9562 = vadd.xlane.f32.xlu0 %v9561_v4 }
0x2f89   :  { %v12496_v6 = vpop.eup %12495 }
0x2f8a   :  { %v12498_v13 = vpop.eup %12497  ;;  %v9570_v14 = vsel %vm167_vm2, %v12496_v6, 0.0  ;;  %v9973_v16 = vpop.permute.xlu1 %9972 }
0x2f8b   :  { %9571 = vadd.xlane.f32.xlu1 %v9570_v14  ;;  %v9567_v36 = vsel %vm167_vm2, %v12498_v13, 0.0 }
0x2f8c   :  { %9568 = vadd.xlane.f32.xlu0 %v9567_v36 }
0x2f8e   :  { %v13840_v35 = vpop.eup %12499 }
0x2f8f   :  { %v9573_v15 = vsel %vm167_vm2, %v13840_v35, 0.0 }
0x2f90   :  { %9574 = vadd.xlane.f32.xlu0 %v9573_v15 }
0x2f9c   :  { %10124 = vrot.lane.b32.xlu1 %v13787_v1, %s12631_s23  ;;  %v9897_v1 = vpop.permute.xlu0 %9896 }
0x2fa6   :  { %10048 = vrot.lane.b32.xlu0 %v13783_v0, %s12631_s23 }
0x2fbb   :  { %v9554_v17 = vpop.xlane.xlu1 %9553 }
0x2fbc   :  { %12501 = vrcp.f32 %v9554_v17 }
0x2fc6   :  { %v12502_v21 = vpop.eup %12501 }
0x2fc7   :  { %v9577_v22 = vmul.f32 %v12502_v21, %v13828_v44 }
0x2fc9   :  { %11953 = vmatmul.mubr.msk.f32.vlgmr.msra.gmra.mrb[96].mxu0 %vm167_vm2, %v9577_v22 }
0x2fca   :  { %11961 = vmatpush3.msra.mxu0 %v9745_v40  ;;  %11962 = vmatprep.mubr.msk.f32.mxu0 %vm12629_vm1, %v12626_v10 }
0x2fcb   :  { %11970 = vmatprep.subr.mxu0 %v12626_v10 }
0x300d   :  { %v9557_v25 = vpop.xlane.xlu0 %9556 }
0x300e   :  { %12503 = vrcp.f32 %v9557_v25 }
0x3010   :  { %v9560_v0 = vpop.xlane.xlu1 %9559 }
0x3011   :  { %12505 = vrcp.f32 %v9560_v0 }
0x3014   :  { %v9566_v26 = vpop.xlane.xlu1 %9565 }
0x3015   :  { %12507 = vrcp.f32 %v9566_v26  ;;  %v9563_v27 = vpop.xlane.xlu0 %9562 }
0x3016   :  { %12509 = vrcp.f32 %v9563_v27 }
0x3018   :  { %v12504_v29 = vpop.eup %12503  ;;  %v9572_v30 = vpop.xlane.xlu1 %9571 }
0x3019   :  { %v9579_v31 = vmul.f32 %v12504_v29, %v12488_v58  ;;  %12511 = vrcp.f32 %v9572_v30  ;;  %v9569_v32 = vpop.xlane.xlu0 %9568 }
0x301a   :  { %12513 = vrcp.f32 %v9569_v32 }
0x301b   :  { %v12506_v33 = vpop.eup %12505  ;;  %11958 = vmatmul.mubr.msk.f32.vlgmr.msra.gmra.mrb[118].mxu1 %vm167_vm2, %v9579_v31 }
0x301c   :  { %v9581_v34 = vmul.f32 %v12506_v33, %v12490_v19  ;;  %11966 = vmatpush3.msra.mxu1 %v9821_v39  ;;  %11967 = vmatprep.mubr.msk.f32.mxu1 %vm12629_vm1, %v12626_v10  ;;  %v10125_v28 = vpop.permute.xlu1 %10124 }
0x301d   :  { %v9575_v37 = vpop.xlane.xlu0 %9574  ;;  %11975 = vmatprep.subr.mxu1 %v12626_v10 }
0x301e   :  { %12515 = vrcp.f32 %v9575_v37  ;;  %11963 = vmatmul.mubr.msk.f32.vlgmr.msra.gmra.mrb[98].mxu0 %vm167_vm2, %v9581_v34 }
0x301f   :  { %v12508_v38 = vpop.eup %12507  ;;  %11971 = vmatpush3.msra.mxu0 %v9897_v1  ;;  %11972 = vmatprep.mubr.msk.f32.mxu0 %vm12629_vm1, %v12626_v10 }
0x3020   :  { %v12510_v41 = vpop.eup %12509  ;;  %v9585_v42 = vmul.f32 %v12508_v38, %v12492_v63  ;;  %11980 = vmatprep.subr.mxu0 %v12626_v10 }
0x3021   :  { %v9583_v43 = vmul.f32 %v12510_v41, %v12494_v2  ;;  %v10049_v44 = vpop.permute.xlu0 %10048 }
0x3022   :  { %11973 = vmatmul.mubr.msk.f32.vlgmr.msra.gmra.mrb[100].mxu0 %vm167_vm2, %v9585_v42  ;;  %v10363_v42 = vld [vmem:[#allocation7 + $0x3c8] sm:$0xff] }
0x3023   :  { %v12512_v24 = vpop.eup %12511  ;;  %11968 = vmatmul.mubr.msk.f32.vlgmr.msra.gmra.mrb[120].mxu1 %vm167_vm2, %v9583_v43  ;;  %11981 = vmatpush3.msra.mxu0 %v10049_v44  ;;  %v10364_v44 = vld [vmem:[#allocation7 + $0x3d0] sm:$0xff] }
0x3024   :  { %v12514_v45 = vpop.eup %12513  ;;  %v9589_v18 = vmul.f32 %v12512_v24, %v12496_v6  ;;  %11976 = vmatpush3.msra.mxu1 %v9973_v16  ;;  %11977 = vmatprep.mubr.msk.f32.mxu1 %vm12629_vm1, %v12626_v10  ;;  %v10915_v16 = vld [vmem:[#allocation7 + $0x3a8] ss:$0 sm:$0xff]  ;;  %v10365_v24 = vld [vmem:[#allocation7 + $0x3d8] sm:$0xff] }
0x3025   :  { %v9587_v20 = vmul.f32 %v12514_v45, %v12498_v13  ;;  %11982 = vmatprep.mubr.msk.f32.mxu0 %vm12629_vm1, %v12626_v10  ;;  %11985 = vmatprep.subr.mxu1 %v12626_v10  ;;  %v12230_v45 = vpack.c.bf16 %v10365_v24, %v10364_v44 }
0x3026   :  { %11983 = vmatmul.mubr.msk.f32.vlgmr.msra.gmra.mrb[102].mxu0 %vm167_vm2, %v9589_v18  ;;  %12219 = vmatprep.subr.bf16.mxu0 %v12218_v7  ;;  %v10367_v18 = vld [vmem:[#allocation7 + $0x3e8] sm:$0xff] }
0x3027   :  { %11978 = vmatmul.mubr.msk.f32.vlgmr.msra.gmra.mrb[122].mxu1 %vm167_vm2, %v9587_v20  ;;  %12221 = vmatpush3.bf16.msra.mxu0 %v12218_v7  ;;  %v10368_v20 = vld [vmem:[#allocation7 + $0x3f0] sm:$0xff] }
0x3028   :  { %v12516_v23 = vpop.eup %12515  ;;  %11986 = vmatpush3.msra.mxu1 %v10125_v28  ;;  %11987 = vmatprep.mubr.msk.f32.mxu1 %vm12629_vm1, %v12626_v10  ;;  %v10369_v28 = vld [vmem:[#allocation7 + $0x3f8] sm:$0xff] }
0x3029   :  { %v9591_v48 = vmul.f32 %v12516_v23, %v13840_v35  ;;  %12223 = vmatprep.subr.bf16.mxu0 %v12222_v55  ;;  %v12234_v23 = vpack.c.bf16 %v10368_v20, %v10367_v18 }
0x302b   :  { %11988 = vmatmul.mubr.msk.f32.vlgmr.msra.gmra.mrb[124].mxu1 %vm167_vm2, %v9591_v48  ;;  %12225 = vmatpush3.bf16.msra.mxu0 %v12222_v55  ;;  %v10370_v48 = vld [vmem:[#allocation7 + $0x400] sm:$0xff] }
0x302c   :  { %12235 = vmatprep.subr.bf16.mxu0 %v12234_v23 }
0x309c   :  { %v9664_v49 = vpop.f32.mrb[96].mxu0 }
0x309d   :  { %v11954_v51 = vpop.f32.mrb[97].mxu0 }
0x309e   :  { %v10371_v51 = vld [vmem:[#allocation7 + $0x408] sm:$0xff] }
0x309f   :  { %v12242_v53 = vpack.c.bf16 %v10372_v52, %v10371_v51  ;;  %v10927_v52 = vld [vmem:[#allocation7 + $0x438] ss:$0 sm:$0xff] }
0x30ee   :  { %v9740_v8 = vpop.f32.mrb[118].mxu1 }
0x30ef   :  { %10201 = vrot.lane.b32.xlu0 %v9740_v8, %s12624_s25  ;;  %v11959_v54 = vpop.f32.mrb[119].mxu1 }
0x30f1   :  { %v9816_v56 = vpop.f32.mrb[98].mxu0 }
0x30f2   :  { %10205 = vrot.lane.b32.xlu1 %v9816_v56, %s12633_s27  ;;  %v11964_v10 = vpop.f32.mrb[99].mxu0 }
0x30f3   :  { %v10918_v10 = vld [vmem:[#allocation7 + $0x3b0] ss:$0 sm:$0xff] }
0x30f5   :  { %v9968_v57 = vpop.f32.mrb[100].mxu0 }
0x30f6   :  { %v9892_v58 = vpop.f32.mrb[120].mxu1  ;;  %v11974_v47 = vpop.f32.mrb[101].mxu0 }
0x30f7   :  { %10209 = vrot.lane.b32.xlu1 %v9892_v58, %s12634_s28  ;;  %v11969_v59 = vpop.f32.mrb[121].mxu1  ;;  %v10919_v58 = vld [vmem:[#allocation7 + $0x3b8] ss:$0 sm:$0xff] }
0x30f9   :  { %v10120_v50 = vpop.f32.mrb[102].mxu0 }
0x30fa   :  { %v10044_v60 = vpop.f32.mrb[122].mxu1  ;;  %v11984_v19 = vpop.f32.mrb[103].mxu0 }
0x30fb   :  { %10216 = vrot.lane.b32.xlu0 %v10044_v60, %s12624_s25  ;;  %v11979_v61 = vpop.f32.mrb[123].mxu1 }
0x30fe   :  { %v10196_v46 = vpop.f32.mrb[124].mxu1 }
0x30ff   :  { %10220 = vrot.lane.b32.xlu0 %v10120_v50, %s12633_s27  ;;  %10224 = vrot.lane.b32.xlu1 %v10196_v46, %s12634_s28  ;;  %v11989_v62 = vpop.f32.mrb[125].mxu1  ;;  %v10373_v46 = vld [vmem:[#allocation7 + $0x418] sm:$0xff] }
0x3100   :  { %v10374_v62 = vld [vmem:[#allocation7 + $0x420] sm:$0xff] }
0x3161   :  { %v10202_v2 = vpop.permute.xlu0 %10201 }
0x3162   :  { %v10212_v3 = vsel %vm167_vm2, %v9664_v49, %v10202_v2  ;;  %v12238_v49 = vpack.c.bf16 %v10370_v48, %v10369_v28  ;;  %v10920_v2 = vld [vmem:[#allocation7 + $0x3e0] ss:$0 sm:$0xff] }
0x3164   :  { %v10206_v63 = vpop.permute.xlu1 %10205 }
0x3165   :  { %v10213_v4 = vsel %vm1483_vm3, %v10212_v3, %v10206_v63  ;;  %v12246_v63 = vpack.c.bf16 %v10374_v62, %v10373_v46 }
0x3169   :  { %v10210_v6 = vpop.permute.xlu1 %10209 }
0x316a   :  { %v10214_v13 = vsel %vm1485_vm4, %v10213_v4, %v10210_v6 }
0x316b   :  { %11998 = vmatprep.mubr.msk.f32.mxu0 %vm69_vm0, %v10214_v13 }
0x316d   :  { %v10217_v14 = vpop.permute.xlu0 %10216 }
0x316e   :  { %v10227_v36 = vsel %vm167_vm2, %v9968_v57, %v10217_v14 }
0x3171   :  { %v10221_v35 = vpop.permute.xlu0 %10220  ;;  %v10225_v15 = vpop.permute.xlu1 %10224 }
0x3172   :  { %v10228_v40 = vsel %vm1483_vm3, %v10227_v36, %v10221_v35  ;;  %v10923_v35 = vld [vmem:[#allocation7 + $0x428] ss:$0 sm:$0xff] }
0x3173   :  { %v10229_v39 = vsel %vm1485_vm4, %v10228_v40, %v10225_v15 }
0x3174   :  { %11999 = vmatmul.mubr.msk.f32.vlgmr.msra.gmra.mrb[104].mxu0 %vm69_vm0, %v10229_v39 }
0x3175   :  { %12237 = vmatpush3.bf16.msra.mxu0 %v12234_v23  ;;  %v10926_v23 = vld [vmem:[#allocation7 + $0x430] ss:$0 sm:$0xff] }
0x3176   :  { %12239 = vmatprep.subr.bf16.mxu0 %v12238_v49 }
0x3179   :  { %12241 = vmatpush3.bf16.msra.mxu0 %v12238_v49 }
0x317a   :  { %12243 = vmatprep.subr.bf16.mxu0 %v12242_v53 }
0x317d   :  { %12245 = vmatpush3.bf16.msra.mxu0 %v12242_v53 }
0x317e   :  { %12247 = vmatprep.subr.bf16.mxu0 %v12246_v63 }
0x3181   :  { %12249 = vmatpush3.bf16.msra.mxu0 %v12246_v63 }
0x3247   :  { %v12000_v17 = vpop.f32.mrb[104].mxu0 }
0x3248   :  { %v10317_v21 = vadd.f32 %v12000_v17, %v10915_v16  ;;  %v10311_v22 = vpop.f32.mrb[105].mxu0 }
0x3249   :  { %v10312_v1 = vadd.f32 %v10915_v16, %v10311_v22 }
0x324a   :  { %v10321_v25 = vadd.f32 %v10317_v21, %v13718_v9 }
0x324b   :  { %v10320_v0 = vadd.f32 %v10312_v1, %v13716_v5  ;;  %v10362_v5 = vld [vmem:[#allocation7 + $0x3c0] sm:$0xff] }
0x324c   :  { %v10327_v26 = vsel %vm69_vm0, %v10321_v25, 0.0  ;;  %v12226_v43 = vpack.c.bf16 %v10363_v42, %v10362_v5  ;;  %v10593_v5 = vld [vmem:[#allocation7 + $0x458] sm:$0xff] }
0x324d   :  { %10328 = vadd.xlane.f32.xlu1 %v10327_v26  ;;  %v10324_v27 = vsel %vm69_vm0, %v10320_v0, 0.0 }
0x324e   :  { %10325 = vadd.xlane.f32.xlu0 %v10324_v27  ;;  %12227 = vmatprep.subr.bf16.mxu1 %v12226_v43 }
0x324f   :  { %12229 = vmatpush3.bf16.msra.mxu1 %v12226_v43 }
0x3250   :  { %12231 = vmatprep.subr.bf16.mxu1 %v12230_v45 }
0x3253   :  { %12233 = vmatpush3.bf16.msra.mxu1 %v12230_v45 }
0x32da   :  { %v10329_v29 = vpop.xlane.xlu1 %10328 }
0x32db   :  { %v10331_v30 = vmul.f32 0.03125, %v10329_v29  ;;  %v10326_v31 = vpop.xlane.xlu0 %10325 }
0x32dc   :  { %v10330_v32 = vmul.f32 0.03125, %v10326_v31 }
0x32dd   :  { %v10333_v33 = vsub.f32 %v10321_v25, %v10331_v30 }
0x32de   :  { %v10332_v34 = vsub.f32 %v10320_v0, %v10330_v32 }
0x32df   :  { %v10335_v41 = vmul.f32 %v10333_v33, %v10333_v33 }
0x32e0   :  { %v10334_v37 = vmul.f32 %v10332_v34, %v10332_v34 }
0x32e1   :  { %v10339_v9 = vsel %vm69_vm0, %v10335_v41, 0.0 }
0x32e2   :  { %v10336_v38 = vsel %vm69_vm0, %v10334_v37, 0.0  ;;  %v10590_v37 = vld [vmem:[#allocation7 + $0x440] sm:$0xff] }
0x32e3   :  { %10337 = vadd.xlane.f32.xlu0 %v10336_v38  ;;  %v10591_v38 = vld [vmem:[#allocation7 + $0x448] sm:$0xff] }
0x32e4   :  { %v12250_v41 = vpack.c.bf16 %v10591_v38, %v10590_v37 }
0x32e6   :  { %12251 = vmatprep.subr.bf16.mxu1 %v12250_v41 }
0x32e7   :  { %10340 = vadd.xlane.f32.xlu0 %v10339_v9  ;;  %v10592_v9 = vld [vmem:[#allocation7 + $0x450] sm:$0xff] }
0x32e8   :  { %v12254_v42 = vpack.c.bf16 %v10593_v5, %v10592_v9 }
0x3370   :  { %v10338_v7 = vpop.xlane.xlu0 %10337 }
0x3371   :  { %v10342_v8 = vmul.f32 0.03125, %v10338_v7 }
0x3373   :  { %v10344_v12 = vadd.f32 1e-05, %v10342_v8 }
0x3374   :  { %v10341_v11 = vpop.xlane.xlu0 %10340 }
0x3375   :  { %12517 = vrsqrt.f32 %v10344_v12  ;;  %v10343_v54 = vmul.f32 0.03125, %v10341_v11  ;;  %v10928_v11 = vld [vmem:[#allocation7 + $0x460] ss:$0 sm:$0xff] }
0x3377   :  { %v10345_v55 = vadd.f32 1e-05, %v10343_v54 }
0x3379   :  { %12519 = vrsqrt.f32 %v10345_v55 }
0x337f   :  { %v12518_v56 = vpop.eup %12517 }
0x3380   :  { %v10348_v57 = vmul.f32 %v12518_v56, %v10332_v34 }
0x3382   :  { %v10354_v47 = vmul.f32 %v10918_v10, %v10348_v57 }
0x3383   :  { %v12520_v59 = vpop.eup %12519 }
0x3384   :  { %v10349_v50 = vmul.f32 %v12520_v59, %v10333_v33  ;;  %v10360_v60 = vadd.f32 %v10919_v58, %v10354_v47 }
0x3386   :  { %v10355_v19 = vmul.f32 %v10918_v10, %v10349_v50  ;;  %12009 = vmatprep.mubr.msk.f32.mxu1 %vm69_vm0, %v10360_v60 }
0x3388   :  { %v10361_v61 = vadd.f32 %v10919_v58, %v10355_v19 }
0x338a   :  { %12010 = vmatmul.mubr.msk.f32.vlgmr.msra.gmra.mrb[126].mxu1 %vm69_vm0, %v10361_v61 }
0x338b   :  { %12253 = vmatpush3.bf16.msra.mxu1 %v12250_v41 }
0x338c   :  { %12255 = vmatprep.subr.bf16.mxu1 %v12254_v42 }
0x338f   :  { %12257 = vmatpush3.bf16.msra.mxu1 %v12254_v42 }
0x345d   :  { %v12011_v3 = vpop.f32.mrb[126].mxu1 }
0x345e   :  { %v10458_v4 = vadd.f32 %v12011_v3, %v10920_v2  ;;  %v10452_v6 = vpop.f32.mrb[127].mxu1 }
0x345f   :  { %v10453_v13 = vadd.f32 %v10920_v2, %v10452_v6 }
0x3460   :  { %v10462_v36 = vmax.f32 %v10458_v4, 0.0 }
0x3461   :  { %v10461_v14 = vmax.f32 %v10453_v13, 0.0 }
0x3463   :  { %12028 = vmatprep.mubr.msk.f32.mxu0 %vm1740_vm5, %v10461_v14 }
0x3464   :  { %12029 = vmatmul.mubr.msk.f32.vlgmr.msra.gmra.mrb[106].mxu0 %vm1740_vm5, %v10462_v36 }
0x3537   :  { %v12030_v15 = vpop.f32.mrb[106].mxu0 }
0x3538   :  { %v10545_v40 = vadd.f32 %v12030_v15, %v10923_v35  ;;  %v10539_v39 = vpop.f32.mrb[107].mxu0 }
0x3539   :  { %v10540_v16 = vadd.f32 %v10923_v35, %v10539_v39 }
0x353a   :  { %v10549_v17 = vadd.f32 %v10545_v40, %v10361_v61 }
0x353b   :  { %v10548_v21 = vadd.f32 %v10540_v16, %v10360_v60 }
0x353c   :  { %v10555_v22 = vsel %vm69_vm0, %v10549_v17, 0.0 }
0x353d   :  { %10556 = vadd.xlane.f32.xlu0 %v10555_v22  ;;  %v10552_v1 = vsel %vm69_vm0, %v10548_v21, 0.0 }
0x353e   :  { %10553 = vadd.xlane.f32.xlu1 %v10552_v1 }
0x35ca   :  { %v10557_v25 = vpop.xlane.xlu0 %10556 }
0x35cb   :  { %v10559_v0 = vmul.f32 0.03125, %v10557_v25  ;;  %v10554_v26 = vpop.xlane.xlu1 %10553 }
0x35cc   :  { %v10558_v27 = vmul.f32 0.03125, %v10554_v26 }
0x35cd   :  { %v10561_v29 = vsub.f32 %v10549_v17, %v10559_v0 }
0x35ce   :  { %v10560_v30 = vsub.f32 %v10548_v21, %v10558_v27 }
0x35cf   :  { %v10563_v31 = vmul.f32 %v10561_v29, %v10561_v29 }
0x35d0   :  { %v10562_v32 = vmul.f32 %v10560_v30, %v10560_v30 }
0x35d1   :  { %v10567_v33 = vsel %vm69_vm0, %v10563_v31, 0.0 }
0x35d2   :  { %10568 = vadd.xlane.f32.xlu0 %v10567_v33  ;;  %v10564_v34 = vsel %vm69_vm0, %v10562_v32, 0.0 }
0x35d3   :  { %10565 = vadd.xlane.f32.xlu1 %v10564_v34 }
0x365f   :  { %v10569_v43 = vpop.xlane.xlu0 %10568 }
0x3660   :  { %v10571_v44 = vmul.f32 0.03125, %v10569_v43  ;;  %v10566_v24 = vpop.xlane.xlu1 %10565 }
0x3661   :  { %v10570_v45 = vmul.f32 0.03125, %v10566_v24 }
0x3662   :  { %v10573_v18 = vadd.f32 1e-05, %v10571_v44 }
0x3663   :  { %v10572_v20 = vadd.f32 1e-05, %v10570_v45 }
0x3664   :  { %12521 = vrsqrt.f32 %v10573_v18 }
0x3665   :  { %12523 = vrsqrt.f32 %v10572_v20 }
0x366e   :  { %v12522_v28 = vpop.eup %12521 }
0x366f   :  { %v12524_v48 = vpop.eup %12523  ;;  %v10577_v49 = vmul.f32 %v12522_v28, %v10561_v29 }
0x3670   :  { %v10576_v51 = vmul.f32 %v12524_v48, %v10560_v30 }
0x3671   :  { %v10583_v53 = vmul.f32 %v10926_v23, %v10577_v49 }
0x3672   :  { %v10582_v7 = vmul.f32 %v10926_v23, %v10576_v51 }
0x3673   :  { %v10589_v12 = vadd.f32 %v10927_v52, %v10583_v53 }
0x3674   :  { %v10588_v8 = vadd.f32 %v10927_v52, %v10582_v7 }
0x3676   :  { %12039 = vmatprep.mubr.msk.f32.mxu1 %vm69_vm0, %v10588_v8 }
0x3677   :  { %12040 = vmatmul.mubr.msk.f32.vlgmr.msra.gmra.mrb[128].mxu1 %vm69_vm0, %v10589_v12 }
0x374a   :  { %v12041_v54 = vpop.f32.mrb[128].mxu1 }
0x374b   :  { %v10677_v55 = vadd.f32 %v12041_v54, %v10928_v11  ;;  %v10671_v56 = vpop.f32.mrb[129].mxu1 }
0x374c   :  { %v10672_v10 = vadd.f32 %v10928_v11, %v10671_v56 }
0x374d   :  { %10681 = vst.msk [vmem:[#allocation8 + $0x8] sm:$0xff] %vm69_vm0, %v10677_v55 }
0x374e   :  { %10680 = vst.msk [vmem:[#allocation8] sm:$0xff] %vm69_vm0, %v10672_v10 }
0x374f   :  { %12604 = shalt.err (!%p12601_p0)
}
0x3750   :  { %s12605_s7 = scalar_lea.hbm %s13924_s3, 256 }
0x3751   :  { %p12606_p1 = scmp.ne.s32.totalorder %s13924_s3, %s12605_s7  ;;  %p12609_p2 = scmp.lt.u32.totalorder %s12605_s7, %s13924_s3 }
0x3753   :  { %p12611_p3 = pnand %p12609_p2, %p12606_p1 }
0x3755   :  { %12614 = shalt.err (!%p12611_p3)
}
0x3756   :  { %10693 = dma.vmem_to_hbm [thread:$0]  %s10688_s30, 256, %s13924_s3, [#allocation4], %s12623_s24, %s12623_s24, %s12624_s25  }
0x3757   :  { %12619 = dma.done.wait [#allocation4], 256  }
0x3758   :  { %12620 = vsyncadd [#allocation4], 4294967040 }
0x3759   :  { %10697 = vsyncpa [#allocation3], 1 }
0x375a   :  { %10698 = vsyncpa [#allocation6], 1 }
0x375b   :  { %10699 = vsyncpa [#allocation4], 1 }

</bundles_post_ra>
